<compile_context>
chip_gen: v7x
topology: tpu7x:2x2x1
jax: 0.10.0
libtpu: 0.0.40
codegen_flags: <defaults>
</compile_context>

<pallas_src>
import functools

import jax
import jax.numpy as jnp
from jax.experimental import pallas as pl
from jax.experimental.pallas import tpu as pltpu

EMB_DIM = 70          # logical channel width of the PyTorch model
F_PAD   = 128         # channel dim padded to one full lane tile
F4_PAD  = 4 * F_PAD   # [mean | min | max | std] concat width (lane aligned)
F3_PAD  = 3 * F_PAD   # [identity | amplification | attenuation] output width
N_PAD   = 128         # padded node count
E_PAD   = 64          # padded edge count (>= real E, multiple of 16 for bf16)
G_PAD   = 8           # padded graph count (sublane multiple)
LAYERS  = 4
_BIG    = 1e30


# ------------------------------ fused kernel --------------------------------

def _net_fused_kernel(
    # scalar prefetch (SMEM)
    tgt_ids_ref,                                    # [E_PAD] int32 edge -> target node
    # graph structure / per-node constants (constant index maps, fetched once)
    x0_ref, src_oh_ref, tgt_oh_ref, adj_ref, scal_ref, pool_ref,
    # per-layer weights (blocked over the layer grid axis -> double buffered)
    pre_a_ref, pre_b_ref, pre_bias_ref,
    w_x_ref, w_ag_ref, post_bias_ref, bn_scale_ref, bn_shift_ref,
    # MLP head (constant)
    mw1_ref, mb1_ref, mw2_ref, mb2_ref, mw3_ref, mb3_ref,
    # output
    out_ref,
    # VMEM scratch (persist across grid steps)
    x_ref, msg_ref, mn_ref, mx_ref,
    *, num_edges,
):
    l = pl.program_id(0)

    @pl.when(l == 0)
    def _():
        x_ref[...] = x0_ref[...]                    # AtomEncoder output -> resident state

    x = x_ref[...]                                  # [N, F] f32
    xb = x.astype(jnp.bfloat16)

    # --- message: pre_nn([x_i || x_j]) without materializing the concat ---
    # gathers x[tgt], x[src] via one-hot @ x on the MXU (x stays in VMEM)
    x_tgt = jnp.dot(tgt_oh_ref[...], xb, preferred_element_type=jnp.float32)
    x_src = jnp.dot(src_oh_ref[...], xb, preferred_element_type=jnp.float32)
    msg = (jnp.dot(x_tgt.astype(jnp.bfloat16), pre_a_ref[...],
                   preferred_element_type=jnp.float32)
           + jnp.dot(x_src.astype(jnp.bfloat16), pre_b_ref[...],
                     preferred_element_type=jnp.float32)
           + pre_bias_ref[...])                     # [E, F] f32
    msg_ref[...] = msg

    # --- mean / std via MXU scatter-sums (f32: variance cancellation) ---
    adj = adj_ref[...]                              # [N, E] f32 (zero cols for pad edges)
    s   = jnp.dot(adj, msg, preferred_element_type=jnp.float32)
    ssq = jnp.dot(adj, msg * msg, preferred_element_type=jnp.float32)

    inv_deg = scal_ref[0]                           # [N, 1] 1 / clamp(in_degree, 1)
    has_in  = scal_ref[1]                           # [N, 1] 1.0 if in_degree > 0
    s_amp   = scal_ref[2]                           # [N, 1] log(deg+1)/avg_log
    s_att   = scal_ref[3]                           # [N, 1] avg_log/log(deg+1)

    mean = s * inv_deg
    var  = ssq * inv_deg - mean * mean
    std  = jnp.sqrt(jnp.maximum(var, 0.0) + 1e-5)

    # --- min / max: per-edge segment updates into VMEM scratch (no cube) ---
    mn_ref[...] = jnp.full((N_PAD, F_PAD), _BIG, jnp.float32)
    mx_ref[...] = jnp.full((N_PAD, F_PAD), -_BIG, jnp.float32)
    for e in range(num_edges):                      # real edge count, fully unrolled
        t = tgt_ids_ref[e]
        m = msg_ref[pl.ds(e, 1), :]                 # [1, F] f32
        mn_ref[pl.ds(t, 1), :] = jnp.minimum(mn_ref[pl.ds(t, 1), :], m)
        mx_ref[pl.ds(t, 1), :] = jnp.maximum(mx_ref[pl.ds(t, 1), :], m)

    mn = jnp.where(has_in > 0, mn_ref[...], 0.0)    # isolated nodes -> 0 (f32 masking)
    mx = jnp.where(has_in > 0, mx_ref[...], 0.0)

    # --- post_nn folded with lin; bf16 concat; single fused aggregate matmul ---
    agg4b = jnp.concatenate(
        [mean.astype(jnp.bfloat16), mn.astype(jnp.bfloat16),
         mx.astype(jnp.bfloat16), std.astype(jnp.bfloat16)], axis=-1)   # [N, 4F] bf16
    slab = jnp.dot(agg4b, w_ag_ref[...], preferred_element_type=jnp.float32)  # [N, 3F]
    h = jnp.dot(xb, w_x_ref[...], preferred_element_type=jnp.float32)
    h = (h + slab[:, 0:F_PAD]
           + s_amp * slab[:, F_PAD:2 * F_PAD]
           + s_att * slab[:, 2 * F_PAD:3 * F_PAD]
           + post_bias_ref[...])

    # --- x = relu(BN(h)) + x ; dropout(0.3) is identity in eval mode ---
    x_new = jnp.maximum(h * bn_scale_ref[...] + bn_shift_ref[...], 0.0) + x
    x_ref[...] = x_new

    # --- global_mean_pool + MLP head on the final layer ---
    @pl.when(l == LAYERS - 1)
    def _():
        g = jnp.dot(pool_ref[...], x_new, preferred_element_type=jnp.float32)   # [G, F]
        g = jnp.maximum(jnp.dot(g.astype(jnp.bfloat16), mw1_ref[...],
                                preferred_element_type=jnp.float32) + mb1_ref[...], 0.0)
        g = jnp.maximum(jnp.dot(g.astype(jnp.bfloat16), mw2_ref[...],
                                preferred_element_type=jnp.float32) + mb2_ref[...], 0.0)
        out_ref[...] = jnp.dot(g.astype(jnp.bfloat16), mw3_ref[...],
                               preferred_element_type=jnp.float32) + mb3_ref[...]


# --------------------------- parameter handling ------------------------------

def _pad2(a, rows, cols, dtype=None):
    dtype = dtype or a.dtype
    out = jnp.zeros((rows, cols), dtype)
    return out.at[: a.shape[0], : a.shape[1]].set(a.astype(dtype))


def _pad_row(v, cols, dtype=jnp.float32):
    out = jnp.zeros((1, cols), dtype)
    return out.at[0, : v.shape[0]].set(v.astype(dtype))


def init_params(key, atom_vocab_sizes, deg_histogram):
    """Raw (PyTorch-shaped) parameters for Net(degree)."""
    keys = iter(jax.random.split(key, 64))

    def dense(k, fan_in, fan_out):
        return jax.random.normal(k, (fan_in, fan_out), jnp.float32) / jnp.sqrt(fan_in)

    params = {}
    params['atom_emb'] = [
        jax.random.normal(next(keys), (v, EMB_DIM), jnp.float32) * 0.1
        for v in atom_vocab_sizes
    ]
    bins = jnp.arange(deg_histogram.shape[0], dtype=jnp.float32)
    params['avg_log'] = (jnp.sum(jnp.log(bins + 1.0) * deg_histogram)
                         / jnp.sum(deg_histogram))

    layers = []
    for _ in range(LAYERS):
        layers.append(dict(
            pre_w=dense(next(keys), 2 * EMB_DIM, EMB_DIM),     # pre_nn: Linear(140, 70)
            pre_b=jnp.zeros((EMB_DIM,), jnp.float32),
            post_w=dense(next(keys), 13 * EMB_DIM, EMB_DIM),   # post_nn: Linear(910, 70)
            post_b=jnp.zeros((EMB_DIM,), jnp.float32),
            lin_w=dense(next(keys), EMB_DIM, EMB_DIM),         # lin: Linear(70, 70)
            lin_b=jnp.zeros((EMB_DIM,), jnp.float32),
            bn_gamma=jnp.ones((EMB_DIM,), jnp.float32),
            bn_beta=jnp.zeros((EMB_DIM,), jnp.float32),
            bn_mean=jnp.zeros((EMB_DIM,), jnp.float32),
            bn_var=jnp.ones((EMB_DIM,), jnp.float32),
        ))
    params['layers'] = layers
    params['mlp'] = [
        (dense(next(keys), 70, 35), jnp.zeros((35,), jnp.float32)),
        (dense(next(keys), 35, 17), jnp.zeros((17,), jnp.float32)),
        (dense(next(keys), 17, 1), jnp.zeros((1,), jnp.float32)),
    ]
    return params


def build_kernel_params(params):
    """Fold post_nn+lin, split/fuse concat weights, pad to 128 lanes, cast to bf16."""
    pre_a, pre_b, pre_bias = [], [], []
    w_x, w_ag, post_bias = [], [], []
    bn_scale, bn_shift = [], []

    for layer in params['layers']:
        # pre_nn: [x_i || x_j] @ pre_w == x_i @ pre_w[:F] + x_j @ pre_w[F:]
        pre_a.append(_pad2(layer['pre_w'][:EMB_DIM], F_PAD, F_PAD, jnp.bfloat16))
        pre_b.append(_pad2(layer['pre_w'][EMB_DIM:], F_PAD, F_PAD, jnp.bfloat16))
        pre_bias.append(_pad_row(layer['pre_b'], F_PAD))

        # fold post_nn and lin (no nonlinearity between them)
        w_fold = layer['post_w'] @ layer['lin_w']                     # [910, 70]
        b_fold = layer['post_b'] @ layer['lin_w'] + layer['lin_b']    # [70]
        w_x.append(_pad2(w_fold[:EMB_DIM], F_PAD, F_PAD, jnp.bfloat16))

        # fuse the 12 aggregate blocks (scaler-major, aggregator-minor in PyG)
        # into one [4F, 3F] weight: rows = aggregator slot, cols = scaler slot.
        blocks = w_fold[EMB_DIM:].reshape(12, EMB_DIM, EMB_DIM)
        wag = jnp.zeros((F4_PAD, F3_PAD), jnp.float32)
        for g in range(3):          # identity / amplification / attenuation
            for a in range(4):      # mean / min / max / std
                wag = wag.at[a * F_PAD: a * F_PAD + EMB_DIM,
                             g * F_PAD: g * F_PAD + EMB_DIM].set(blocks[g * 4 + a])
        w_ag.append(wag.astype(jnp.bfloat16))
        post_bias.append(_pad_row(b_fold, F_PAD))

        # inference BatchNorm folded into scale/shift
        scale = layer['bn_gamma'] / jnp.sqrt(layer['bn_var'] + 1e-5)
        shift = layer['bn_beta'] - layer['bn_mean'] * scale
        bn_scale.append(_pad_row(scale, F_PAD))
        bn_shift.append(_pad_row(shift, F_PAD))

    (w1, b1), (w2, b2), (w3, b3) = params['mlp']
    return dict(
        atom_emb=params['atom_emb'], avg_log=params['avg_log'],
        pre_a=jnp.stack(pre_a), pre_b=jnp.stack(pre_b), pre_bias=jnp.stack(pre_bias),
        w_x=jnp.stack(w_x), w_ag=jnp.stack(w_ag), post_bias=jnp.stack(post_bias),
        bn_scale=jnp.stack(bn_scale), bn_shift=jnp.stack(bn_shift),
        mw1=_pad2(w1, F_PAD, F_PAD, jnp.bfloat16), mb1=_pad_row(b1, F_PAD),
        mw2=_pad2(w2, F_PAD, F_PAD, jnp.bfloat16), mb2=_pad_row(b2, F_PAD),
        mw3=_pad2(w3, F_PAD, F_PAD, jnp.bfloat16), mb3=_pad_row(b3, F_PAD),
    )


# -------------------------------- forward -----------------------------------

def net_forward(kparams, x_feat, edge_index, edge_attr, batch, num_graphs):
    # TODO(synk): edge_attr unused — PNAConv was built without edge_dim, so the
    # PyG message function has no edge encoder; messages use only [x_i || x_j].
    del edge_attr

    num_nodes = x_feat.shape[0]
    num_edges = edge_index.shape[1]
    assert num_nodes <= N_PAD and num_edges <= E_PAD and num_graphs <= G_PAD

    # AtomEncoder: sum of per-feature embedding lookups (host-side glue, once).
    x0 = jnp.zeros((num_nodes, EMB_DIM), jnp.float32)
    for k, table in enumerate(kparams['atom_emb']):
        x0 = x0 + table[x_feat[:, k]]
    x0 = _pad2(x0, N_PAD, F_PAD)

    # Graph-structure operands, built once and consumed in-kernel for all 4 layers.
    node_ids = jnp.arange(N_PAD, dtype=jnp.int32)
    src = jnp.full((E_PAD,), -1, jnp.int32).at[:num_edges].set(edge_index[0])
    tgt = jnp.full((E_PAD,), -1, jnp.int32).at[:num_edges].set(edge_index[1])
    src_oh = (src[:, None] == node_ids[None, :]).astype(jnp.bfloat16)     # [E, N]
    tgt_oh = (tgt[:, None] == node_ids[None, :]).astype(jnp.bfloat16)     # [E, N]
    adj = (tgt[None, :] == node_ids[:, None]).astype(jnp.float32)         # [N, E]

    cnt = jnp.sum(adj, axis=1, keepdims=True)                             # in-degree
    deg = jnp.maximum(cnt, 1.0)
    inv_deg = 1.0 / deg
    has_in = (cnt > 0).astype(jnp.float32)
    log_deg = jnp.log(deg + 1.0)
    s_amp = log_deg / kparams['avg_log']
    s_att = kparams['avg_log'] / log_deg
    scal = jnp.stack([inv_deg, has_in, s_amp, s_att], axis=0)             # [4, N, 1]

    batch_p = jnp.full((N_PAD,), -1, jnp.int32).at[:num_nodes].set(batch)
    pool = (batch_p[None, :] ==
            jnp.arange(G_PAD, dtype=jnp.int32)[:, None]).astype(jnp.float32)
    pool = pool / jnp.maximum(jnp.sum(pool, axis=1, keepdims=True), 1.0)

    tgt_ids = jnp.zeros((E_PAD,), jnp.int32).at[:num_edges].set(edge_index[1])

    kernel = functools.partial(_net_fused_kernel, num_edges=num_edges)

    def _const2(l, tg): return (0, 0)
    def _const3(l, tg): return (0, 0, 0)
    def _layer(l, tg): return (l, 0, 0)

    grid_spec = pltpu.PrefetchScalarGridSpec(
        num_scalar_prefetch=1,
        grid=(LAYERS,),
        in_specs=[
            pl.BlockSpec((N_PAD, F_PAD), _const2),          # x0
            pl.BlockSpec((E_PAD, N_PAD), _const2),          # src_oh
            pl.BlockSpec((E_PAD, N_PAD), _const2),          # tgt_oh
            pl.BlockSpec((N_PAD, E_PAD), _const2),          # adj
            pl.BlockSpec((4, N_PAD, 1), _const3),           # scalers (packed)
            pl.BlockSpec((G_PAD, N_PAD), _const2),          # pool
            pl.BlockSpec((None, F_PAD, F_PAD), _layer),     # pre_a
            pl.BlockSpec((None, F_PAD, F_PAD), _layer),     # pre_b
            pl.BlockSpec((None, 1, F_PAD), _layer),         # pre_bias
            pl.BlockSpec((None, F_PAD, F_PAD), _layer),     # w_x
            pl.BlockSpec((None, F4_PAD, F3_PAD), _layer),   # w_ag (fused)
            pl.BlockSpec((None, 1, F_PAD), _layer),         # post_bias
            pl.BlockSpec((None, 1, F_PAD), _layer),         # bn_scale
            pl.BlockSpec((None, 1, F_PAD), _layer),         # bn_shift
            pl.BlockSpec((F_PAD, F_PAD), _const2),          # mw1
            pl.BlockSpec((1, F_PAD), _const2),              # mb1
            pl.BlockSpec((F_PAD, F_PAD), _const2),          # mw2
            pl.BlockSpec((1, F_PAD), _const2),              # mb2
            pl.BlockSpec((F_PAD, F_PAD), _const2),          # mw3
            pl.BlockSpec((1, F_PAD), _const2),              # mb3
        ],
        out_specs=pl.BlockSpec((G_PAD, F_PAD), _const2),
        scratch_shapes=[
            pltpu.VMEM((N_PAD, F_PAD), jnp.float32),        # x (resident node state)
            pltpu.VMEM((E_PAD, F_PAD), jnp.float32),        # msg
            pltpu.VMEM((N_PAD, F_PAD), jnp.float32),        # running min
            pltpu.VMEM((N_PAD, F_PAD), jnp.float32),        # running max
        ],
    )

    out_pad = pl.pallas_call(
        kernel,
        out_shape=jax.ShapeDtypeStruct((G_PAD, F_PAD), jnp.float32),
        grid_spec=grid_spec,
        compiler_params=pltpu.CompilerParams(dimension_semantics=("arbitrary",)),
    )(tgt_ids, x0, src_oh, tgt_oh, adj, scal, pool,
      kparams['pre_a'], kparams['pre_b'], kparams['pre_bias'],
      kparams['w_x'], kparams['w_ag'], kparams['post_bias'],
      kparams['bn_scale'], kparams['bn_shift'],
      kparams['mw1'], kparams['mb1'], kparams['mw2'], kparams['mb2'],
      kparams['mw3'], kparams['mb3'])

    return out_pad[:num_graphs, :1]


# ---------------------------------- main -------------------------------------

if __name__ == "__main__":
    key = jax.random.PRNGKey(0)
    k_param, k_feat, k_src, k_tgt, k_edge = jax.random.split(key, 5)

    num_nodes, num_edges, num_graphs = 16, 40, 2
    atom_vocab = [10, 6, 4]                                       # synthetic atom vocabs
    deg_hist = jnp.array([0.0, 4.0, 6.0, 4.0, 2.0], jnp.float32)  # Net(degree) histogram

    params = init_params(k_param, atom_vocab, deg_hist)
    kparams = build_kernel_params(params)

    x_feat = jnp.stack(
        [jax.random.randint(jax.random.fold_in(k_feat, i), (num_nodes,), 0, v)
         for i, v in enumerate(atom_vocab)], axis=1).astype(jnp.int32)    # [N, 3]
    src = jax.random.randint(k_src, (num_edges,), 0, num_nodes, dtype=jnp.int32)
    tgt = jax.random.randint(k_tgt, (num_edges,), 0, num_nodes, dtype=jnp.int32)
    edge_index = jnp.stack([src, tgt], axis=0)                            # [2, E]
    edge_attr = jax.random.normal(k_edge, (num_edges, 3), jnp.float32)    # unused
    batch = jnp.concatenate([jnp.zeros(8, jnp.int32), jnp.ones(8, jnp.int32)])

    fwd = jax.jit(net_forward, static_argnames=("num_graphs",))
    out = fwd(kparams, x_feat, edge_index, edge_attr, batch, num_graphs=num_graphs)
    jax.block_until_ready(out)
    assert out.shape == (num_graphs, 1) and out.dtype == jnp.float32
    assert bool(jnp.all(jnp.isfinite(out)))
    print("KERNEL_OK")
</pallas_src>

<mosaic_0001>
module attributes {stable_mosaic.version = 11 : i64} {
  func.func @_net_fused_kernel(%arg0: i32, %arg1: memref<64xi32, #tpu.memory_space<smem>>, %arg2: memref<128x128xf32, #tpu.memory_space<vmem>>, %arg3: memref<64x128xbf16, #tpu.memory_space<vmem>>, %arg4: memref<64x128xbf16, #tpu.memory_space<vmem>>, %arg5: memref<128x64xf32, #tpu.memory_space<vmem>>, %arg6: memref<4x128x1xf32, #tpu.memory_space<vmem>>, %arg7: memref<8x128xf32, #tpu.memory_space<vmem>>, %arg8: memref<1x128x128xbf16, #tpu.memory_space<vmem>>, %arg9: memref<1x128x128xbf16, #tpu.memory_space<vmem>>, %arg10: memref<1x1x128xf32, #tpu.memory_space<vmem>>, %arg11: memref<1x128x128xbf16, #tpu.memory_space<vmem>>, %arg12: memref<1x512x384xbf16, #tpu.memory_space<vmem>>, %arg13: memref<1x1x128xf32, #tpu.memory_space<vmem>>, %arg14: memref<1x1x128xf32, #tpu.memory_space<vmem>>, %arg15: memref<1x1x128xf32, #tpu.memory_space<vmem>>, %arg16: memref<128x128xbf16, #tpu.memory_space<vmem>>, %arg17: memref<1x128xf32, #tpu.memory_space<vmem>>, %arg18: memref<128x128xbf16, #tpu.memory_space<vmem>>, %arg19: memref<1x128xf32, #tpu.memory_space<vmem>>, %arg20: memref<128x128xbf16, #tpu.memory_space<vmem>>, %arg21: memref<1x128xf32, #tpu.memory_space<vmem>>, %arg22: memref<8x128xf32, #tpu.memory_space<vmem>>, %arg23: memref<128x128xf32, #tpu.memory_space<vmem>>, %arg24: memref<64x128xf32, #tpu.memory_space<vmem>>, %arg25: memref<128x128xf32, #tpu.memory_space<vmem>>, %arg26: memref<128x128xf32, #tpu.memory_space<vmem>>) attributes {dimension_semantics = [#tpu.dimension_semantics<arbitrary>], iteration_bounds = array<i64: 4>, scalar_prefetch = 1 : i64, scratch_operands = 4 : i64, tpu.core_type = #tpu.core_type<tc>, window_params = [{pipeline_mode = #tpu.pipeline_mode<synchronous>, transform_indices = @transform_0, window_bounds = array<i64: 128, 128>}, {pipeline_mode = #tpu.pipeline_mode<synchronous>, transform_indices = @transform_1, window_bounds = array<i64: 64, 128>}, {pipeline_mode = #tpu.pipeline_mode<synchronous>, transform_indices = @transform_2, window_bounds = array<i64: 64, 128>}, {pipeline_mode = #tpu.pipeline_mode<synchronous>, transform_indices = @transform_3, window_bounds = array<i64: 128, 64>}, {pipeline_mode = #tpu.pipeline_mode<synchronous>, transform_indices = @transform_4, window_bounds = array<i64: 4, 128, 1>}, {pipeline_mode = #tpu.pipeline_mode<synchronous>, transform_indices = @transform_5, window_bounds = array<i64: 8, 128>}, {transform_indices = @transform_6, window_bounds = array<i64: 1, 128, 128>}, {transform_indices = @transform_7, window_bounds = array<i64: 1, 128, 128>}, {transform_indices = @transform_8, window_bounds = array<i64: 1, 1, 128>}, {transform_indices = @transform_9, window_bounds = array<i64: 1, 128, 128>}, {transform_indices = @transform_10, window_bounds = array<i64: 1, 512, 384>}, {transform_indices = @transform_11, window_bounds = array<i64: 1, 1, 128>}, {transform_indices = @transform_12, window_bounds = array<i64: 1, 1, 128>}, {transform_indices = @transform_13, window_bounds = array<i64: 1, 1, 128>}, {pipeline_mode = #tpu.pipeline_mode<synchronous>, transform_indices = @transform_14, window_bounds = array<i64: 128, 128>}, {pipeline_mode = #tpu.pipeline_mode<synchronous>, transform_indices = @transform_15, window_bounds = array<i64: 1, 128>}, {pipeline_mode = #tpu.pipeline_mode<synchronous>, transform_indices = @transform_16, window_bounds = array<i64: 128, 128>}, {pipeline_mode = #tpu.pipeline_mode<synchronous>, transform_indices = @transform_17, window_bounds = array<i64: 1, 128>}, {pipeline_mode = #tpu.pipeline_mode<synchronous>, transform_indices = @transform_18, window_bounds = array<i64: 128, 128>}, {pipeline_mode = #tpu.pipeline_mode<synchronous>, transform_indices = @transform_19, window_bounds = array<i64: 1, 128>}, {pipeline_mode = #tpu.pipeline_mode<synchronous>, transform_indices = @transform_20, window_bounds = array<i64: 8, 128>}]} {
    %c0_i32 = arith.constant 0 : i32
    %0 = arith.cmpi eq, %arg0, %c0_i32 : i32
    %1 = arith.extui %0 : i1 to i32
    %c0_i32_0 = arith.constant 0 : i32
    %2 = arith.cmpi ne, %1, %c0_i32_0 : i32
    scf.if %2 {
      %c0_314 = arith.constant 0 : index
      %c0_315 = arith.constant 0 : index
      %584 = vector.load %arg2[%c0_314, %c0_315] : memref<128x128xf32, #tpu.memory_space<vmem>>, vector<128x128xf32>
      %c0_316 = arith.constant 0 : index
      %c0_317 = arith.constant 0 : index
      %585 = vector.load %arg23[%c0_316, %c0_317] : memref<128x128xf32, #tpu.memory_space<vmem>>, vector<128x128xf32>
      tpu.vector_store %arg23[%c0_316, %c0_317], %584 {strides = array<i32>} : memref<128x128xf32, #tpu.memory_space<vmem>>, vector<128x128xf32>,
    } else {
    }
    %c0 = arith.constant 0 : index
    %c0_1 = arith.constant 0 : index
    %3 = vector.load %arg23[%c0, %c0_1] : memref<128x128xf32, #tpu.memory_space<vmem>>, vector<128x128xf32>
    %4 = arith.truncf %3 : vector<128x128xf32> to vector<128x128xbf16>
    %c0_2 = arith.constant 0 : index
    %c0_3 = arith.constant 0 : index
    %5 = vector.load %arg4[%c0_2, %c0_3] : memref<64x128xbf16, #tpu.memory_space<vmem>>, vector<64x128xbf16>
    %cst = arith.constant dense<0.000000e+00> : vector<64x128xf32>
    %6 = tpu.matmul %5, %4, %cst {dimension_numbers = #tpu.dot_dimension_numbers<[1], [0], [0], [1], [0, 0, 1, 1], [], []>} : vector<64x128xbf16>, vector<128x128xbf16>, vector<64x128xf32> -> vector<64x128xf32>
    %c0_4 = arith.constant 0 : index
    %c0_5 = arith.constant 0 : index
    %7 = vector.load %arg3[%c0_4, %c0_5] : memref<64x128xbf16, #tpu.memory_space<vmem>>, vector<64x128xbf16>
    %cst_6 = arith.constant dense<0.000000e+00> : vector<64x128xf32>
    %8 = tpu.matmul %7, %4, %cst_6 {dimension_numbers = #tpu.dot_dimension_numbers<[1], [0], [0], [1], [0, 0, 1, 1], [], []>} : vector<64x128xbf16>, vector<128x128xbf16>, vector<64x128xf32> -> vector<64x128xf32>
    %9 = arith.truncf %6 : vector<64x128xf32> to vector<64x128xbf16>
    %c0_7 = arith.constant 0 : index
    %c0_8 = arith.constant 0 : index
    %c0_9 = arith.constant 0 : index
    %10 = vector.load %arg8[%c0_7, %c0_8, %c0_9] : memref<1x128x128xbf16, #tpu.memory_space<vmem>>, vector<1x128x128xbf16>
    %11 = vector.shape_cast %10 : vector<1x128x128xbf16> to vector<128x128xbf16>
    %cst_10 = arith.constant dense<0.000000e+00> : vector<64x128xf32>
    %12 = tpu.matmul %9, %11, %cst_10 {dimension_numbers = #tpu.dot_dimension_numbers<[1], [0], [0], [1], [0, 0, 1, 1], [], []>} : vector<64x128xbf16>, vector<128x128xbf16>, vector<64x128xf32> -> vector<64x128xf32>
    %13 = arith.truncf %8 : vector<64x128xf32> to vector<64x128xbf16>
    %c0_11 = arith.constant 0 : index
    %c0_12 = arith.constant 0 : index
    %c0_13 = arith.constant 0 : index
    %14 = vector.load %arg9[%c0_11, %c0_12, %c0_13] : memref<1x128x128xbf16, #tpu.memory_space<vmem>>, vector<1x128x128xbf16>
    %15 = vector.shape_cast %14 : vector<1x128x128xbf16> to vector<128x128xbf16>
    %cst_14 = arith.constant dense<0.000000e+00> : vector<64x128xf32>
    %16 = tpu.matmul %13, %15, %cst_14 {dimension_numbers = #tpu.dot_dimension_numbers<[1], [0], [0], [1], [0, 0, 1, 1], [], []>} : vector<64x128xbf16>, vector<128x128xbf16>, vector<64x128xf32> -> vector<64x128xf32>
    %17 = arith.addf %12, %16 : vector<64x128xf32>
    %c0_15 = arith.constant 0 : index
    %c0_16 = arith.constant 0 : index
    %c0_17 = arith.constant 0 : index
    %18 = vector.load %arg10[%c0_15, %c0_16, %c0_17] : memref<1x1x128xf32, #tpu.memory_space<vmem>>, vector<1x1x128xf32>
    %19 = vector.shape_cast %18 : vector<1x1x128xf32> to vector<1x128xf32>
    %20 = vector.broadcast %19 : vector<1x128xf32> to vector<64x128xf32>
    %21 = arith.addf %17, %20 : vector<64x128xf32>
    %c0_18 = arith.constant 0 : index
    %c0_19 = arith.constant 0 : index
    %22 = vector.load %arg24[%c0_18, %c0_19] : memref<64x128xf32, #tpu.memory_space<vmem>>, vector<64x128xf32>
    tpu.vector_store %arg24[%c0_18, %c0_19], %21 {strides = array<i32>} : memref<64x128xf32, #tpu.memory_space<vmem>>, vector<64x128xf32>,
    %c0_20 = arith.constant 0 : index
    %c0_21 = arith.constant 0 : index
    %23 = vector.load %arg5[%c0_20, %c0_21] : memref<128x64xf32, #tpu.memory_space<vmem>>, vector<128x64xf32>
    %cst_22 = arith.constant dense<0.000000e+00> : vector<128x128xf32>
    %24 = tpu.matmul %23, %21, %cst_22 {dimension_numbers = #tpu.dot_dimension_numbers<[1], [0], [0], [1], [0, 0, 1, 1], [], []>} : vector<128x64xf32>, vector<64x128xf32>, vector<128x128xf32> -> vector<128x128xf32>
    %25 = arith.mulf %21, %21 : vector<64x128xf32>
    %cst_23 = arith.constant dense<0.000000e+00> : vector<128x128xf32>
    %26 = tpu.matmul %23, %25, %cst_23 {dimension_numbers = #tpu.dot_dimension_numbers<[1], [0], [0], [1], [0, 0, 1, 1], [], []>} : vector<128x64xf32>, vector<64x128xf32>, vector<128x128xf32> -> vector<128x128xf32>
    %c0_24 = arith.constant 0 : index
    %c0_25 = arith.constant 0 : index
    %c0_26 = arith.constant 0 : index
    %27 = vector.load %arg6[%c0_24, %c0_25, %c0_26] : memref<4x128x1xf32, #tpu.memory_space<vmem>>, vector<1x128x1xf32>
    %28 = vector.shape_cast %27 : vector<1x128x1xf32> to vector<128x1xf32>
    %c1 = arith.constant 1 : index
    %c0_27 = arith.constant 0 : index
    %c0_28 = arith.constant 0 : index
    %29 = vector.load %arg6[%c1, %c0_27, %c0_28] : memref<4x128x1xf32, #tpu.memory_space<vmem>>, vector<1x128x1xf32>
    %30 = vector.shape_cast %29 : vector<1x128x1xf32> to vector<128x1xf32>
    %c2 = arith.constant 2 : index
    %c0_29 = arith.constant 0 : index
    %c0_30 = arith.constant 0 : index
    %31 = vector.load %arg6[%c2, %c0_29, %c0_30] : memref<4x128x1xf32, #tpu.memory_space<vmem>>, vector<1x128x1xf32>
    %32 = vector.shape_cast %31 : vector<1x128x1xf32> to vector<128x1xf32>
    %c3 = arith.constant 3 : index
    %c0_31 = arith.constant 0 : index
    %c0_32 = arith.constant 0 : index
    %33 = vector.load %arg6[%c3, %c0_31, %c0_32] : memref<4x128x1xf32, #tpu.memory_space<vmem>>, vector<1x128x1xf32>
    %34 = vector.shape_cast %33 : vector<1x128x1xf32> to vector<128x1xf32>
    %35 = vector.broadcast %28 : vector<128x1xf32> to vector<128x128xf32>
    %36 = arith.mulf %24, %35 : vector<128x128xf32>
    %37 = vector.broadcast %28 : vector<128x1xf32> to vector<128x128xf32>
    %38 = arith.mulf %26, %37 : vector<128x128xf32>
    %39 = arith.mulf %36, %36 : vector<128x128xf32>
    %40 = arith.subf %38, %39 : vector<128x128xf32>
    %cst_33 = arith.constant 0.000000e+00 : f32
    %41 = vector.broadcast %cst_33 : f32 to vector<128x128xf32>
    %42 = arith.maximumf %40, %41 : vector<128x128xf32>
    %cst_34 = arith.constant 9.99999974E-6 : f32
    %43 = vector.broadcast %cst_34 : f32 to vector<128x128xf32>
    %44 = arith.addf %42, %43 : vector<128x128xf32>
    %45 = math.sqrt %44 : vector<128x128xf32>
    %cst_35 = arith.constant 1.000000e+30 : f32
    %46 = vector.broadcast %cst_35 : f32 to vector<128x128xf32>
    %c0_36 = arith.constant 0 : index
    %c0_37 = arith.constant 0 : index
    %47 = vector.load %arg25[%c0_36, %c0_37] : memref<128x128xf32, #tpu.memory_space<vmem>>, vector<128x128xf32>
    tpu.vector_store %arg25[%c0_36, %c0_37], %46 {strides = array<i32>} : memref<128x128xf32, #tpu.memory_space<vmem>>, vector<128x128xf32>,
    %cst_38 = arith.constant -1.000000e+30 : f32
    %48 = vector.broadcast %cst_38 : f32 to vector<128x128xf32>
    %c0_39 = arith.constant 0 : index
    %c0_40 = arith.constant 0 : index
    %49 = vector.load %arg26[%c0_39, %c0_40] : memref<128x128xf32, #tpu.memory_space<vmem>>, vector<128x128xf32>
    tpu.vector_store %arg26[%c0_39, %c0_40], %48 {strides = array<i32>} : memref<128x128xf32, #tpu.memory_space<vmem>>, vector<128x128xf32>,
    %c0_41 = arith.constant 0 : index
    %50 = memref.load %arg1[%c0_41] : memref<64xi32, #tpu.memory_space<smem>>
    %c0_42 = arith.constant 0 : index
    %c0_43 = arith.constant 0 : index
    %51 = vector.load %arg24[%c0_42, %c0_43] : memref<64x128xf32, #tpu.memory_space<vmem>>, vector<1x128xf32>
    %52 = arith.index_cast %50 : i32 to index
    %c0_44 = arith.constant 0 : index
    %53 = vector.load %arg25[%52, %c0_44] : memref<128x128xf32, #tpu.memory_space<vmem>>, vector<1x128xf32>
    %54 = arith.minimumf %53, %51 : vector<1x128xf32>
    %55 = arith.index_cast %50 : i32 to index
    %c0_45 = arith.constant 0 : index
    %56 = vector.load %arg25[%55, %c0_45] : memref<128x128xf32, #tpu.memory_space<vmem>>, vector<1x128xf32>
    tpu.vector_store %arg25[%55, %c0_45], %54 {strides = array<i32>} : memref<128x128xf32, #tpu.memory_space<vmem>>, vector<1x128xf32>,
    %57 = arith.index_cast %50 : i32 to index
    %c0_46 = arith.constant 0 : index
    %58 = vector.load %arg26[%57, %c0_46] : memref<128x128xf32, #tpu.memory_space<vmem>>, vector<1x128xf32>
    %59 = arith.maximumf %58, %51 : vector<1x128xf32>
    %60 = arith.index_cast %50 : i32 to index
    %c0_47 = arith.constant 0 : index
    %61 = vector.load %arg26[%60, %c0_47] : memref<128x128xf32, #tpu.memory_space<vmem>>, vector<1x128xf32>
    tpu.vector_store %arg26[%60, %c0_47], %59 {strides = array<i32>} : memref<128x128xf32, #tpu.memory_space<vmem>>, vector<1x128xf32>,
    %c1_48 = arith.constant 1 : index
    %62 = memref.load %arg1[%c1_48] : memref<64xi32, #tpu.memory_space<smem>>
    %c1_49 = arith.constant 1 : index
    %c0_50 = arith.constant 0 : index
    %63 = vector.load %arg24[%c1_49, %c0_50] : memref<64x128xf32, #tpu.memory_space<vmem>>, vector<1x128xf32>
    %64 = arith.index_cast %62 : i32 to index
    %c0_51 = arith.constant 0 : index
    %65 = vector.load %arg25[%64, %c0_51] : memref<128x128xf32, #tpu.memory_space<vmem>>, vector<1x128xf32>
    %66 = arith.minimumf %65, %63 : vector<1x128xf32>
    %67 = arith.index_cast %62 : i32 to index
    %c0_52 = arith.constant 0 : index
    %68 = vector.load %arg25[%67, %c0_52] : memref<128x128xf32, #tpu.memory_space<vmem>>, vector<1x128xf32>
    tpu.vector_store %arg25[%67, %c0_52], %66 {strides = array<i32>} : memref<128x128xf32, #tpu.memory_space<vmem>>, vector<1x128xf32>,
    %69 = arith.index_cast %62 : i32 to index
    %c0_53 = arith.constant 0 : index
    %70 = vector.load %arg26[%69, %c0_53] : memref<128x128xf32, #tpu.memory_space<vmem>>, vector<1x128xf32>
    %71 = arith.maximumf %70, %63 : vector<1x128xf32>
    %72 = arith.index_cast %62 : i32 to index
    %c0_54 = arith.constant 0 : index
    %73 = vector.load %arg26[%72, %c0_54] : memref<128x128xf32, #tpu.memory_space<vmem>>, vector<1x128xf32>
    tpu.vector_store %arg26[%72, %c0_54], %71 {strides = array<i32>} : memref<128x128xf32, #tpu.memory_space<vmem>>, vector<1x128xf32>,
    %c2_55 = arith.constant 2 : index
    %74 = memref.load %arg1[%c2_55] : memref<64xi32, #tpu.memory_space<smem>>
    %c2_56 = arith.constant 2 : index
    %c0_57 = arith.constant 0 : index
    %75 = vector.load %arg24[%c2_56, %c0_57] : memref<64x128xf32, #tpu.memory_space<vmem>>, vector<1x128xf32>
    %76 = arith.index_cast %74 : i32 to index
    %c0_58 = arith.constant 0 : index
    %77 = vector.load %arg25[%76, %c0_58] : memref<128x128xf32, #tpu.memory_space<vmem>>, vector<1x128xf32>
    %78 = arith.minimumf %77, %75 : vector<1x128xf32>
    %79 = arith.index_cast %74 : i32 to index
    %c0_59 = arith.constant 0 : index
    %80 = vector.load %arg25[%79, %c0_59] : memref<128x128xf32, #tpu.memory_space<vmem>>, vector<1x128xf32>
    tpu.vector_store %arg25[%79, %c0_59], %78 {strides = array<i32>} : memref<128x128xf32, #tpu.memory_space<vmem>>, vector<1x128xf32>,
    %81 = arith.index_cast %74 : i32 to index
    %c0_60 = arith.constant 0 : index
    %82 = vector.load %arg26[%81, %c0_60] : memref<128x128xf32, #tpu.memory_space<vmem>>, vector<1x128xf32>
    %83 = arith.maximumf %82, %75 : vector<1x128xf32>
    %84 = arith.index_cast %74 : i32 to index
    %c0_61 = arith.constant 0 : index
    %85 = vector.load %arg26[%84, %c0_61] : memref<128x128xf32, #tpu.memory_space<vmem>>, vector<1x128xf32>
    tpu.vector_store %arg26[%84, %c0_61], %83 {strides = array<i32>} : memref<128x128xf32, #tpu.memory_space<vmem>>, vector<1x128xf32>,
    %c3_62 = arith.constant 3 : index
    %86 = memref.load %arg1[%c3_62] : memref<64xi32, #tpu.memory_space<smem>>
    %c3_63 = arith.constant 3 : index
    %c0_64 = arith.constant 0 : index
    %87 = vector.load %arg24[%c3_63, %c0_64] : memref<64x128xf32, #tpu.memory_space<vmem>>, vector<1x128xf32>
    %88 = arith.index_cast %86 : i32 to index
    %c0_65 = arith.constant 0 : index
    %89 = vector.load %arg25[%88, %c0_65] : memref<128x128xf32, #tpu.memory_space<vmem>>, vector<1x128xf32>
    %90 = arith.minimumf %89, %87 : vector<1x128xf32>
    %91 = arith.index_cast %86 : i32 to index
    %c0_66 = arith.constant 0 : index
    %92 = vector.load %arg25[%91, %c0_66] : memref<128x128xf32, #tpu.memory_space<vmem>>, vector<1x128xf32>
    tpu.vector_store %arg25[%91, %c0_66], %90 {strides = array<i32>} : memref<128x128xf32, #tpu.memory_space<vmem>>, vector<1x128xf32>,
    %93 = arith.index_cast %86 : i32 to index
    %c0_67 = arith.constant 0 : index
    %94 = vector.load %arg26[%93, %c0_67] : memref<128x128xf32, #tpu.memory_space<vmem>>, vector<1x128xf32>
    %95 = arith.maximumf %94, %87 : vector<1x128xf32>
    %96 = arith.index_cast %86 : i32 to index
    %c0_68 = arith.constant 0 : index
    %97 = vector.load %arg26[%96, %c0_68] : memref<128x128xf32, #tpu.memory_space<vmem>>, vector<1x128xf32>
    tpu.vector_store %arg26[%96, %c0_68], %95 {strides = array<i32>} : memref<128x128xf32, #tpu.memory_space<vmem>>, vector<1x128xf32>,
    %c4 = arith.constant 4 : index
    %98 = memref.load %arg1[%c4] : memref<64xi32, #tpu.memory_space<smem>>
    %c4_69 = arith.constant 4 : index
    %c0_70 = arith.constant 0 : index
    %99 = vector.load %arg24[%c4_69, %c0_70] : memref<64x128xf32, #tpu.memory_space<vmem>>, vector<1x128xf32>
    %100 = arith.index_cast %98 : i32 to index
    %c0_71 = arith.constant 0 : index
    %101 = vector.load %arg25[%100, %c0_71] : memref<128x128xf32, #tpu.memory_space<vmem>>, vector<1x128xf32>
    %102 = arith.minimumf %101, %99 : vector<1x128xf32>
    %103 = arith.index_cast %98 : i32 to index
    %c0_72 = arith.constant 0 : index
    %104 = vector.load %arg25[%103, %c0_72] : memref<128x128xf32, #tpu.memory_space<vmem>>, vector<1x128xf32>
    tpu.vector_store %arg25[%103, %c0_72], %102 {strides = array<i32>} : memref<128x128xf32, #tpu.memory_space<vmem>>, vector<1x128xf32>,
    %105 = arith.index_cast %98 : i32 to index
    %c0_73 = arith.constant 0 : index
    %106 = vector.load %arg26[%105, %c0_73] : memref<128x128xf32, #tpu.memory_space<vmem>>, vector<1x128xf32>
    %107 = arith.maximumf %106, %99 : vector<1x128xf32>
    %108 = arith.index_cast %98 : i32 to index
    %c0_74 = arith.constant 0 : index
    %109 = vector.load %arg26[%108, %c0_74] : memref<128x128xf32, #tpu.memory_space<vmem>>, vector<1x128xf32>
    tpu.vector_store %arg26[%108, %c0_74], %107 {strides = array<i32>} : memref<128x128xf32, #tpu.memory_space<vmem>>, vector<1x128xf32>,
    %c5 = arith.constant 5 : index
    %110 = memref.load %arg1[%c5] : memref<64xi32, #tpu.memory_space<smem>>
    %c5_75 = arith.constant 5 : index
    %c0_76 = arith.constant 0 : index
    %111 = vector.load %arg24[%c5_75, %c0_76] : memref<64x128xf32, #tpu.memory_space<vmem>>, vector<1x128xf32>
    %112 = arith.index_cast %110 : i32 to index
    %c0_77 = arith.constant 0 : index
    %113 = vector.load %arg25[%112, %c0_77] : memref<128x128xf32, #tpu.memory_space<vmem>>, vector<1x128xf32>
    %114 = arith.minimumf %113, %111 : vector<1x128xf32>
    %115 = arith.index_cast %110 : i32 to index
    %c0_78 = arith.constant 0 : index
    %116 = vector.load %arg25[%115, %c0_78] : memref<128x128xf32, #tpu.memory_space<vmem>>, vector<1x128xf32>
    tpu.vector_store %arg25[%115, %c0_78], %114 {strides = array<i32>} : memref<128x128xf32, #tpu.memory_space<vmem>>, vector<1x128xf32>,
    %117 = arith.index_cast %110 : i32 to index
    %c0_79 = arith.constant 0 : index
    %118 = vector.load %arg26[%117, %c0_79] : memref<128x128xf32, #tpu.memory_space<vmem>>, vector<1x128xf32>
    %119 = arith.maximumf %118, %111 : vector<1x128xf32>
    %120 = arith.index_cast %110 : i32 to index
    %c0_80 = arith.constant 0 : index
    %121 = vector.load %arg26[%120, %c0_80] : memref<128x128xf32, #tpu.memory_space<vmem>>, vector<1x128xf32>
    tpu.vector_store %arg26[%120, %c0_80], %119 {strides = array<i32>} : memref<128x128xf32, #tpu.memory_space<vmem>>, vector<1x128xf32>,
    %c6 = arith.constant 6 : index
    %122 = memref.load %arg1[%c6] : memref<64xi32, #tpu.memory_space<smem>>
    %c6_81 = arith.constant 6 : index
    %c0_82 = arith.constant 0 : index
    %123 = vector.load %arg24[%c6_81, %c0_82] : memref<64x128xf32, #tpu.memory_space<vmem>>, vector<1x128xf32>
    %124 = arith.index_cast %122 : i32 to index
    %c0_83 = arith.constant 0 : index
    %125 = vector.load %arg25[%124, %c0_83] : memref<128x128xf32, #tpu.memory_space<vmem>>, vector<1x128xf32>
    %126 = arith.minimumf %125, %123 : vector<1x128xf32>
    %127 = arith.index_cast %122 : i32 to index
    %c0_84 = arith.constant 0 : index
    %128 = vector.load %arg25[%127, %c0_84] : memref<128x128xf32, #tpu.memory_space<vmem>>, vector<1x128xf32>
    tpu.vector_store %arg25[%127, %c0_84], %126 {strides = array<i32>} : memref<128x128xf32, #tpu.memory_space<vmem>>, vector<1x128xf32>,
    %129 = arith.index_cast %122 : i32 to index
    %c0_85 = arith.constant 0 : index
    %130 = vector.load %arg26[%129, %c0_85] : memref<128x128xf32, #tpu.memory_space<vmem>>, vector<1x128xf32>
    %131 = arith.maximumf %130, %123 : vector<1x128xf32>
    %132 = arith.index_cast %122 : i32 to index
    %c0_86 = arith.constant 0 : index
    %133 = vector.load %arg26[%132, %c0_86] : memref<128x128xf32, #tpu.memory_space<vmem>>, vector<1x128xf32>
    tpu.vector_store %arg26[%132, %c0_86], %131 {strides = array<i32>} : memref<128x128xf32, #tpu.memory_space<vmem>>, vector<1x128xf32>,
    %c7 = arith.constant 7 : index
    %134 = memref.load %arg1[%c7] : memref<64xi32, #tpu.memory_space<smem>>
    %c7_87 = arith.constant 7 : index
    %c0_88 = arith.constant 0 : index
    %135 = vector.load %arg24[%c7_87, %c0_88] : memref<64x128xf32, #tpu.memory_space<vmem>>, vector<1x128xf32>
    %136 = arith.index_cast %134 : i32 to index
    %c0_89 = arith.constant 0 : index
    %137 = vector.load %arg25[%136, %c0_89] : memref<128x128xf32, #tpu.memory_space<vmem>>, vector<1x128xf32>
    %138 = arith.minimumf %137, %135 : vector<1x128xf32>
    %139 = arith.index_cast %134 : i32 to index
    %c0_90 = arith.constant 0 : index
    %140 = vector.load %arg25[%139, %c0_90] : memref<128x128xf32, #tpu.memory_space<vmem>>, vector<1x128xf32>
    tpu.vector_store %arg25[%139, %c0_90], %138 {strides = array<i32>} : memref<128x128xf32, #tpu.memory_space<vmem>>, vector<1x128xf32>,
    %141 = arith.index_cast %134 : i32 to index
    %c0_91 = arith.constant 0 : index
    %142 = vector.load %arg26[%141, %c0_91] : memref<128x128xf32, #tpu.memory_space<vmem>>, vector<1x128xf32>
    %143 = arith.maximumf %142, %135 : vector<1x128xf32>
    %144 = arith.index_cast %134 : i32 to index
    %c0_92 = arith.constant 0 : index
    %145 = vector.load %arg26[%144, %c0_92] : memref<128x128xf32, #tpu.memory_space<vmem>>, vector<1x128xf32>
    tpu.vector_store %arg26[%144, %c0_92], %143 {strides = array<i32>} : memref<128x128xf32, #tpu.memory_space<vmem>>, vector<1x128xf32>,
    %c8 = arith.constant 8 : index
    %146 = memref.load %arg1[%c8] : memref<64xi32, #tpu.memory_space<smem>>
    %c8_93 = arith.constant 8 : index
    %c0_94 = arith.constant 0 : index
    %147 = vector.load %arg24[%c8_93, %c0_94] : memref<64x128xf32, #tpu.memory_space<vmem>>, vector<1x128xf32>
    %148 = arith.index_cast %146 : i32 to index
    %c0_95 = arith.constant 0 : index
    %149 = vector.load %arg25[%148, %c0_95] : memref<128x128xf32, #tpu.memory_space<vmem>>, vector<1x128xf32>
    %150 = arith.minimumf %149, %147 : vector<1x128xf32>
    %151 = arith.index_cast %146 : i32 to index
    %c0_96 = arith.constant 0 : index
    %152 = vector.load %arg25[%151, %c0_96] : memref<128x128xf32, #tpu.memory_space<vmem>>, vector<1x128xf32>
    tpu.vector_store %arg25[%151, %c0_96], %150 {strides = array<i32>} : memref<128x128xf32, #tpu.memory_space<vmem>>, vector<1x128xf32>,
    %153 = arith.index_cast %146 : i32 to index
    %c0_97 = arith.constant 0 : index
    %154 = vector.load %arg26[%153, %c0_97] : memref<128x128xf32, #tpu.memory_space<vmem>>, vector<1x128xf32>
    %155 = arith.maximumf %154, %147 : vector<1x128xf32>
    %156 = arith.index_cast %146 : i32 to index
    %c0_98 = arith.constant 0 : index
    %157 = vector.load %arg26[%156, %c0_98] : memref<128x128xf32, #tpu.memory_space<vmem>>, vector<1x128xf32>
    tpu.vector_store %arg26[%156, %c0_98], %155 {strides = array<i32>} : memref<128x128xf32, #tpu.memory_space<vmem>>, vector<1x128xf32>,
    %c9 = arith.constant 9 : index
    %158 = memref.load %arg1[%c9] : memref<64xi32, #tpu.memory_space<smem>>
    %c9_99 = arith.constant 9 : index
    %c0_100 = arith.constant 0 : index
    %159 = vector.load %arg24[%c9_99, %c0_100] : memref<64x128xf32, #tpu.memory_space<vmem>>, vector<1x128xf32>
    %160 = arith.index_cast %158 : i32 to index
    %c0_101 = arith.constant 0 : index
    %161 = vector.load %arg25[%160, %c0_101] : memref<128x128xf32, #tpu.memory_space<vmem>>, vector<1x128xf32>
    %162 = arith.minimumf %161, %159 : vector<1x128xf32>
    %163 = arith.index_cast %158 : i32 to index
    %c0_102 = arith.constant 0 : index
    %164 = vector.load %arg25[%163, %c0_102] : memref<128x128xf32, #tpu.memory_space<vmem>>, vector<1x128xf32>
    tpu.vector_store %arg25[%163, %c0_102], %162 {strides = array<i32>} : memref<128x128xf32, #tpu.memory_space<vmem>>, vector<1x128xf32>,
    %165 = arith.index_cast %158 : i32 to index
    %c0_103 = arith.constant 0 : index
    %166 = vector.load %arg26[%165, %c0_103] : memref<128x128xf32, #tpu.memory_space<vmem>>, vector<1x128xf32>
    %167 = arith.maximumf %166, %159 : vector<1x128xf32>
    %168 = arith.index_cast %158 : i32 to index
    %c0_104 = arith.constant 0 : index
    %169 = vector.load %arg26[%168, %c0_104] : memref<128x128xf32, #tpu.memory_space<vmem>>, vector<1x128xf32>
    tpu.vector_store %arg26[%168, %c0_104], %167 {strides = array<i32>} : memref<128x128xf32, #tpu.memory_space<vmem>>, vector<1x128xf32>,
    %c10 = arith.constant 10 : index
    %170 = memref.load %arg1[%c10] : memref<64xi32, #tpu.memory_space<smem>>
    %c10_105 = arith.constant 10 : index
    %c0_106 = arith.constant 0 : index
    %171 = vector.load %arg24[%c10_105, %c0_106] : memref<64x128xf32, #tpu.memory_space<vmem>>, vector<1x128xf32>
    %172 = arith.index_cast %170 : i32 to index
    %c0_107 = arith.constant 0 : index
    %173 = vector.load %arg25[%172, %c0_107] : memref<128x128xf32, #tpu.memory_space<vmem>>, vector<1x128xf32>
    %174 = arith.minimumf %173, %171 : vector<1x128xf32>
    %175 = arith.index_cast %170 : i32 to index
    %c0_108 = arith.constant 0 : index
    %176 = vector.load %arg25[%175, %c0_108] : memref<128x128xf32, #tpu.memory_space<vmem>>, vector<1x128xf32>
    tpu.vector_store %arg25[%175, %c0_108], %174 {strides = array<i32>} : memref<128x128xf32, #tpu.memory_space<vmem>>, vector<1x128xf32>,
    %177 = arith.index_cast %170 : i32 to index
    %c0_109 = arith.constant 0 : index
    %178 = vector.load %arg26[%177, %c0_109] : memref<128x128xf32, #tpu.memory_space<vmem>>, vector<1x128xf32>
    %179 = arith.maximumf %178, %171 : vector<1x128xf32>
    %180 = arith.index_cast %170 : i32 to index
    %c0_110 = arith.constant 0 : index
    %181 = vector.load %arg26[%180, %c0_110] : memref<128x128xf32, #tpu.memory_space<vmem>>, vector<1x128xf32>
    tpu.vector_store %arg26[%180, %c0_110], %179 {strides = array<i32>} : memref<128x128xf32, #tpu.memory_space<vmem>>, vector<1x128xf32>,
    %c11 = arith.constant 11 : index
    %182 = memref.load %arg1[%c11] : memref<64xi32, #tpu.memory_space<smem>>
    %c11_111 = arith.constant 11 : index
    %c0_112 = arith.constant 0 : index
    %183 = vector.load %arg24[%c11_111, %c0_112] : memref<64x128xf32, #tpu.memory_space<vmem>>, vector<1x128xf32>
    %184 = arith.index_cast %182 : i32 to index
    %c0_113 = arith.constant 0 : index
    %185 = vector.load %arg25[%184, %c0_113] : memref<128x128xf32, #tpu.memory_space<vmem>>, vector<1x128xf32>
    %186 = arith.minimumf %185, %183 : vector<1x128xf32>
    %187 = arith.index_cast %182 : i32 to index
    %c0_114 = arith.constant 0 : index
    %188 = vector.load %arg25[%187, %c0_114] : memref<128x128xf32, #tpu.memory_space<vmem>>, vector<1x128xf32>
    tpu.vector_store %arg25[%187, %c0_114], %186 {strides = array<i32>} : memref<128x128xf32, #tpu.memory_space<vmem>>, vector<1x128xf32>,
    %189 = arith.index_cast %182 : i32 to index
    %c0_115 = arith.constant 0 : index
    %190 = vector.load %arg26[%189, %c0_115] : memref<128x128xf32, #tpu.memory_space<vmem>>, vector<1x128xf32>
    %191 = arith.maximumf %190, %183 : vector<1x128xf32>
    %192 = arith.index_cast %182 : i32 to index
    %c0_116 = arith.constant 0 : index
    %193 = vector.load %arg26[%192, %c0_116] : memref<128x128xf32, #tpu.memory_space<vmem>>, vector<1x128xf32>
    tpu.vector_store %arg26[%192, %c0_116], %191 {strides = array<i32>} : memref<128x128xf32, #tpu.memory_space<vmem>>, vector<1x128xf32>,
    %c12 = arith.constant 12 : index
    %194 = memref.load %arg1[%c12] : memref<64xi32, #tpu.memory_space<smem>>
    %c12_117 = arith.constant 12 : index
    %c0_118 = arith.constant 0 : index
    %195 = vector.load %arg24[%c12_117, %c0_118] : memref<64x128xf32, #tpu.memory_space<vmem>>, vector<1x128xf32>
    %196 = arith.index_cast %194 : i32 to index
    %c0_119 = arith.constant 0 : index
    %197 = vector.load %arg25[%196, %c0_119] : memref<128x128xf32, #tpu.memory_space<vmem>>, vector<1x128xf32>
    %198 = arith.minimumf %197, %195 : vector<1x128xf32>
    %199 = arith.index_cast %194 : i32 to index
    %c0_120 = arith.constant 0 : index
    %200 = vector.load %arg25[%199, %c0_120] : memref<128x128xf32, #tpu.memory_space<vmem>>, vector<1x128xf32>
    tpu.vector_store %arg25[%199, %c0_120], %198 {strides = array<i32>} : memref<128x128xf32, #tpu.memory_space<vmem>>, vector<1x128xf32>,
    %201 = arith.index_cast %194 : i32 to index
    %c0_121 = arith.constant 0 : index
    %202 = vector.load %arg26[%201, %c0_121] : memref<128x128xf32, #tpu.memory_space<vmem>>, vector<1x128xf32>
    %203 = arith.maximumf %202, %195 : vector<1x128xf32>
    %204 = arith.index_cast %194 : i32 to index
    %c0_122 = arith.constant 0 : index
    %205 = vector.load %arg26[%204, %c0_122] : memref<128x128xf32, #tpu.memory_space<vmem>>, vector<1x128xf32>
    tpu.vector_store %arg26[%204, %c0_122], %203 {strides = array<i32>} : memref<128x128xf32, #tpu.memory_space<vmem>>, vector<1x128xf32>,
    %c13 = arith.constant 13 : index
    %206 = memref.load %arg1[%c13] : memref<64xi32, #tpu.memory_space<smem>>
    %c13_123 = arith.constant 13 : index
    %c0_124 = arith.constant 0 : index
    %207 = vector.load %arg24[%c13_123, %c0_124] : memref<64x128xf32, #tpu.memory_space<vmem>>, vector<1x128xf32>
    %208 = arith.index_cast %206 : i32 to index
    %c0_125 = arith.constant 0 : index
    %209 = vector.load %arg25[%208, %c0_125] : memref<128x128xf32, #tpu.memory_space<vmem>>, vector<1x128xf32>
    %210 = arith.minimumf %209, %207 : vector<1x128xf32>
    %211 = arith.index_cast %206 : i32 to index
    %c0_126 = arith.constant 0 : index
    %212 = vector.load %arg25[%211, %c0_126] : memref<128x128xf32, #tpu.memory_space<vmem>>, vector<1x128xf32>
    tpu.vector_store %arg25[%211, %c0_126], %210 {strides = array<i32>} : memref<128x128xf32, #tpu.memory_space<vmem>>, vector<1x128xf32>,
    %213 = arith.index_cast %206 : i32 to index
    %c0_127 = arith.constant 0 : index
    %214 = vector.load %arg26[%213, %c0_127] : memref<128x128xf32, #tpu.memory_space<vmem>>, vector<1x128xf32>
    %215 = arith.maximumf %214, %207 : vector<1x128xf32>
    %216 = arith.index_cast %206 : i32 to index
    %c0_128 = arith.constant 0 : index
    %217 = vector.load %arg26[%216, %c0_128] : memref<128x128xf32, #tpu.memory_space<vmem>>, vector<1x128xf32>
    tpu.vector_store %arg26[%216, %c0_128], %215 {strides = array<i32>} : memref<128x128xf32, #tpu.memory_space<vmem>>, vector<1x128xf32>,
    %c14 = arith.constant 14 : index
    %218 = memref.load %arg1[%c14] : memref<64xi32, #tpu.memory_space<smem>>
    %c14_129 = arith.constant 14 : index
    %c0_130 = arith.constant 0 : index
    %219 = vector.load %arg24[%c14_129, %c0_130] : memref<64x128xf32, #tpu.memory_space<vmem>>, vector<1x128xf32>
    %220 = arith.index_cast %218 : i32 to index
    %c0_131 = arith.constant 0 : index
    %221 = vector.load %arg25[%220, %c0_131] : memref<128x128xf32, #tpu.memory_space<vmem>>, vector<1x128xf32>
    %222 = arith.minimumf %221, %219 : vector<1x128xf32>
    %223 = arith.index_cast %218 : i32 to index
    %c0_132 = arith.constant 0 : index
    %224 = vector.load %arg25[%223, %c0_132] : memref<128x128xf32, #tpu.memory_space<vmem>>, vector<1x128xf32>
    tpu.vector_store %arg25[%223, %c0_132], %222 {strides = array<i32>} : memref<128x128xf32, #tpu.memory_space<vmem>>, vector<1x128xf32>,
    %225 = arith.index_cast %218 : i32 to index
    %c0_133 = arith.constant 0 : index
    %226 = vector.load %arg26[%225, %c0_133] : memref<128x128xf32, #tpu.memory_space<vmem>>, vector<1x128xf32>
    %227 = arith.maximumf %226, %219 : vector<1x128xf32>
    %228 = arith.index_cast %218 : i32 to index
    %c0_134 = arith.constant 0 : index
    %229 = vector.load %arg26[%228, %c0_134] : memref<128x128xf32, #tpu.memory_space<vmem>>, vector<1x128xf32>
    tpu.vector_store %arg26[%228, %c0_134], %227 {strides = array<i32>} : memref<128x128xf32, #tpu.memory_space<vmem>>, vector<1x128xf32>,
    %c15 = arith.constant 15 : index
    %230 = memref.load %arg1[%c15] : memref<64xi32, #tpu.memory_space<smem>>
    %c15_135 = arith.constant 15 : index
    %c0_136 = arith.constant 0 : index
    %231 = vector.load %arg24[%c15_135, %c0_136] : memref<64x128xf32, #tpu.memory_space<vmem>>, vector<1x128xf32>
    %232 = arith.index_cast %230 : i32 to index
    %c0_137 = arith.constant 0 : index
    %233 = vector.load %arg25[%232, %c0_137] : memref<128x128xf32, #tpu.memory_space<vmem>>, vector<1x128xf32>
    %234 = arith.minimumf %233, %231 : vector<1x128xf32>
    %235 = arith.index_cast %230 : i32 to index
    %c0_138 = arith.constant 0 : index
    %236 = vector.load %arg25[%235, %c0_138] : memref<128x128xf32, #tpu.memory_space<vmem>>, vector<1x128xf32>
    tpu.vector_store %arg25[%235, %c0_138], %234 {strides = array<i32>} : memref<128x128xf32, #tpu.memory_space<vmem>>, vector<1x128xf32>,
    %237 = arith.index_cast %230 : i32 to index
    %c0_139 = arith.constant 0 : index
    %238 = vector.load %arg26[%237, %c0_139] : memref<128x128xf32, #tpu.memory_space<vmem>>, vector<1x128xf32>
    %239 = arith.maximumf %238, %231 : vector<1x128xf32>
    %240 = arith.index_cast %230 : i32 to index
    %c0_140 = arith.constant 0 : index
    %241 = vector.load %arg26[%240, %c0_140] : memref<128x128xf32, #tpu.memory_space<vmem>>, vector<1x128xf32>
    tpu.vector_store %arg26[%240, %c0_140], %239 {strides = array<i32>} : memref<128x128xf32, #tpu.memory_space<vmem>>, vector<1x128xf32>,
    %c16 = arith.constant 16 : index
    %242 = memref.load %arg1[%c16] : memref<64xi32, #tpu.memory_space<smem>>
    %c16_141 = arith.constant 16 : index
    %c0_142 = arith.constant 0 : index
    %243 = vector.load %arg24[%c16_141, %c0_142] : memref<64x128xf32, #tpu.memory_space<vmem>>, vector<1x128xf32>
    %244 = arith.index_cast %242 : i32 to index
    %c0_143 = arith.constant 0 : index
    %245 = vector.load %arg25[%244, %c0_143] : memref<128x128xf32, #tpu.memory_space<vmem>>, vector<1x128xf32>
    %246 = arith.minimumf %245, %243 : vector<1x128xf32>
    %247 = arith.index_cast %242 : i32 to index
    %c0_144 = arith.constant 0 : index
    %248 = vector.load %arg25[%247, %c0_144] : memref<128x128xf32, #tpu.memory_space<vmem>>, vector<1x128xf32>
    tpu.vector_store %arg25[%247, %c0_144], %246 {strides = array<i32>} : memref<128x128xf32, #tpu.memory_space<vmem>>, vector<1x128xf32>,
    %249 = arith.index_cast %242 : i32 to index
    %c0_145 = arith.constant 0 : index
    %250 = vector.load %arg26[%249, %c0_145] : memref<128x128xf32, #tpu.memory_space<vmem>>, vector<1x128xf32>
    %251 = arith.maximumf %250, %243 : vector<1x128xf32>
    %252 = arith.index_cast %242 : i32 to index
    %c0_146 = arith.constant 0 : index
    %253 = vector.load %arg26[%252, %c0_146] : memref<128x128xf32, #tpu.memory_space<vmem>>, vector<1x128xf32>
    tpu.vector_store %arg26[%252, %c0_146], %251 {strides = array<i32>} : memref<128x128xf32, #tpu.memory_space<vmem>>, vector<1x128xf32>,
    %c17 = arith.constant 17 : index
    %254 = memref.load %arg1[%c17] : memref<64xi32, #tpu.memory_space<smem>>
    %c17_147 = arith.constant 17 : index
    %c0_148 = arith.constant 0 : index
    %255 = vector.load %arg24[%c17_147, %c0_148] : memref<64x128xf32, #tpu.memory_space<vmem>>, vector<1x128xf32>
    %256 = arith.index_cast %254 : i32 to index
    %c0_149 = arith.constant 0 : index
    %257 = vector.load %arg25[%256, %c0_149] : memref<128x128xf32, #tpu.memory_space<vmem>>, vector<1x128xf32>
    %258 = arith.minimumf %257, %255 : vector<1x128xf32>
    %259 = arith.index_cast %254 : i32 to index
    %c0_150 = arith.constant 0 : index
    %260 = vector.load %arg25[%259, %c0_150] : memref<128x128xf32, #tpu.memory_space<vmem>>, vector<1x128xf32>
    tpu.vector_store %arg25[%259, %c0_150], %258 {strides = array<i32>} : memref<128x128xf32, #tpu.memory_space<vmem>>, vector<1x128xf32>,
    %261 = arith.index_cast %254 : i32 to index
    %c0_151 = arith.constant 0 : index
    %262 = vector.load %arg26[%261, %c0_151] : memref<128x128xf32, #tpu.memory_space<vmem>>, vector<1x128xf32>
    %263 = arith.maximumf %262, %255 : vector<1x128xf32>
    %264 = arith.index_cast %254 : i32 to index
    %c0_152 = arith.constant 0 : index
    %265 = vector.load %arg26[%264, %c0_152] : memref<128x128xf32, #tpu.memory_space<vmem>>, vector<1x128xf32>
    tpu.vector_store %arg26[%264, %c0_152], %263 {strides = array<i32>} : memref<128x128xf32, #tpu.memory_space<vmem>>, vector<1x128xf32>,
    %c18 = arith.constant 18 : index
    %266 = memref.load %arg1[%c18] : memref<64xi32, #tpu.memory_space<smem>>
    %c18_153 = arith.constant 18 : index
    %c0_154 = arith.constant 0 : index
    %267 = vector.load %arg24[%c18_153, %c0_154] : memref<64x128xf32, #tpu.memory_space<vmem>>, vector<1x128xf32>
    %268 = arith.index_cast %266 : i32 to index
    %c0_155 = arith.constant 0 : index
    %269 = vector.load %arg25[%268, %c0_155] : memref<128x128xf32, #tpu.memory_space<vmem>>, vector<1x128xf32>
    %270 = arith.minimumf %269, %267 : vector<1x128xf32>
    %271 = arith.index_cast %266 : i32 to index
    %c0_156 = arith.constant 0 : index
    %272 = vector.load %arg25[%271, %c0_156] : memref<128x128xf32, #tpu.memory_space<vmem>>, vector<1x128xf32>
    tpu.vector_store %arg25[%271, %c0_156], %270 {strides = array<i32>} : memref<128x128xf32, #tpu.memory_space<vmem>>, vector<1x128xf32>,
    %273 = arith.index_cast %266 : i32 to index
    %c0_157 = arith.constant 0 : index
    %274 = vector.load %arg26[%273, %c0_157] : memref<128x128xf32, #tpu.memory_space<vmem>>, vector<1x128xf32>
    %275 = arith.maximumf %274, %267 : vector<1x128xf32>
    %276 = arith.index_cast %266 : i32 to index
    %c0_158 = arith.constant 0 : index
    %277 = vector.load %arg26[%276, %c0_158] : memref<128x128xf32, #tpu.memory_space<vmem>>, vector<1x128xf32>
    tpu.vector_store %arg26[%276, %c0_158], %275 {strides = array<i32>} : memref<128x128xf32, #tpu.memory_space<vmem>>, vector<1x128xf32>,
    %c19 = arith.constant 19 : index
    %278 = memref.load %arg1[%c19] : memref<64xi32, #tpu.memory_space<smem>>
    %c19_159 = arith.constant 19 : index
    %c0_160 = arith.constant 0 : index
    %279 = vector.load %arg24[%c19_159, %c0_160] : memref<64x128xf32, #tpu.memory_space<vmem>>, vector<1x128xf32>
    %280 = arith.index_cast %278 : i32 to index
    %c0_161 = arith.constant 0 : index
    %281 = vector.load %arg25[%280, %c0_161] : memref<128x128xf32, #tpu.memory_space<vmem>>, vector<1x128xf32>
    %282 = arith.minimumf %281, %279 : vector<1x128xf32>
    %283 = arith.index_cast %278 : i32 to index
    %c0_162 = arith.constant 0 : index
    %284 = vector.load %arg25[%283, %c0_162] : memref<128x128xf32, #tpu.memory_space<vmem>>, vector<1x128xf32>
    tpu.vector_store %arg25[%283, %c0_162], %282 {strides = array<i32>} : memref<128x128xf32, #tpu.memory_space<vmem>>, vector<1x128xf32>,
    %285 = arith.index_cast %278 : i32 to index
    %c0_163 = arith.constant 0 : index
    %286 = vector.load %arg26[%285, %c0_163] : memref<128x128xf32, #tpu.memory_space<vmem>>, vector<1x128xf32>
    %287 = arith.maximumf %286, %279 : vector<1x128xf32>
    %288 = arith.index_cast %278 : i32 to index
    %c0_164 = arith.constant 0 : index
    %289 = vector.load %arg26[%288, %c0_164] : memref<128x128xf32, #tpu.memory_space<vmem>>, vector<1x128xf32>
    tpu.vector_store %arg26[%288, %c0_164], %287 {strides = array<i32>} : memref<128x128xf32, #tpu.memory_space<vmem>>, vector<1x128xf32>,
    %c20 = arith.constant 20 : index
    %290 = memref.load %arg1[%c20] : memref<64xi32, #tpu.memory_space<smem>>
    %c20_165 = arith.constant 20 : index
    %c0_166 = arith.constant 0 : index
    %291 = vector.load %arg24[%c20_165, %c0_166] : memref<64x128xf32, #tpu.memory_space<vmem>>, vector<1x128xf32>
    %292 = arith.index_cast %290 : i32 to index
    %c0_167 = arith.constant 0 : index
    %293 = vector.load %arg25[%292, %c0_167] : memref<128x128xf32, #tpu.memory_space<vmem>>, vector<1x128xf32>
    %294 = arith.minimumf %293, %291 : vector<1x128xf32>
    %295 = arith.index_cast %290 : i32 to index
    %c0_168 = arith.constant 0 : index
    %296 = vector.load %arg25[%295, %c0_168] : memref<128x128xf32, #tpu.memory_space<vmem>>, vector<1x128xf32>
    tpu.vector_store %arg25[%295, %c0_168], %294 {strides = array<i32>} : memref<128x128xf32, #tpu.memory_space<vmem>>, vector<1x128xf32>,
    %297 = arith.index_cast %290 : i32 to index
    %c0_169 = arith.constant 0 : index
    %298 = vector.load %arg26[%297, %c0_169] : memref<128x128xf32, #tpu.memory_space<vmem>>, vector<1x128xf32>
    %299 = arith.maximumf %298, %291 : vector<1x128xf32>
    %300 = arith.index_cast %290 : i32 to index
    %c0_170 = arith.constant 0 : index
    %301 = vector.load %arg26[%300, %c0_170] : memref<128x128xf32, #tpu.memory_space<vmem>>, vector<1x128xf32>
    tpu.vector_store %arg26[%300, %c0_170], %299 {strides = array<i32>} : memref<128x128xf32, #tpu.memory_space<vmem>>, vector<1x128xf32>,
    %c21 = arith.constant 21 : index
    %302 = memref.load %arg1[%c21] : memref<64xi32, #tpu.memory_space<smem>>
    %c21_171 = arith.constant 21 : index
    %c0_172 = arith.constant 0 : index
    %303 = vector.load %arg24[%c21_171, %c0_172] : memref<64x128xf32, #tpu.memory_space<vmem>>, vector<1x128xf32>
    %304 = arith.index_cast %302 : i32 to index
    %c0_173 = arith.constant 0 : index
    %305 = vector.load %arg25[%304, %c0_173] : memref<128x128xf32, #tpu.memory_space<vmem>>, vector<1x128xf32>
    %306 = arith.minimumf %305, %303 : vector<1x128xf32>
    %307 = arith.index_cast %302 : i32 to index
    %c0_174 = arith.constant 0 : index
    %308 = vector.load %arg25[%307, %c0_174] : memref<128x128xf32, #tpu.memory_space<vmem>>, vector<1x128xf32>
    tpu.vector_store %arg25[%307, %c0_174], %306 {strides = array<i32>} : memref<128x128xf32, #tpu.memory_space<vmem>>, vector<1x128xf32>,
    %309 = arith.index_cast %302 : i32 to index
    %c0_175 = arith.constant 0 : index
    %310 = vector.load %arg26[%309, %c0_175] : memref<128x128xf32, #tpu.memory_space<vmem>>, vector<1x128xf32>
    %311 = arith.maximumf %310, %303 : vector<1x128xf32>
    %312 = arith.index_cast %302 : i32 to index
    %c0_176 = arith.constant 0 : index
    %313 = vector.load %arg26[%312, %c0_176] : memref<128x128xf32, #tpu.memory_space<vmem>>, vector<1x128xf32>
    tpu.vector_store %arg26[%312, %c0_176], %311 {strides = array<i32>} : memref<128x128xf32, #tpu.memory_space<vmem>>, vector<1x128xf32>,
    %c22 = arith.constant 22 : index
    %314 = memref.load %arg1[%c22] : memref<64xi32, #tpu.memory_space<smem>>
    %c22_177 = arith.constant 22 : index
    %c0_178 = arith.constant 0 : index
    %315 = vector.load %arg24[%c22_177, %c0_178] : memref<64x128xf32, #tpu.memory_space<vmem>>, vector<1x128xf32>
    %316 = arith.index_cast %314 : i32 to index
    %c0_179 = arith.constant 0 : index
    %317 = vector.load %arg25[%316, %c0_179] : memref<128x128xf32, #tpu.memory_space<vmem>>, vector<1x128xf32>
    %318 = arith.minimumf %317, %315 : vector<1x128xf32>
    %319 = arith.index_cast %314 : i32 to index
    %c0_180 = arith.constant 0 : index
    %320 = vector.load %arg25[%319, %c0_180] : memref<128x128xf32, #tpu.memory_space<vmem>>, vector<1x128xf32>
    tpu.vector_store %arg25[%319, %c0_180], %318 {strides = array<i32>} : memref<128x128xf32, #tpu.memory_space<vmem>>, vector<1x128xf32>,
    %321 = arith.index_cast %314 : i32 to index
    %c0_181 = arith.constant 0 : index
    %322 = vector.load %arg26[%321, %c0_181] : memref<128x128xf32, #tpu.memory_space<vmem>>, vector<1x128xf32>
    %323 = arith.maximumf %322, %315 : vector<1x128xf32>
    %324 = arith.index_cast %314 : i32 to index
    %c0_182 = arith.constant 0 : index
    %325 = vector.load %arg26[%324, %c0_182] : memref<128x128xf32, #tpu.memory_space<vmem>>, vector<1x128xf32>
    tpu.vector_store %arg26[%324, %c0_182], %323 {strides = array<i32>} : memref<128x128xf32, #tpu.memory_space<vmem>>, vector<1x128xf32>,
    %c23 = arith.constant 23 : index
    %326 = memref.load %arg1[%c23] : memref<64xi32, #tpu.memory_space<smem>>
    %c23_183 = arith.constant 23 : index
    %c0_184 = arith.constant 0 : index
    %327 = vector.load %arg24[%c23_183, %c0_184] : memref<64x128xf32, #tpu.memory_space<vmem>>, vector<1x128xf32>
    %328 = arith.index_cast %326 : i32 to index
    %c0_185 = arith.constant 0 : index
    %329 = vector.load %arg25[%328, %c0_185] : memref<128x128xf32, #tpu.memory_space<vmem>>, vector<1x128xf32>
    %330 = arith.minimumf %329, %327 : vector<1x128xf32>
    %331 = arith.index_cast %326 : i32 to index
    %c0_186 = arith.constant 0 : index
    %332 = vector.load %arg25[%331, %c0_186] : memref<128x128xf32, #tpu.memory_space<vmem>>, vector<1x128xf32>
    tpu.vector_store %arg25[%331, %c0_186], %330 {strides = array<i32>} : memref<128x128xf32, #tpu.memory_space<vmem>>, vector<1x128xf32>,
    %333 = arith.index_cast %326 : i32 to index
    %c0_187 = arith.constant 0 : index
    %334 = vector.load %arg26[%333, %c0_187] : memref<128x128xf32, #tpu.memory_space<vmem>>, vector<1x128xf32>
    %335 = arith.maximumf %334, %327 : vector<1x128xf32>
    %336 = arith.index_cast %326 : i32 to index
    %c0_188 = arith.constant 0 : index
    %337 = vector.load %arg26[%336, %c0_188] : memref<128x128xf32, #tpu.memory_space<vmem>>, vector<1x128xf32>
    tpu.vector_store %arg26[%336, %c0_188], %335 {strides = array<i32>} : memref<128x128xf32, #tpu.memory_space<vmem>>, vector<1x128xf32>,
    %c24 = arith.constant 24 : index
    %338 = memref.load %arg1[%c24] : memref<64xi32, #tpu.memory_space<smem>>
    %c24_189 = arith.constant 24 : index
    %c0_190 = arith.constant 0 : index
    %339 = vector.load %arg24[%c24_189, %c0_190] : memref<64x128xf32, #tpu.memory_space<vmem>>, vector<1x128xf32>
    %340 = arith.index_cast %338 : i32 to index
    %c0_191 = arith.constant 0 : index
    %341 = vector.load %arg25[%340, %c0_191] : memref<128x128xf32, #tpu.memory_space<vmem>>, vector<1x128xf32>
    %342 = arith.minimumf %341, %339 : vector<1x128xf32>
    %343 = arith.index_cast %338 : i32 to index
    %c0_192 = arith.constant 0 : index
    %344 = vector.load %arg25[%343, %c0_192] : memref<128x128xf32, #tpu.memory_space<vmem>>, vector<1x128xf32>
    tpu.vector_store %arg25[%343, %c0_192], %342 {strides = array<i32>} : memref<128x128xf32, #tpu.memory_space<vmem>>, vector<1x128xf32>,
    %345 = arith.index_cast %338 : i32 to index
    %c0_193 = arith.constant 0 : index
    %346 = vector.load %arg26[%345, %c0_193] : memref<128x128xf32, #tpu.memory_space<vmem>>, vector<1x128xf32>
    %347 = arith.maximumf %346, %339 : vector<1x128xf32>
    %348 = arith.index_cast %338 : i32 to index
    %c0_194 = arith.constant 0 : index
    %349 = vector.load %arg26[%348, %c0_194] : memref<128x128xf32, #tpu.memory_space<vmem>>, vector<1x128xf32>
    tpu.vector_store %arg26[%348, %c0_194], %347 {strides = array<i32>} : memref<128x128xf32, #tpu.memory_space<vmem>>, vector<1x128xf32>,
    %c25 = arith.constant 25 : index
    %350 = memref.load %arg1[%c25] : memref<64xi32, #tpu.memory_space<smem>>
    %c25_195 = arith.constant 25 : index
    %c0_196 = arith.constant 0 : index
    %351 = vector.load %arg24[%c25_195, %c0_196] : memref<64x128xf32, #tpu.memory_space<vmem>>, vector<1x128xf32>
    %352 = arith.index_cast %350 : i32 to index
    %c0_197 = arith.constant 0 : index
    %353 = vector.load %arg25[%352, %c0_197] : memref<128x128xf32, #tpu.memory_space<vmem>>, vector<1x128xf32>
    %354 = arith.minimumf %353, %351 : vector<1x128xf32>
    %355 = arith.index_cast %350 : i32 to index
    %c0_198 = arith.constant 0 : index
    %356 = vector.load %arg25[%355, %c0_198] : memref<128x128xf32, #tpu.memory_space<vmem>>, vector<1x128xf32>
    tpu.vector_store %arg25[%355, %c0_198], %354 {strides = array<i32>} : memref<128x128xf32, #tpu.memory_space<vmem>>, vector<1x128xf32>,
    %357 = arith.index_cast %350 : i32 to index
    %c0_199 = arith.constant 0 : index
    %358 = vector.load %arg26[%357, %c0_199] : memref<128x128xf32, #tpu.memory_space<vmem>>, vector<1x128xf32>
    %359 = arith.maximumf %358, %351 : vector<1x128xf32>
    %360 = arith.index_cast %350 : i32 to index
    %c0_200 = arith.constant 0 : index
    %361 = vector.load %arg26[%360, %c0_200] : memref<128x128xf32, #tpu.memory_space<vmem>>, vector<1x128xf32>
    tpu.vector_store %arg26[%360, %c0_200], %359 {strides = array<i32>} : memref<128x128xf32, #tpu.memory_space<vmem>>, vector<1x128xf32>,
    %c26 = arith.constant 26 : index
    %362 = memref.load %arg1[%c26] : memref<64xi32, #tpu.memory_space<smem>>
    %c26_201 = arith.constant 26 : index
    %c0_202 = arith.constant 0 : index
    %363 = vector.load %arg24[%c26_201, %c0_202] : memref<64x128xf32, #tpu.memory_space<vmem>>, vector<1x128xf32>
    %364 = arith.index_cast %362 : i32 to index
    %c0_203 = arith.constant 0 : index
    %365 = vector.load %arg25[%364, %c0_203] : memref<128x128xf32, #tpu.memory_space<vmem>>, vector<1x128xf32>
    %366 = arith.minimumf %365, %363 : vector<1x128xf32>
    %367 = arith.index_cast %362 : i32 to index
    %c0_204 = arith.constant 0 : index
    %368 = vector.load %arg25[%367, %c0_204] : memref<128x128xf32, #tpu.memory_space<vmem>>, vector<1x128xf32>
    tpu.vector_store %arg25[%367, %c0_204], %366 {strides = array<i32>} : memref<128x128xf32, #tpu.memory_space<vmem>>, vector<1x128xf32>,
    %369 = arith.index_cast %362 : i32 to index
    %c0_205 = arith.constant 0 : index
    %370 = vector.load %arg26[%369, %c0_205] : memref<128x128xf32, #tpu.memory_space<vmem>>, vector<1x128xf32>
    %371 = arith.maximumf %370, %363 : vector<1x128xf32>
    %372 = arith.index_cast %362 : i32 to index
    %c0_206 = arith.constant 0 : index
    %373 = vector.load %arg26[%372, %c0_206] : memref<128x128xf32, #tpu.memory_space<vmem>>, vector<1x128xf32>
    tpu.vector_store %arg26[%372, %c0_206], %371 {strides = array<i32>} : memref<128x128xf32, #tpu.memory_space<vmem>>, vector<1x128xf32>,
    %c27 = arith.constant 27 : index
    %374 = memref.load %arg1[%c27] : memref<64xi32, #tpu.memory_space<smem>>
    %c27_207 = arith.constant 27 : index
    %c0_208 = arith.constant 0 : index
    %375 = vector.load %arg24[%c27_207, %c0_208] : memref<64x128xf32, #tpu.memory_space<vmem>>, vector<1x128xf32>
    %376 = arith.index_cast %374 : i32 to index
    %c0_209 = arith.constant 0 : index
    %377 = vector.load %arg25[%376, %c0_209] : memref<128x128xf32, #tpu.memory_space<vmem>>, vector<1x128xf32>
    %378 = arith.minimumf %377, %375 : vector<1x128xf32>
    %379 = arith.index_cast %374 : i32 to index
    %c0_210 = arith.constant 0 : index
    %380 = vector.load %arg25[%379, %c0_210] : memref<128x128xf32, #tpu.memory_space<vmem>>, vector<1x128xf32>
    tpu.vector_store %arg25[%379, %c0_210], %378 {strides = array<i32>} : memref<128x128xf32, #tpu.memory_space<vmem>>, vector<1x128xf32>,
    %381 = arith.index_cast %374 : i32 to index
    %c0_211 = arith.constant 0 : index
    %382 = vector.load %arg26[%381, %c0_211] : memref<128x128xf32, #tpu.memory_space<vmem>>, vector<1x128xf32>
    %383 = arith.maximumf %382, %375 : vector<1x128xf32>
    %384 = arith.index_cast %374 : i32 to index
    %c0_212 = arith.constant 0 : index
    %385 = vector.load %arg26[%384, %c0_212] : memref<128x128xf32, #tpu.memory_space<vmem>>, vector<1x128xf32>
    tpu.vector_store %arg26[%384, %c0_212], %383 {strides = array<i32>} : memref<128x128xf32, #tpu.memory_space<vmem>>, vector<1x128xf32>,
    %c28 = arith.constant 28 : index
    %386 = memref.load %arg1[%c28] : memref<64xi32, #tpu.memory_space<smem>>
    %c28_213 = arith.constant 28 : index
    %c0_214 = arith.constant 0 : index
    %387 = vector.load %arg24[%c28_213, %c0_214] : memref<64x128xf32, #tpu.memory_space<vmem>>, vector<1x128xf32>
    %388 = arith.index_cast %386 : i32 to index
    %c0_215 = arith.constant 0 : index
    %389 = vector.load %arg25[%388, %c0_215] : memref<128x128xf32, #tpu.memory_space<vmem>>, vector<1x128xf32>
    %390 = arith.minimumf %389, %387 : vector<1x128xf32>
    %391 = arith.index_cast %386 : i32 to index
    %c0_216 = arith.constant 0 : index
    %392 = vector.load %arg25[%391, %c0_216] : memref<128x128xf32, #tpu.memory_space<vmem>>, vector<1x128xf32>
    tpu.vector_store %arg25[%391, %c0_216], %390 {strides = array<i32>} : memref<128x128xf32, #tpu.memory_space<vmem>>, vector<1x128xf32>,
    %393 = arith.index_cast %386 : i32 to index
    %c0_217 = arith.constant 0 : index
    %394 = vector.load %arg26[%393, %c0_217] : memref<128x128xf32, #tpu.memory_space<vmem>>, vector<1x128xf32>
    %395 = arith.maximumf %394, %387 : vector<1x128xf32>
    %396 = arith.index_cast %386 : i32 to index
    %c0_218 = arith.constant 0 : index
    %397 = vector.load %arg26[%396, %c0_218] : memref<128x128xf32, #tpu.memory_space<vmem>>, vector<1x128xf32>
    tpu.vector_store %arg26[%396, %c0_218], %395 {strides = array<i32>} : memref<128x128xf32, #tpu.memory_space<vmem>>, vector<1x128xf32>,
    %c29 = arith.constant 29 : index
    %398 = memref.load %arg1[%c29] : memref<64xi32, #tpu.memory_space<smem>>
    %c29_219 = arith.constant 29 : index
    %c0_220 = arith.constant 0 : index
    %399 = vector.load %arg24[%c29_219, %c0_220] : memref<64x128xf32, #tpu.memory_space<vmem>>, vector<1x128xf32>
    %400 = arith.index_cast %398 : i32 to index
    %c0_221 = arith.constant 0 : index
    %401 = vector.load %arg25[%400, %c0_221] : memref<128x128xf32, #tpu.memory_space<vmem>>, vector<1x128xf32>
    %402 = arith.minimumf %401, %399 : vector<1x128xf32>
    %403 = arith.index_cast %398 : i32 to index
    %c0_222 = arith.constant 0 : index
    %404 = vector.load %arg25[%403, %c0_222] : memref<128x128xf32, #tpu.memory_space<vmem>>, vector<1x128xf32>
    tpu.vector_store %arg25[%403, %c0_222], %402 {strides = array<i32>} : memref<128x128xf32, #tpu.memory_space<vmem>>, vector<1x128xf32>,
    %405 = arith.index_cast %398 : i32 to index
    %c0_223 = arith.constant 0 : index
    %406 = vector.load %arg26[%405, %c0_223] : memref<128x128xf32, #tpu.memory_space<vmem>>, vector<1x128xf32>
    %407 = arith.maximumf %406, %399 : vector<1x128xf32>
    %408 = arith.index_cast %398 : i32 to index
    %c0_224 = arith.constant 0 : index
    %409 = vector.load %arg26[%408, %c0_224] : memref<128x128xf32, #tpu.memory_space<vmem>>, vector<1x128xf32>
    tpu.vector_store %arg26[%408, %c0_224], %407 {strides = array<i32>} : memref<128x128xf32, #tpu.memory_space<vmem>>, vector<1x128xf32>,
    %c30 = arith.constant 30 : index
    %410 = memref.load %arg1[%c30] : memref<64xi32, #tpu.memory_space<smem>>
    %c30_225 = arith.constant 30 : index
    %c0_226 = arith.constant 0 : index
    %411 = vector.load %arg24[%c30_225, %c0_226] : memref<64x128xf32, #tpu.memory_space<vmem>>, vector<1x128xf32>
    %412 = arith.index_cast %410 : i32 to index
    %c0_227 = arith.constant 0 : index
    %413 = vector.load %arg25[%412, %c0_227] : memref<128x128xf32, #tpu.memory_space<vmem>>, vector<1x128xf32>
    %414 = arith.minimumf %413, %411 : vector<1x128xf32>
    %415 = arith.index_cast %410 : i32 to index
    %c0_228 = arith.constant 0 : index
    %416 = vector.load %arg25[%415, %c0_228] : memref<128x128xf32, #tpu.memory_space<vmem>>, vector<1x128xf32>
    tpu.vector_store %arg25[%415, %c0_228], %414 {strides = array<i32>} : memref<128x128xf32, #tpu.memory_space<vmem>>, vector<1x128xf32>,
    %417 = arith.index_cast %410 : i32 to index
    %c0_229 = arith.constant 0 : index
    %418 = vector.load %arg26[%417, %c0_229] : memref<128x128xf32, #tpu.memory_space<vmem>>, vector<1x128xf32>
    %419 = arith.maximumf %418, %411 : vector<1x128xf32>
    %420 = arith.index_cast %410 : i32 to index
    %c0_230 = arith.constant 0 : index
    %421 = vector.load %arg26[%420, %c0_230] : memref<128x128xf32, #tpu.memory_space<vmem>>, vector<1x128xf32>
    tpu.vector_store %arg26[%420, %c0_230], %419 {strides = array<i32>} : memref<128x128xf32, #tpu.memory_space<vmem>>, vector<1x128xf32>,
    %c31 = arith.constant 31 : index
    %422 = memref.load %arg1[%c31] : memref<64xi32, #tpu.memory_space<smem>>
    %c31_231 = arith.constant 31 : index
    %c0_232 = arith.constant 0 : index
    %423 = vector.load %arg24[%c31_231, %c0_232] : memref<64x128xf32, #tpu.memory_space<vmem>>, vector<1x128xf32>
    %424 = arith.index_cast %422 : i32 to index
    %c0_233 = arith.constant 0 : index
    %425 = vector.load %arg25[%424, %c0_233] : memref<128x128xf32, #tpu.memory_space<vmem>>, vector<1x128xf32>
    %426 = arith.minimumf %425, %423 : vector<1x128xf32>
    %427 = arith.index_cast %422 : i32 to index
    %c0_234 = arith.constant 0 : index
    %428 = vector.load %arg25[%427, %c0_234] : memref<128x128xf32, #tpu.memory_space<vmem>>, vector<1x128xf32>
    tpu.vector_store %arg25[%427, %c0_234], %426 {strides = array<i32>} : memref<128x128xf32, #tpu.memory_space<vmem>>, vector<1x128xf32>,
    %429 = arith.index_cast %422 : i32 to index
    %c0_235 = arith.constant 0 : index
    %430 = vector.load %arg26[%429, %c0_235] : memref<128x128xf32, #tpu.memory_space<vmem>>, vector<1x128xf32>
    %431 = arith.maximumf %430, %423 : vector<1x128xf32>
    %432 = arith.index_cast %422 : i32 to index
    %c0_236 = arith.constant 0 : index
    %433 = vector.load %arg26[%432, %c0_236] : memref<128x128xf32, #tpu.memory_space<vmem>>, vector<1x128xf32>
    tpu.vector_store %arg26[%432, %c0_236], %431 {strides = array<i32>} : memref<128x128xf32, #tpu.memory_space<vmem>>, vector<1x128xf32>,
    %c32 = arith.constant 32 : index
    %434 = memref.load %arg1[%c32] : memref<64xi32, #tpu.memory_space<smem>>
    %c32_237 = arith.constant 32 : index
    %c0_238 = arith.constant 0 : index
    %435 = vector.load %arg24[%c32_237, %c0_238] : memref<64x128xf32, #tpu.memory_space<vmem>>, vector<1x128xf32>
    %436 = arith.index_cast %434 : i32 to index
    %c0_239 = arith.constant 0 : index
    %437 = vector.load %arg25[%436, %c0_239] : memref<128x128xf32, #tpu.memory_space<vmem>>, vector<1x128xf32>
    %438 = arith.minimumf %437, %435 : vector<1x128xf32>
    %439 = arith.index_cast %434 : i32 to index
    %c0_240 = arith.constant 0 : index
    %440 = vector.load %arg25[%439, %c0_240] : memref<128x128xf32, #tpu.memory_space<vmem>>, vector<1x128xf32>
    tpu.vector_store %arg25[%439, %c0_240], %438 {strides = array<i32>} : memref<128x128xf32, #tpu.memory_space<vmem>>, vector<1x128xf32>,
    %441 = arith.index_cast %434 : i32 to index
    %c0_241 = arith.constant 0 : index
    %442 = vector.load %arg26[%441, %c0_241] : memref<128x128xf32, #tpu.memory_space<vmem>>, vector<1x128xf32>
    %443 = arith.maximumf %442, %435 : vector<1x128xf32>
    %444 = arith.index_cast %434 : i32 to index
    %c0_242 = arith.constant 0 : index
    %445 = vector.load %arg26[%444, %c0_242] : memref<128x128xf32, #tpu.memory_space<vmem>>, vector<1x128xf32>
    tpu.vector_store %arg26[%444, %c0_242], %443 {strides = array<i32>} : memref<128x128xf32, #tpu.memory_space<vmem>>, vector<1x128xf32>,
    %c33 = arith.constant 33 : index
    %446 = memref.load %arg1[%c33] : memref<64xi32, #tpu.memory_space<smem>>
    %c33_243 = arith.constant 33 : index
    %c0_244 = arith.constant 0 : index
    %447 = vector.load %arg24[%c33_243, %c0_244] : memref<64x128xf32, #tpu.memory_space<vmem>>, vector<1x128xf32>
    %448 = arith.index_cast %446 : i32 to index
    %c0_245 = arith.constant 0 : index
    %449 = vector.load %arg25[%448, %c0_245] : memref<128x128xf32, #tpu.memory_space<vmem>>, vector<1x128xf32>
    %450 = arith.minimumf %449, %447 : vector<1x128xf32>
    %451 = arith.index_cast %446 : i32 to index
    %c0_246 = arith.constant 0 : index
    %452 = vector.load %arg25[%451, %c0_246] : memref<128x128xf32, #tpu.memory_space<vmem>>, vector<1x128xf32>
    tpu.vector_store %arg25[%451, %c0_246], %450 {strides = array<i32>} : memref<128x128xf32, #tpu.memory_space<vmem>>, vector<1x128xf32>,
    %453 = arith.index_cast %446 : i32 to index
    %c0_247 = arith.constant 0 : index
    %454 = vector.load %arg26[%453, %c0_247] : memref<128x128xf32, #tpu.memory_space<vmem>>, vector<1x128xf32>
    %455 = arith.maximumf %454, %447 : vector<1x128xf32>
    %456 = arith.index_cast %446 : i32 to index
    %c0_248 = arith.constant 0 : index
    %457 = vector.load %arg26[%456, %c0_248] : memref<128x128xf32, #tpu.memory_space<vmem>>, vector<1x128xf32>
    tpu.vector_store %arg26[%456, %c0_248], %455 {strides = array<i32>} : memref<128x128xf32, #tpu.memory_space<vmem>>, vector<1x128xf32>,
    %c34 = arith.constant 34 : index
    %458 = memref.load %arg1[%c34] : memref<64xi32, #tpu.memory_space<smem>>
    %c34_249 = arith.constant 34 : index
    %c0_250 = arith.constant 0 : index
    %459 = vector.load %arg24[%c34_249, %c0_250] : memref<64x128xf32, #tpu.memory_space<vmem>>, vector<1x128xf32>
    %460 = arith.index_cast %458 : i32 to index
    %c0_251 = arith.constant 0 : index
    %461 = vector.load %arg25[%460, %c0_251] : memref<128x128xf32, #tpu.memory_space<vmem>>, vector<1x128xf32>
    %462 = arith.minimumf %461, %459 : vector<1x128xf32>
    %463 = arith.index_cast %458 : i32 to index
    %c0_252 = arith.constant 0 : index
    %464 = vector.load %arg25[%463, %c0_252] : memref<128x128xf32, #tpu.memory_space<vmem>>, vector<1x128xf32>
    tpu.vector_store %arg25[%463, %c0_252], %462 {strides = array<i32>} : memref<128x128xf32, #tpu.memory_space<vmem>>, vector<1x128xf32>,
    %465 = arith.index_cast %458 : i32 to index
    %c0_253 = arith.constant 0 : index
    %466 = vector.load %arg26[%465, %c0_253] : memref<128x128xf32, #tpu.memory_space<vmem>>, vector<1x128xf32>
    %467 = arith.maximumf %466, %459 : vector<1x128xf32>
    %468 = arith.index_cast %458 : i32 to index
    %c0_254 = arith.constant 0 : index
    %469 = vector.load %arg26[%468, %c0_254] : memref<128x128xf32, #tpu.memory_space<vmem>>, vector<1x128xf32>
    tpu.vector_store %arg26[%468, %c0_254], %467 {strides = array<i32>} : memref<128x128xf32, #tpu.memory_space<vmem>>, vector<1x128xf32>,
    %c35 = arith.constant 35 : index
    %470 = memref.load %arg1[%c35] : memref<64xi32, #tpu.memory_space<smem>>
    %c35_255 = arith.constant 35 : index
    %c0_256 = arith.constant 0 : index
    %471 = vector.load %arg24[%c35_255, %c0_256] : memref<64x128xf32, #tpu.memory_space<vmem>>, vector<1x128xf32>
    %472 = arith.index_cast %470 : i32 to index
    %c0_257 = arith.constant 0 : index
    %473 = vector.load %arg25[%472, %c0_257] : memref<128x128xf32, #tpu.memory_space<vmem>>, vector<1x128xf32>
    %474 = arith.minimumf %473, %471 : vector<1x128xf32>
    %475 = arith.index_cast %470 : i32 to index
    %c0_258 = arith.constant 0 : index
    %476 = vector.load %arg25[%475, %c0_258] : memref<128x128xf32, #tpu.memory_space<vmem>>, vector<1x128xf32>
    tpu.vector_store %arg25[%475, %c0_258], %474 {strides = array<i32>} : memref<128x128xf32, #tpu.memory_space<vmem>>, vector<1x128xf32>,
    %477 = arith.index_cast %470 : i32 to index
    %c0_259 = arith.constant 0 : index
    %478 = vector.load %arg26[%477, %c0_259] : memref<128x128xf32, #tpu.memory_space<vmem>>, vector<1x128xf32>
    %479 = arith.maximumf %478, %471 : vector<1x128xf32>
    %480 = arith.index_cast %470 : i32 to index
    %c0_260 = arith.constant 0 : index
    %481 = vector.load %arg26[%480, %c0_260] : memref<128x128xf32, #tpu.memory_space<vmem>>, vector<1x128xf32>
    tpu.vector_store %arg26[%480, %c0_260], %479 {strides = array<i32>} : memref<128x128xf32, #tpu.memory_space<vmem>>, vector<1x128xf32>,
    %c36 = arith.constant 36 : index
    %482 = memref.load %arg1[%c36] : memref<64xi32, #tpu.memory_space<smem>>
    %c36_261 = arith.constant 36 : index
    %c0_262 = arith.constant 0 : index
    %483 = vector.load %arg24[%c36_261, %c0_262] : memref<64x128xf32, #tpu.memory_space<vmem>>, vector<1x128xf32>
    %484 = arith.index_cast %482 : i32 to index
    %c0_263 = arith.constant 0 : index
    %485 = vector.load %arg25[%484, %c0_263] : memref<128x128xf32, #tpu.memory_space<vmem>>, vector<1x128xf32>
    %486 = arith.minimumf %485, %483 : vector<1x128xf32>
    %487 = arith.index_cast %482 : i32 to index
    %c0_264 = arith.constant 0 : index
    %488 = vector.load %arg25[%487, %c0_264] : memref<128x128xf32, #tpu.memory_space<vmem>>, vector<1x128xf32>
    tpu.vector_store %arg25[%487, %c0_264], %486 {strides = array<i32>} : memref<128x128xf32, #tpu.memory_space<vmem>>, vector<1x128xf32>,
    %489 = arith.index_cast %482 : i32 to index
    %c0_265 = arith.constant 0 : index
    %490 = vector.load %arg26[%489, %c0_265] : memref<128x128xf32, #tpu.memory_space<vmem>>, vector<1x128xf32>
    %491 = arith.maximumf %490, %483 : vector<1x128xf32>
    %492 = arith.index_cast %482 : i32 to index
    %c0_266 = arith.constant 0 : index
    %493 = vector.load %arg26[%492, %c0_266] : memref<128x128xf32, #tpu.memory_space<vmem>>, vector<1x128xf32>
    tpu.vector_store %arg26[%492, %c0_266], %491 {strides = array<i32>} : memref<128x128xf32, #tpu.memory_space<vmem>>, vector<1x128xf32>,
    %c37 = arith.constant 37 : index
    %494 = memref.load %arg1[%c37] : memref<64xi32, #tpu.memory_space<smem>>
    %c37_267 = arith.constant 37 : index
    %c0_268 = arith.constant 0 : index
    %495 = vector.load %arg24[%c37_267, %c0_268] : memref<64x128xf32, #tpu.memory_space<vmem>>, vector<1x128xf32>
    %496 = arith.index_cast %494 : i32 to index
    %c0_269 = arith.constant 0 : index
    %497 = vector.load %arg25[%496, %c0_269] : memref<128x128xf32, #tpu.memory_space<vmem>>, vector<1x128xf32>
    %498 = arith.minimumf %497, %495 : vector<1x128xf32>
    %499 = arith.index_cast %494 : i32 to index
    %c0_270 = arith.constant 0 : index
    %500 = vector.load %arg25[%499, %c0_270] : memref<128x128xf32, #tpu.memory_space<vmem>>, vector<1x128xf32>
    tpu.vector_store %arg25[%499, %c0_270], %498 {strides = array<i32>} : memref<128x128xf32, #tpu.memory_space<vmem>>, vector<1x128xf32>,
    %501 = arith.index_cast %494 : i32 to index
    %c0_271 = arith.constant 0 : index
    %502 = vector.load %arg26[%501, %c0_271] : memref<128x128xf32, #tpu.memory_space<vmem>>, vector<1x128xf32>
    %503 = arith.maximumf %502, %495 : vector<1x128xf32>
    %504 = arith.index_cast %494 : i32 to index
    %c0_272 = arith.constant 0 : index
    %505 = vector.load %arg26[%504, %c0_272] : memref<128x128xf32, #tpu.memory_space<vmem>>, vector<1x128xf32>
    tpu.vector_store %arg26[%504, %c0_272], %503 {strides = array<i32>} : memref<128x128xf32, #tpu.memory_space<vmem>>, vector<1x128xf32>,
    %c38 = arith.constant 38 : index
    %506 = memref.load %arg1[%c38] : memref<64xi32, #tpu.memory_space<smem>>
    %c38_273 = arith.constant 38 : index
    %c0_274 = arith.constant 0 : index
    %507 = vector.load %arg24[%c38_273, %c0_274] : memref<64x128xf32, #tpu.memory_space<vmem>>, vector<1x128xf32>
    %508 = arith.index_cast %506 : i32 to index
    %c0_275 = arith.constant 0 : index
    %509 = vector.load %arg25[%508, %c0_275] : memref<128x128xf32, #tpu.memory_space<vmem>>, vector<1x128xf32>
    %510 = arith.minimumf %509, %507 : vector<1x128xf32>
    %511 = arith.index_cast %506 : i32 to index
    %c0_276 = arith.constant 0 : index
    %512 = vector.load %arg25[%511, %c0_276] : memref<128x128xf32, #tpu.memory_space<vmem>>, vector<1x128xf32>
    tpu.vector_store %arg25[%511, %c0_276], %510 {strides = array<i32>} : memref<128x128xf32, #tpu.memory_space<vmem>>, vector<1x128xf32>,
    %513 = arith.index_cast %506 : i32 to index
    %c0_277 = arith.constant 0 : index
    %514 = vector.load %arg26[%513, %c0_277] : memref<128x128xf32, #tpu.memory_space<vmem>>, vector<1x128xf32>
    %515 = arith.maximumf %514, %507 : vector<1x128xf32>
    %516 = arith.index_cast %506 : i32 to index
    %c0_278 = arith.constant 0 : index
    %517 = vector.load %arg26[%516, %c0_278] : memref<128x128xf32, #tpu.memory_space<vmem>>, vector<1x128xf32>
    tpu.vector_store %arg26[%516, %c0_278], %515 {strides = array<i32>} : memref<128x128xf32, #tpu.memory_space<vmem>>, vector<1x128xf32>,
    %c39 = arith.constant 39 : index
    %518 = memref.load %arg1[%c39] : memref<64xi32, #tpu.memory_space<smem>>
    %c39_279 = arith.constant 39 : index
    %c0_280 = arith.constant 0 : index
    %519 = vector.load %arg24[%c39_279, %c0_280] : memref<64x128xf32, #tpu.memory_space<vmem>>, vector<1x128xf32>
    %520 = arith.index_cast %518 : i32 to index
    %c0_281 = arith.constant 0 : index
    %521 = vector.load %arg25[%520, %c0_281] : memref<128x128xf32, #tpu.memory_space<vmem>>, vector<1x128xf32>
    %522 = arith.minimumf %521, %519 : vector<1x128xf32>
    %523 = arith.index_cast %518 : i32 to index
    %c0_282 = arith.constant 0 : index
    %524 = vector.load %arg25[%523, %c0_282] : memref<128x128xf32, #tpu.memory_space<vmem>>, vector<1x128xf32>
    tpu.vector_store %arg25[%523, %c0_282], %522 {strides = array<i32>} : memref<128x128xf32, #tpu.memory_space<vmem>>, vector<1x128xf32>,
    %525 = arith.index_cast %518 : i32 to index
    %c0_283 = arith.constant 0 : index
    %526 = vector.load %arg26[%525, %c0_283] : memref<128x128xf32, #tpu.memory_space<vmem>>, vector<1x128xf32>
    %527 = arith.maximumf %526, %519 : vector<1x128xf32>
    %528 = arith.index_cast %518 : i32 to index
    %c0_284 = arith.constant 0 : index
    %529 = vector.load %arg26[%528, %c0_284] : memref<128x128xf32, #tpu.memory_space<vmem>>, vector<1x128xf32>
    tpu.vector_store %arg26[%528, %c0_284], %527 {strides = array<i32>} : memref<128x128xf32, #tpu.memory_space<vmem>>, vector<1x128xf32>,
    %cst_285 = arith.constant 0.000000e+00 : f32
    %530 = vector.broadcast %cst_285 : f32 to vector<128x1xf32>
    %531 = arith.cmpf ogt, %30, %530 : vector<128x1xf32>
    %c0_286 = arith.constant 0 : index
    %c0_287 = arith.constant 0 : index
    %532 = vector.load %arg25[%c0_286, %c0_287] : memref<128x128xf32, #tpu.memory_space<vmem>>, vector<128x128xf32>
    %cst_288 = arith.constant 0.000000e+00 : f32
    %533 = vector.shape_cast %531 : vector<128x1xi1> to vector<128x1xi1>
    %534 = vector.broadcast %533 : vector<128x1xi1> to vector<128x128xi1>
    %535 = vector.broadcast %cst_288 : f32 to vector<128x128xf32>
    %536 = arith.select %534, %532, %535 : vector<128x128xi1>, vector<128x128xf32>
    %cst_289 = arith.constant 0.000000e+00 : f32
    %537 = vector.broadcast %cst_289 : f32 to vector<128x1xf32>
    %538 = arith.cmpf ogt, %30, %537 : vector<128x1xf32>
    %c0_290 = arith.constant 0 : index
    %c0_291 = arith.constant 0 : index
    %539 = vector.load %arg26[%c0_290, %c0_291] : memref<128x128xf32, #tpu.memory_space<vmem>>, vector<128x128xf32>
    %cst_292 = arith.constant 0.000000e+00 : f32
    %540 = vector.shape_cast %538 : vector<128x1xi1> to vector<128x1xi1>
    %541 = vector.broadcast %540 : vector<128x1xi1> to vector<128x128xi1>
    %542 = vector.broadcast %cst_292 : f32 to vector<128x128xf32>
    %543 = arith.select %541, %539, %542 : vector<128x128xi1>, vector<128x128xf32>
    %544 = arith.truncf %36 : vector<128x128xf32> to vector<128x128xbf16>
    %545 = arith.truncf %536 : vector<128x128xf32> to vector<128x128xbf16>
    %546 = arith.truncf %543 : vector<128x128xf32> to vector<128x128xbf16>
    %547 = arith.truncf %45 : vector<128x128xf32> to vector<128x128xbf16>
    %548 = tpu.concatenate %544, %545, %546, %547 in 1 : vector<128x128xbf16>, vector<128x128xbf16>, vector<128x128xbf16>, vector<128x128xbf16> -> vector<128x512xbf16>
    %c0_293 = arith.constant 0 : index
    %c0_294 = arith.constant 0 : index
    %c0_295 = arith.constant 0 : index
    %549 = vector.load %arg12[%c0_293, %c0_294, %c0_295] : memref<1x512x384xbf16, #tpu.memory_space<vmem>>, vector<1x512x384xbf16>
    %550 = vector.shape_cast %549 : vector<1x512x384xbf16> to vector<512x384xbf16>
    %cst_296 = arith.constant dense<0.000000e+00> : vector<128x384xf32>
    %551 = tpu.matmul %548, %550, %cst_296 {dimension_numbers = #tpu.dot_dimension_numbers<[1], [0], [0], [1], [0, 0, 1, 1], [], []>} : vector<128x512xbf16>, vector<512x384xbf16>, vector<128x384xf32> -> vector<128x384xf32>
    %c0_297 = arith.constant 0 : index
    %c0_298 = arith.constant 0 : index
    %c0_299 = arith.constant 0 : index
    %552 = vector.load %arg11[%c0_297, %c0_298, %c0_299] : memref<1x128x128xbf16, #tpu.memory_space<vmem>>, vector<1x128x128xbf16>
    %553 = vector.shape_cast %552 : vector<1x128x128xbf16> to vector<128x128xbf16>
    %cst_300 = arith.constant dense<0.000000e+00> : vector<128x128xf32>
    %554 = tpu.matmul %4, %553, %cst_300 {dimension_numbers = #tpu.dot_dimension_numbers<[1], [0], [0], [1], [0, 0, 1, 1], [], []>} : vector<128x128xbf16>, vector<128x128xbf16>, vector<128x128xf32> -> vector<128x128xf32>
    %555 = vector.extract_strided_slice %551 {offsets = [0, 0], sizes = [128, 128], strides = [1, 1]} : vector<128x384xf32> to vector<128x128xf32>
    %556 = arith.addf %554, %555 : vector<128x128xf32>
    %557 = vector.extract_strided_slice %551 {offsets = [0, 128], sizes = [128, 128], strides = [1, 1]} : vector<128x384xf32> to vector<128x128xf32>
    %558 = vector.broadcast %32 : vector<128x1xf32> to vector<128x128xf32>
    %559 = arith.mulf %558, %557 : vector<128x128xf32>
    %560 = arith.addf %556, %559 : vector<128x128xf32>
    %561 = vector.extract_strided_slice %551 {offsets = [0, 256], sizes = [128, 128], strides = [1, 1]} : vector<128x384xf32> to vector<128x128xf32>
    %562 = vector.broadcast %34 : vector<128x1xf32> to vector<128x128xf32>
    %563 = arith.mulf %562, %561 : vector<128x128xf32>
    %564 = arith.addf %560, %563 : vector<128x128xf32>
    %c0_301 = arith.constant 0 : index
    %c0_302 = arith.constant 0 : index
    %c0_303 = arith.constant 0 : index
    %565 = vector.load %arg13[%c0_301, %c0_302, %c0_303] : memref<1x1x128xf32, #tpu.memory_space<vmem>>, vector<1x1x128xf32>
    %566 = vector.shape_cast %565 : vector<1x1x128xf32> to vector<1x128xf32>
    %567 = vector.broadcast %566 : vector<1x128xf32> to vector<128x128xf32>
    %568 = arith.addf %564, %567 : vector<128x128xf32>
    %c0_304 = arith.constant 0 : index
    %c0_305 = arith.constant 0 : index
    %c0_306 = arith.constant 0 : index
    %569 = vector.load %arg14[%c0_304, %c0_305, %c0_306] : memref<1x1x128xf32, #tpu.memory_space<vmem>>, vector<1x1x128xf32>
    %570 = vector.shape_cast %569 : vector<1x1x128xf32> to vector<1x128xf32>
    %571 = vector.broadcast %570 : vector<1x128xf32> to vector<128x128xf32>
    %572 = arith.mulf %568, %571 : vector<128x128xf32>
    %c0_307 = arith.constant 0 : index
    %c0_308 = arith.constant 0 : index
    %c0_309 = arith.constant 0 : index
    %573 = vector.load %arg15[%c0_307, %c0_308, %c0_309] : memref<1x1x128xf32, #tpu.memory_space<vmem>>, vector<1x1x128xf32>
    %574 = vector.shape_cast %573 : vector<1x1x128xf32> to vector<1x128xf32>
    %575 = vector.broadcast %574 : vector<1x128xf32> to vector<128x128xf32>
    %576 = arith.addf %572, %575 : vector<128x128xf32>
    %cst_310 = arith.constant 0.000000e+00 : f32
    %577 = vector.broadcast %cst_310 : f32 to vector<128x128xf32>
    %578 = arith.maximumf %576, %577 : vector<128x128xf32>
    %579 = arith.addf %578, %3 : vector<128x128xf32>
    %c0_311 = arith.constant 0 : index
    %c0_312 = arith.constant 0 : index
    %580 = vector.load %arg23[%c0_311, %c0_312] : memref<128x128xf32, #tpu.memory_space<vmem>>, vector<128x128xf32>
    tpu.vector_store %arg23[%c0_311, %c0_312], %579 {strides = array<i32>} : memref<128x128xf32, #tpu.memory_space<vmem>>, vector<128x128xf32>,
    %c3_i32 = arith.constant 3 : i32
    %581 = arith.cmpi eq, %arg0, %c3_i32 : i32
    %582 = arith.extui %581 : i1 to i32
    %c0_i32_313 = arith.constant 0 : i32
    %583 = arith.cmpi ne, %582, %c0_i32_313 : i32
    scf.if %583 {
      %c0_314 = arith.constant 0 : index
      %c0_315 = arith.constant 0 : index
      %584 = vector.load %arg7[%c0_314, %c0_315] : memref<8x128xf32, #tpu.memory_space<vmem>>, vector<8x128xf32>
      %cst_316 = arith.constant dense<0.000000e+00> : vector<8x128xf32>
      %585 = tpu.matmul %584, %579, %cst_316 {dimension_numbers = #tpu.dot_dimension_numbers<[1], [0], [0], [1], [0, 0, 1, 1], [], []>} : vector<8x128xf32>, vector<128x128xf32>, vector<8x128xf32> -> vector<8x128xf32>
      %586 = arith.truncf %585 : vector<8x128xf32> to vector<8x128xbf16>
      %c0_317 = arith.constant 0 : index
      %c0_318 = arith.constant 0 : index
      %587 = vector.load %arg16[%c0_317, %c0_318] : memref<128x128xbf16, #tpu.memory_space<vmem>>, vector<128x128xbf16>
      %cst_319 = arith.constant dense<0.000000e+00> : vector<8x128xf32>
      %588 = tpu.matmul %586, %587, %cst_319 {dimension_numbers = #tpu.dot_dimension_numbers<[1], [0], [0], [1], [0, 0, 1, 1], [], []>} : vector<8x128xbf16>, vector<128x128xbf16>, vector<8x128xf32> -> vector<8x128xf32>
      %c0_320 = arith.constant 0 : index
      %c0_321 = arith.constant 0 : index
      %589 = vector.load %arg17[%c0_320, %c0_321] : memref<1x128xf32, #tpu.memory_space<vmem>>, vector<1x128xf32>
      %590 = vector.broadcast %589 : vector<1x128xf32> to vector<8x128xf32>
      %591 = arith.addf %588, %590 : vector<8x128xf32>
      %cst_322 = arith.constant 0.000000e+00 : f32
      %592 = vector.broadcast %cst_322 : f32 to vector<8x128xf32>
      %593 = arith.maximumf %591, %592 : vector<8x128xf32>
      %594 = arith.truncf %593 : vector<8x128xf32> to vector<8x128xbf16>
      %c0_323 = arith.constant 0 : index
      %c0_324 = arith.constant 0 : index
      %595 = vector.load %arg18[%c0_323, %c0_324] : memref<128x128xbf16, #tpu.memory_space<vmem>>, vector<128x128xbf16>
      %cst_325 = arith.constant dense<0.000000e+00> : vector<8x128xf32>
      %596 = tpu.matmul %594, %595, %cst_325 {dimension_numbers = #tpu.dot_dimension_numbers<[1], [0], [0], [1], [0, 0, 1, 1], [], []>} : vector<8x128xbf16>, vector<128x128xbf16>, vector<8x128xf32> -> vector<8x128xf32>
      %c0_326 = arith.constant 0 : index
      %c0_327 = arith.constant 0 : index
      %597 = vector.load %arg19[%c0_326, %c0_327] : memref<1x128xf32, #tpu.memory_space<vmem>>, vector<1x128xf32>
      %598 = vector.broadcast %597 : vector<1x128xf32> to vector<8x128xf32>
      %599 = arith.addf %596, %598 : vector<8x128xf32>
      %cst_328 = arith.constant 0.000000e+00 : f32
      %600 = vector.broadcast %cst_328 : f32 to vector<8x128xf32>
      %601 = arith.maximumf %599, %600 : vector<8x128xf32>
      %602 = arith.truncf %601 : vector<8x128xf32> to vector<8x128xbf16>
      %c0_329 = arith.constant 0 : index
      %c0_330 = arith.constant 0 : index
      %603 = vector.load %arg20[%c0_329, %c0_330] : memref<128x128xbf16, #tpu.memory_space<vmem>>, vector<128x128xbf16>
      %cst_331 = arith.constant dense<0.000000e+00> : vector<8x128xf32>
      %604 = tpu.matmul %602, %603, %cst_331 {dimension_numbers = #tpu.dot_dimension_numbers<[1], [0], [0], [1], [0, 0, 1, 1], [], []>} : vector<8x128xbf16>, vector<128x128xbf16>, vector<8x128xf32> -> vector<8x128xf32>
      %c0_332 = arith.constant 0 : index
      %c0_333 = arith.constant 0 : index
      %605 = vector.load %arg21[%c0_332, %c0_333] : memref<1x128xf32, #tpu.memory_space<vmem>>, vector<1x128xf32>
      %606 = vector.broadcast %605 : vector<1x128xf32> to vector<8x128xf32>
      %607 = arith.addf %604, %606 : vector<8x128xf32>
      %c0_334 = arith.constant 0 : index
      %c0_335 = arith.constant 0 : index
      %608 = vector.load %arg22[%c0_334, %c0_335] : memref<8x128xf32, #tpu.memory_space<vmem>>, vector<8x128xf32>
      tpu.vector_store %arg22[%c0_334, %c0_335], %607 {strides = array<i32>} : memref<8x128xf32, #tpu.memory_space<vmem>>, vector<8x128xf32>,
    } else {
    }
    return
  }
  func.func @transform_0(%arg0: i32, %arg1: memref<64xi32, #tpu.memory_space<smem>>) -> (i32, i32) {
    %c0_i32 = arith.constant 0 : i32
    %c0_i32_0 = arith.constant 0 : i32
    %c0_i32_1 = arith.constant 0 : i32
    return %c0_i32, %c0_i32_0 : i32, i32
  }
  func.func @transform_1(%arg0: i32, %arg1: memref<64xi32, #tpu.memory_space<smem>>) -> (i32, i32) {
    %c0_i32 = arith.constant 0 : i32
    %c0_i32_0 = arith.constant 0 : i32
    %c0_i32_1 = arith.constant 0 : i32
    return %c0_i32, %c0_i32_0 : i32, i32
  }
  func.func @transform_2(%arg0: i32, %arg1: memref<64xi32, #tpu.memory_space<smem>>) -> (i32, i32) {
    %c0_i32 = arith.constant 0 : i32
    %c0_i32_0 = arith.constant 0 : i32
    %c0_i32_1 = arith.constant 0 : i32
    return %c0_i32, %c0_i32_0 : i32, i32
  }
  func.func @transform_3(%arg0: i32, %arg1: memref<64xi32, #tpu.memory_space<smem>>) -> (i32, i32) {
    %c0_i32 = arith.constant 0 : i32
    %c0_i32_0 = arith.constant 0 : i32
    %c0_i32_1 = arith.constant 0 : i32
    return %c0_i32, %c0_i32_0 : i32, i32
  }
  func.func @transform_4(%arg0: i32, %arg1: memref<64xi32, #tpu.memory_space<smem>>) -> (i32, i32, i32) {
    %c0_i32 = arith.constant 0 : i32
    %c0_i32_0 = arith.constant 0 : i32
    %c0_i32_1 = arith.constant 0 : i32
    %c0_i32_2 = arith.constant 0 : i32
    return %c0_i32, %c0_i32_0, %c0_i32_1 : i32, i32, i32
  }
  func.func @transform_5(%arg0: i32, %arg1: memref<64xi32, #tpu.memory_space<smem>>) -> (i32, i32) {
    %c0_i32 = arith.constant 0 : i32
    %c0_i32_0 = arith.constant 0 : i32
    %c0_i32_1 = arith.constant 0 : i32
    return %c0_i32, %c0_i32_0 : i32, i32
  }
  func.func @transform_6(%arg0: i32, %arg1: memref<64xi32, #tpu.memory_space<smem>>) -> (i32, i32, i32) {
    %c0_i32 = arith.constant 0 : i32
    %c0_i32_0 = arith.constant 0 : i32
    %c0_i32_1 = arith.constant 0 : i32
    return %arg0, %c0_i32, %c0_i32_0 : i32, i32, i32
  }
  func.func @transform_7(%arg0: i32, %arg1: memref<64xi32, #tpu.memory_space<smem>>) -> (i32, i32, i32) {
    %c0_i32 = arith.constant 0 : i32
    %c0_i32_0 = arith.constant 0 : i32
    %c0_i32_1 = arith.constant 0 : i32
    return %arg0, %c0_i32, %c0_i32_0 : i32, i32, i32
  }
  func.func @transform_8(%arg0: i32, %arg1: memref<64xi32, #tpu.memory_space<smem>>) -> (i32, i32, i32) {
    %c0_i32 = arith.constant 0 : i32
    %c0_i32_0 = arith.constant 0 : i32
    %c0_i32_1 = arith.constant 0 : i32
    return %arg0, %c0_i32, %c0_i32_0 : i32, i32, i32
  }
  func.func @transform_9(%arg0: i32, %arg1: memref<64xi32, #tpu.memory_space<smem>>) -> (i32, i32, i32) {
    %c0_i32 = arith.constant 0 : i32
    %c0_i32_0 = arith.constant 0 : i32
    %c0_i32_1 = arith.constant 0 : i32
    return %arg0, %c0_i32, %c0_i32_0 : i32, i32, i32
  }
  func.func @transform_10(%arg0: i32, %arg1: memref<64xi32, #tpu.memory_space<smem>>) -> (i32, i32, i32) {
    %c0_i32 = arith.constant 0 : i32
    %c0_i32_0 = arith.constant 0 : i32
    %c0_i32_1 = arith.constant 0 : i32
    return %arg0, %c0_i32, %c0_i32_0 : i32, i32, i32
  }
  func.func @transform_11(%arg0: i32, %arg1: memref<64xi32, #tpu.memory_space<smem>>) -> (i32, i32, i32) {
    %c0_i32 = arith.constant 0 : i32
    %c0_i32_0 = arith.constant 0 : i32
    %c0_i32_1 = arith.constant 0 : i32
    return %arg0, %c0_i32, %c0_i32_0 : i32, i32, i32
  }
  func.func @transform_12(%arg0: i32, %arg1: memref<64xi32, #tpu.memory_space<smem>>) -> (i32, i32, i32) {
    %c0_i32 = arith.constant 0 : i32
    %c0_i32_0 = arith.constant 0 : i32
    %c0_i32_1 = arith.constant 0 : i32
    return %arg0, %c0_i32, %c0_i32_0 : i32, i32, i32
  }
  func.func @transform_13(%arg0: i32, %arg1: memref<64xi32, #tpu.memory_space<smem>>) -> (i32, i32, i32) {
    %c0_i32 = arith.constant 0 : i32
    %c0_i32_0 = arith.constant 0 : i32
    %c0_i32_1 = arith.constant 0 : i32
    return %arg0, %c0_i32, %c0_i32_0 : i32, i32, i32
  }
  func.func @transform_14(%arg0: i32, %arg1: memref<64xi32, #tpu.memory_space<smem>>) -> (i32, i32) {
    %c0_i32 = arith.constant 0 : i32
    %c0_i32_0 = arith.constant 0 : i32
    %c0_i32_1 = arith.constant 0 : i32
    return %c0_i32, %c0_i32_0 : i32, i32
  }
  func.func @transform_15(%arg0: i32, %arg1: memref<64xi32, #tpu.memory_space<smem>>) -> (i32, i32) {
    %c0_i32 = arith.constant 0 : i32
    %c0_i32_0 = arith.constant 0 : i32
    %c0_i32_1 = arith.constant 0 : i32
    return %c0_i32, %c0_i32_0 : i32, i32
  }
  func.func @transform_16(%arg0: i32, %arg1: memref<64xi32, #tpu.memory_space<smem>>) -> (i32, i32) {
    %c0_i32 = arith.constant 0 : i32
    %c0_i32_0 = arith.constant 0 : i32
    %c0_i32_1 = arith.constant 0 : i32
    return %c0_i32, %c0_i32_0 : i32, i32
  }
  func.func @transform_17(%arg0: i32, %arg1: memref<64xi32, #tpu.memory_space<smem>>) -> (i32, i32) {
    %c0_i32 = arith.constant 0 : i32
    %c0_i32_0 = arith.constant 0 : i32
    %c0_i32_1 = arith.constant 0 : i32
    return %c0_i32, %c0_i32_0 : i32, i32
  }
  func.func @transform_18(%arg0: i32, %arg1: memref<64xi32, #tpu.memory_space<smem>>) -> (i32, i32) {
    %c0_i32 = arith.constant 0 : i32
    %c0_i32_0 = arith.constant 0 : i32
    %c0_i32_1 = arith.constant 0 : i32
    return %c0_i32, %c0_i32_0 : i32, i32
  }
  func.func @transform_19(%arg0: i32, %arg1: memref<64xi32, #tpu.memory_space<smem>>) -> (i32, i32) {
    %c0_i32 = arith.constant 0 : i32
    %c0_i32_0 = arith.constant 0 : i32
    %c0_i32_1 = arith.constant 0 : i32
    return %c0_i32, %c0_i32_0 : i32, i32
  }
  func.func @transform_20(%arg0: i32, %arg1: memref<64xi32, #tpu.memory_space<smem>>) -> (i32, i32) {
    %c0_i32 = arith.constant 0 : i32
    %c0_i32_0 = arith.constant 0 : i32
    %c0_i32_1 = arith.constant 0 : i32
    return %c0_i32, %c0_i32_0 : i32, i32
  }
}

</mosaic_0001>

<bundles_post_ra>
// kernel: net_forward.1
= control target key start
LH: loop header
LB: loop body
LE: loop exit
PB: predicated region body
PF: predicated region fallthrough
CT: control target
= control target key end

     0   :  { %s9514_s0 = inlined_call_operand.vmem [shape: s32[64], index: 0, kind: input, shape index: {}]   ;;  %s9515_s1 = inlined_call_operand.vmem [shape: f32[128,128], index: 1, kind: input, shape index: {}]   ;;  %s9516_s2 = inlined_call_operand.vmem [shape: bf16[64,128], index: 2, kind: input, shape index: {}]   ;;  %s9517_s3 = inlined_call_operand.vmem [shape: bf16[64,128], index: 3, kind: input, shape index: {}]   ;;  %s9518_s4 = inlined_call_operand.vmem [shape: f32[128,64], index: 4, kind: input, shape index: {}]   ;;  %s9519_s5 = inlined_call_operand.vmem [shape: f32[4,128,1], index: 5, kind: input, shape index: {}]   ;;  %s9520_s6 = inlined_call_operand.vmem [shape: f32[8,128], index: 6, kind: input, shape index: {}]   ;;  %s9521_s7 = inlined_call_operand.hbm [shape: bf16[4,128,128], index: 7, kind: input, shape index: {}]   ;;  %s9522_s8 = inlined_call_operand.hbm [shape: bf16[4,128,128], index: 8, kind: input, shape index: {}]   ;;  %s9523_s9 = inlined_call_operand.hbm [shape: f32[4,1,128], index: 9, kind: input, shape index: {}]   ;;  %s9524_s10 = inlined_call_operand.hbm [shape: bf16[4,128,128], index: 10, kind: input, shape index: {}]   ;;  %s9525_s11 = inlined_call_operand.hbm [shape: bf16[4,512,384], index: 11, kind: input, shape index: {}]   ;;  %s9526_s12 = inlined_call_operand.hbm [shape: f32[4,1,128], index: 12, kind: input, shape index: {}]   ;;  %s9527_s13 = inlined_call_operand.hbm [shape: f32[4,1,128], index: 13, kind: input, shape index: {}]   ;;  %s9528_s14 = inlined_call_operand.hbm [shape: f32[4,1,128], index: 14, kind: input, shape index: {}]   ;;  %s9529_s15 = inlined_call_operand.hbm [shape: bf16[128,128], index: 15, kind: input, shape index: {}]   ;;  %s9530_s16 = inlined_call_operand.hbm [shape: f32[1,128], index: 16, kind: input, shape index: {}]   ;;  %s9531_s17 = inlined_call_operand.hbm [shape: bf16[128,128], index: 17, kind: input, shape index: {}]   ;;  %s9532_s18 = inlined_call_operand.hbm [shape: f32[1,128], index: 18, kind: input, shape index: {}]   ;;  %s9533_s19 = inlined_call_operand.hbm [shape: bf16[128,128], index: 19, kind: input, shape index: {}]   ;;  %s9534_s20 = inlined_call_operand.hbm [shape: f32[1,128], index: 20, kind: input, shape index: {}]   ;;  %s9535_s21 = inlined_call_operand.vmem [shape: f32[8,128], index: 21, kind: output, shape index: {}]  }
   0x1   :  { %9583 = sst [smem:[#allocation65_spill]] %s9514_s0 }
   0x2   :  { %9584 = sst [smem:[#allocation66_spill]] %s9515_s1  ;;  %s9600_s26 = sld [smem:[#allocation65_spill]] }
   0x3   :  { %9585 = sst [smem:[#allocation67_spill]] %s9516_s2 }
   0x4   :  { %9586 = sst [smem:[#allocation68_spill]] %s9517_s3 }
   0x5   :  { %9587 = sst [smem:[#allocation69_spill]] %s9518_s4 }
   0x6   :  { %9588 = sst [smem:[#allocation70_spill]] %s9519_s5 }
   0x7   :  { %9589 = sst [smem:[#allocation71_spill]] %s9520_s6 }
   0x8   :  { %9590 = sst [smem:[#allocation72_spill]] %s9522_s8  ;;  %s26_s6 = sshll.u32 %s9600_s26, 4  ;;  %s27_s6 = int_to_ptr.vmem [resolvable:$true] %s26_s6 }
   0x9   :  { %9591 = sst [smem:[#allocation73_spill]] %s9524_s10  ;;  %s6660_s27 = scalar_lea.vmem %s27_s6, 16 }
   0xa   :  { %9592 = sst [smem:[#allocation74_spill]] %s9525_s11  ;;  %p6661_p0 = scmp.ne.s32.totalorder %s27_s6, %s6660_s27 }
   0xb   :  { %9593 = sst [smem:[#allocation75_spill]] %s9526_s12  ;;  %p6665_p1 = scmp.lt.s32.totalorder %s27_s6, %s27_s6 }
   0xc   :  { %9594 = sst [smem:[#allocation76_spill]] %s9527_s13  ;;  %p6666_p2 = scmp.lt.s32.totalorder %s6660_s27, %s6660_s27 }
   0xd   :  { %9595 = sst [smem:[#allocation77_spill]] %s9528_s14 }
   0xe   :  { %9596 = sst [smem:[#allocation78_spill]] %s9529_s15  ;;  %p6667_p3 = por %p6666_p2, %p6665_p1 }
   0xf   :  { %9597 = sst [smem:[#allocation79_spill]] %s9530_s16 }
  0x10   :  { %9598 = sst [smem:[#allocation80_spill]] %s9532_s18  ;;  %p6668_p4 = pnand %p6667_p3, %p6661_p0 }
  0x11   :  { %9599 = sst [smem:[#allocation81_spill]] %s9535_s21 }
  0x12   :  { %6671 = shalt.err (!%p6668_p4)  }
  0x13   :  { %s7150_s3 = smov [#allocation7]  }
  0x14   :  { %29 = dma.vmem_to_smem %s27_s6, 16, %s7150_s3, [#allocation6] }
  0x15   :  { %7096 = dma.done.wait [#allocation6], 16 }
  0x16   :  { %7097 = vsyncadd [#allocation6], 4294967280 }
  0x17   :  { %31 = sfence }
  0x18   :  { %32 = vsyncpa [#allocation9], 0 }
  0x19   :  { %34 = vsyncpa [#allocation9 + $0x1], 0 }
  0x1a   :  { %35 = vsyncpa [#allocation11], 0 }
  0x1b   :  { %37 = vsyncpa [#allocation11 + $0x1], 0 }
  0x1c   :  { %38 = vsyncpa [#allocation14], 0 }
  0x1d   :  { %40 = vsyncpa [#allocation14 + $0x1], 0 }
  0x1e   :  { %41 = vsyncpa [#allocation17], 0 }
  0x1f   :  { %43 = vsyncpa [#allocation17 + $0x1], 0 }
  0x20   :  { %44 = vsyncpa [#allocation20], 0 }
  0x21   :  { %46 = vsyncpa [#allocation20 + $0x1], 0 }
  0x22   :  { %47 = vsyncpa [#allocation23], 0 }
  0x23   :  { %48 = vsyncpa [#allocation26], 0 }
  0x24   :  { %49 = vsyncpa [#allocation29], 0  ;;  %s7288_s28 = smov 0   ;;  %s7290_s29 = smov 0  }
  0x25   :  { %s7292_s6 = smov 0   ;;  %s7294_s0 = smov 0  }
  0x26 LB: > { %9601 = sst [smem:[#allocation40_spill]] %s7140_s29  ;;  %s7307_s4 = sadd.s32 4294967295, %s7148_s0   ;;  %s7148_s0 = sphi %s7294_s0, %s9744_s0   ;;  %s7144_s6 = sphi %s7292_s6, %s9747_s6   ;;  %s7140_s29 = sphi %s7290_s29, %s9746_s29   ;;  %s7136_s28 = sphi %s7288_s28, %s9745_s28  }
  0x27   : > { %9602 = sst [smem:[#allocation41_spill]] %s7144_s6  ;;  %p201_p5 = scmp.ne.s32.totalorder %s7140_s29, %s7136_s28 }
  0x28   : > { %9603 = sst [smem:[#allocation42_spill]] %s7307_s4  ;;  %p9543_p6 = scmp.eq.s32.totalorder %s7307_s4, 0 }
  0x29   : > { %p5149_p7 = scmp.ge.s32.totalorder %s7148_s0, 1  ;;  %p541_p8 = scmp.lt.s32.totalorder %s7148_s0, 5 }
  0x2a   : > { %p7316_p10 = por %p9543_p6, %p201_p5  ;;  %s7151_s22 = smov [#allocation21]  }
  0x2b   : > { %p7320_p11 = pnand %p5149_p7, %p541_p8  ;;  %s571_s23 = sshll.u32 %s7151_s22, 4  ;;  %s7324_s23 = int_to_ptr.vmem [resolvable:$true] %s571_s23 }
  0x2c   : > { %s9604_s30 = scalar_select %p7316_p10, 1, 0 }
  0x2d   : > { %s9606_s5 = scalar_select %p7320_p11, 1, 0 }
  0x2e   : > { %9605 = sst [smem:[#allocation43_spill]] %s9604_s30  ;;  %p6304_p12 = pneg %p7320_p11 }
  0x2f   : > { %9607 = sst [smem:[#allocation44_spill]] %s9606_s5  ;;  %s7152_s24 = smov [#allocation22]  }
  0x30   : > { %p7330_p13 = pnand %p6304_p12, %p9543_p6  ;;  %s585_s2 = sshll.u32 %s7152_s24, 4  ;;  %s7334_s2 = int_to_ptr.vmem [resolvable:$true] %s585_s2 }
  0x31   : > { %s7153_s25 = smov [#allocation25]   ;;  %s9609_s15 = sld [smem:[#allocation78_spill]] }
  0x32   : > { %s9608_s1 = scalar_select %p7330_p13, 1, 0 }
  0x33   : > { %s7336_s26 = sshll.u32 %s7153_s25, 4  ;;  %p7346_p1 = pneg %p7330_p13  ;;  %s610_s26 = int_to_ptr.vmem [resolvable:$true] %s7336_s26 }
  0x35   : > { %s9610_s4 = scalar_select %p7346_p1, 1, 0 }
  0x37   : > { %s6672_s28 = scalar_lea.hbm %s9609_s15, 1024 }
  0x38   : > { %p6673_p0 = scmp.ne.s32.totalorder %s9609_s15, %s6672_s28  ;;  %p6679_p4 = scmp.lt.u32.totalorder %s6672_s28, %s9609_s15 }
  0x3a   : > { %p6675_p2 = pnand %p7346_p1, %p6673_p0 }
  0x3c   : > { %p6676_p3 = pneg %p6675_p2 }
  0x3e   : > { %p6681_p5 = pnand %p6679_p4, %p6676_p3 }
  0x40   : > { %6684 = shalt.err (!%p6681_p5)
}
  0x41   : > { %s6685_s21 = scalar_lea.vmem %s7324_s23, 1024  ;;  %p6693_p9 = scmp.lt.s32.totalorder %s7324_s23, %s7324_s23 }
  0x42   : > { %p6686_p7 = scmp.ne.s32.totalorder %s7324_s23, %s6685_s21  ;;  %p6694_p6 = scmp.lt.s32.totalorder %s6685_s21, %s6685_s21 }
  0x44   : > { %p6688_p8 = pnand %p6686_p7, %p7346_p1  ;;  %p6695_p0 = por %p6694_p6, %p6693_p9 }
  0x46   : > { %p6689_p12 = pneg %p6688_p8 }
  0x48   : > { %p6696_p2 = pnand %p6695_p0, %p6689_p12 }
  0x4a   : > { %6699 = shalt.err (!%p6696_p2)
}
  0x4b   : > { %s9551_s27 = smov 64   ;;  %s9553_s3 = smov 4  }
  0x4c   : > { %6307 = dma.hbm_to_vmem [thread:$0]  (!%p7330_p13), %s9609_s15, 1024, %s7324_s23, [#allocation20], %s9551_s27, %s9551_s27, %s9553_s3  }
  0x4d   : > { %s9611_s16 = sld [smem:[#allocation79_spill]] }
  0x53   : > { %s6700_s21 = scalar_lea.hbm %s9611_s16, 16 }
  0x54   : > { %p6701_p6 = scmp.ne.s32.totalorder %s9611_s16, %s6700_s21  ;;  %p6707_p4 = scmp.lt.u32.totalorder %s6700_s21, %s9611_s16 }
  0x56   : > { %p6703_p9 = pnand %p6701_p6, %p7346_p1 }
  0x58   : > { %p6704_p3 = pneg %p6703_p9 }
  0x5a   : > { %p6709_p5 = pnand %p6707_p4, %p6704_p3 }
  0x5c   : > { %6712 = shalt.err (!%p6709_p5)
}
  0x5d   : > { %s6713_s23 = scalar_lea.vmem %s7334_s2, 16  ;;  %s6720_s30 = scalar_lea.vmem %s7334_s2, 32 }
  0x5e   : > { %p6714_p7 = scmp.ne.s32.totalorder %s7334_s2, %s6713_s23  ;;  %p6721_p0 = scmp.lt.s32.totalorder %s7334_s2, %s7334_s2 }
  0x5f   : > { %p6722_p2 = scmp.lt.s32.totalorder %s6720_s30, %s6713_s23 }
  0x60   : > { %p6716_p8 = pnand %p6714_p7, %p7346_p1 }
  0x61   : > { %p6723_p6 = por %p6722_p2, %p6721_p0 }
  0x62   : > { %p6717_p12 = pneg %p6716_p8 }
  0x64   : > { %p6724_p9 = pnand %p6723_p6, %p6717_p12 }
  0x66   : > { %6727 = shalt.err (!%p6724_p9)
}
  0x67   : > { %6310 = dma.hbm_to_vmem [thread:$0]  (!%p7330_p13), %s9611_s16, 16, %s7334_s2, [#allocation23]  }
  0x68   : > { %s9612_s18 = sld [smem:[#allocation80_spill]] }
  0x6e   : > { %s6728_s22 = scalar_lea.hbm %s9612_s18, 16 }
  0x6f   : > { %p6729_p3 = scmp.ne.s32.totalorder %s9612_s18, %s6728_s22  ;;  %p6735_p7 = scmp.lt.u32.totalorder %s6728_s22, %s9612_s18 }
  0x71   : > { %p6731_p4 = pnand %p6729_p3, %p7346_p1 }
  0x73   : > { %p6732_p5 = pneg %p6731_p4 }
  0x75   : > { %p6737_p8 = pnand %p6735_p7, %p6732_p5 }
  0x77   : > { %6740 = shalt.err (!%p6737_p8)
}
  0x78   : > { %s6741_s30 = scalar_lea.vmem %s610_s26, 16  ;;  %s6748_s2 = scalar_lea.vmem %s610_s26, 32 }
  0x79   : > { %p6742_p12 = scmp.ne.s32.totalorder %s610_s26, %s6741_s30  ;;  %p6749_p6 = scmp.lt.s32.totalorder %s610_s26, %s610_s26 }
  0x7a   : > { %p6750_p9 = scmp.lt.s32.totalorder %s6748_s2, %s6741_s30 }
  0x7b   : > { %p6744_p0 = pnand %p6742_p12, %p7346_p1 }
  0x7c   : > { %p6751_p10 = por %p6750_p9, %p6749_p6 }
  0x7d   : > { %p6745_p2 = pneg %p6744_p0 }
  0x7f   : > { %p6752_p11 = pnand %p6751_p10, %p6745_p2 }
  0x81   : > { %6755 = shalt.err (!%p6752_p11)
}
  0x82   : > { %6316 = dma.hbm_to_vmem [thread:$0]  (!%p7330_p13), %s9612_s18, 16, %s610_s26, [#allocation26]  }
  0x83   : > { %s7414_s5 = sadd.s32 1, %s7148_s0   ;;  %s188_s22 = sadd.s32 1, %s7144_s6 }
  0x84   : > { %9613 = sst [smem:[#allocation45_spill]] %s7414_s5  ;;  %s185_s28 = ssub.s32 %s7148_s0, %s7414_s5 }
  0x85   : > { %p186_p10 = scmp.eq.s32.totalorder %s185_s28, 0  ;;  %p195_p11 = scmp.ne.s32.totalorder %s7144_s6, %s7140_s29 }
  0x86   : > { %p196_p3 = scmp.eq.s32.totalorder %s7148_s0, 0  ;;  %p6354_p4 = scmp.lt.s32.totalorder %s7148_s0, 4 }
  0x87   : > { %s7424_s24 = scalar_select %p186_p10, %s7144_s6, %s188_s22  }
  0x88   : > { %p197_p5 = por %p196_p3, %p195_p11  ;;  %s7427_s25 = sand.u32 1, %s7144_s6  }
  0x89   : > { %9614 = sst [smem:[#allocation46_spill]] %s7424_s24  ;;  %s7430_s21 = sshll.u32 %s7427_s25, 6 }
  0x8a   : > { %s7433_s23 = sshll.u32 %s7148_s0, 10  ;;  %p7435_p7 = pnand %p6354_p4, %p197_p5 }
  0x8b   : > { %s7440_s30 = sand.u32 1, %s7148_s0   ;;  %s9616_s8 = sld [smem:[#allocation72_spill]] }
  0x8c   : > { %s9615_s26 = scalar_select %p7435_p7, 1, 0 }
  0x8d   : > { %s669_s28 = scalar_lea.vmem [#allocation10], %s7430_s21  ;;  %p7456_p12 = pneg %p7435_p7 }
  0x8e   : > { %s676_s22 = sshll.u32 %s669_s28, 4  ;;  %s7449_s22 = int_to_ptr.vmem [resolvable:$true] %s676_s22 }
  0x8f   : > { %s9617_s15 = scalar_select %p7456_p12, 1, 0 }
  0x91   : > { %s7446_s14 = scalar_lea.hbm %s9616_s8, %s7433_s23  ;;  %s6761_s16 = scalar_lea.hbm %s9616_s8, 4096 }
  0x92   : > { %s6756_s3 = scalar_lea.hbm %s7446_s14, 1024  ;;  %p6762_p6 = scmp.lt.u32.totalorder %s7446_s14, %s9616_s8 }
  0x93   : > { %p6757_p8 = scmp.ne.s32.totalorder %s7446_s14, %s6756_s3  ;;  %p6763_p9 = scmp.lt.u32.totalorder %s6761_s16, %s6756_s3 }
  0x94   : > { %p6765_p11 = scmp.lt.u32.totalorder %s6756_s3, %s7446_s14 }
  0x95   : > { %p6759_p0 = pnand %p7456_p12, %p6757_p8  ;;  %p6764_p10 = por %p6763_p9, %p6762_p6 }
  0x97   : > { %p6760_p2 = pneg %p6759_p0  ;;  %p6766_p3 = por %p6765_p11, %p6764_p10 }
  0x99   : > { %p6767_p4 = pnand %p6766_p3, %p6760_p2 }
  0x9b   : > { %6770 = shalt.err (!%p6767_p4)
}
  0x9c   : > { %s6771_s27 = scalar_lea.vmem %s7449_s22, 1024  ;;  %s7156_s2 = smov [#allocation10]  }
  0x9d   : > { %p6772_p5 = scmp.ne.s32.totalorder %s7449_s22, %s6771_s27  ;;  %s6776_s13 = sshll.u32 %s7156_s2, 4  ;;  %s6777_s13 = int_to_ptr.vmem [resolvable:$false] %s6776_s13 }
  0x9e   : > { %s6778_s18 = scalar_lea.vmem %s6777_s13, 2048  ;;  %p6779_p13 = scmp.lt.s32.totalorder %s7449_s22, %s6777_s13 }
  0x9f   : > { %p6774_p8 = pnand %p6772_p5, %p7456_p12  ;;  %p6780_p1 = scmp.lt.s32.totalorder %s6778_s18, %s6771_s27 }
  0xa1   : > { %p6775_p0 = pneg %p6774_p8  ;;  %p6781_p6 = por %p6780_p1, %p6779_p13 }
  0xa3   : > { %p6782_p9 = pnand %p6781_p6, %p6775_p0 }
  0xa5   : > { %6785 = shalt.err (!%p6782_p9)
}
  0xa6   : > { %s9618_s16 = smov 4   ;;  %s9619_s3 = smov 64  }
  0xa7   : > { %s9620_s28 = scalar_lea.sflag [#allocation11], %s7440_s30  ;;  %s9621_s10 = sld [smem:[#allocation73_spill]] }
  0xa8   : > { %6329 = dma.hbm_to_vmem [thread:$0]  (!%p7435_p7), %s7446_s14, 1024, %s7449_s22, %s9620_s28, %s9619_s3, %s9619_s3, %s9618_s16  }
  0xa9   : > { %s707_s18 = scalar_lea.vmem [#allocation13], %s7430_s21  ;;  %s7494_s24 = sshll.u32 %s7148_s0, 4 }
  0xaa   : > { %s714_s8 = sshll.u32 %s707_s18, 4  ;;  %s9562_s6 = scalar_lea.sflag [#allocation14], %s7440_s30  ;;  %s7491_s8 = int_to_ptr.vmem [resolvable:$true] %s714_s8 }
  0xad   : > { %s7488_s13 = scalar_lea.hbm %s9621_s10, %s7433_s23  ;;  %s6791_s28 = scalar_lea.hbm %s9621_s10, 4096 }
  0xae   : > { %s6786_s5 = scalar_lea.hbm %s7488_s13, 1024  ;;  %p6792_p10 = scmp.lt.u32.totalorder %s7488_s13, %s9621_s10 }
  0xaf   : > { %p6787_p13 = scmp.ne.s32.totalorder %s7488_s13, %s6786_s5  ;;  %p6793_p11 = scmp.lt.u32.totalorder %s6791_s28, %s6786_s5 }
  0xb0   : > { %p6795_p4 = scmp.lt.u32.totalorder %s6786_s5, %s7488_s13 }
  0xb1   : > { %p6789_p1 = pnand %p6787_p13, %p7456_p12  ;;  %p6794_p3 = por %p6793_p11, %p6792_p10 }
  0xb3   : > { %p6790_p2 = pneg %p6789_p1  ;;  %p6796_p5 = por %p6795_p4, %p6794_p3 }
  0xb5   : > { %p6797_p8 = pnand %p6796_p5, %p6790_p2 }
  0xb7   : > { %6800 = shalt.err (!%p6797_p8)
}
  0xb8   : > { %s6801_s18 = scalar_lea.vmem %s7491_s8, 1024  ;;  %s7157_s14 = smov [#allocation13]  }
  0xb9   : > { %p6802_p0 = scmp.ne.s32.totalorder %s7491_s8, %s6801_s18  ;;  %s6806_s22 = sshll.u32 %s7157_s14, 4  ;;  %s6807_s22 = int_to_ptr.vmem [resolvable:$false] %s6806_s22 }
  0xba   : > { %s6808_s2 = scalar_lea.vmem %s6807_s22, 2048  ;;  %p6809_p13 = scmp.lt.s32.totalorder %s7491_s8, %s6807_s22 }
  0xbb   : > { %p6804_p6 = pnand %p6802_p0, %p7456_p12  ;;  %p6810_p1 = scmp.lt.s32.totalorder %s6808_s2, %s6801_s18 }
  0xbd   : > { %p6805_p9 = pneg %p6804_p6  ;;  %p6811_p10 = por %p6810_p1, %p6809_p13 }
  0xbf   : > { %p6812_p11 = pnand %p6811_p10, %p6805_p9 }
  0xc1   : > { %6815 = shalt.err (!%p6812_p11)
}
  0xc2   : > { %6335 = dma.hbm_to_vmem [thread:$0]  (!%p7435_p7), %s7488_s13, 1024, %s7491_s8, %s9562_s6, %s9619_s3, %s9619_s3, %s9618_s16  }
  0xc3   : > { %s9622_s12 = sld [smem:[#allocation75_spill]]  ;;  %s748_s18 = scalar_lea.vmem [#allocation16], %s7427_s25 }
  0xc4   : > { %s755_s14 = sshll.u32 %s748_s18, 4  ;;  %s756_s14 = int_to_ptr.vmem [resolvable:$true] %s755_s14 }
  0xc9   : > { %s7527_s27 = scalar_lea.hbm %s9622_s12, %s7494_s24  ;;  %s6821_s13 = scalar_lea.hbm %s9622_s12, 64 }
  0xca   : > { %s6816_s2 = scalar_lea.hbm %s7527_s27, 16  ;;  %p6822_p5 = scmp.lt.u32.totalorder %s7527_s27, %s9622_s12 }
  0xcb   : > { %p6817_p2 = scmp.ne.s32.totalorder %s7527_s27, %s6816_s2  ;;  %p6823_p8 = scmp.lt.u32.totalorder %s6821_s13, %s6816_s2 }
  0xcc   : > { %p6825_p6 = scmp.lt.u32.totalorder %s6816_s2, %s7527_s27 }
  0xcd   : > { %p6819_p3 = pnand %p6817_p2, %p7456_p12  ;;  %p6824_p0 = por %p6823_p8, %p6822_p5 }
  0xcf   : > { %p6820_p4 = pneg %p6819_p3  ;;  %p6826_p9 = por %p6825_p6, %p6824_p0 }
  0xd1   : > { %p6827_p13 = pnand %p6826_p9, %p6820_p4 }
  0xd3   : > { %6830 = shalt.err (!%p6827_p13)
}
  0xd4   : > { %s6831_s18 = scalar_lea.vmem %s756_s14, 16  ;;  %s7158_s6 = smov [#allocation16]  }
  0xd5   : > { %p6832_p1 = scmp.ne.s32.totalorder %s756_s14, %s6831_s18  ;;  %s6836_s22 = sshll.u32 %s7158_s6, 4  ;;  %s6837_s22 = int_to_ptr.vmem [resolvable:$false] %s6836_s22 }
  0xd6   : > { %s6838_s10 = scalar_lea.vmem %s6837_s22, 32  ;;  %p6839_p2 = scmp.lt.s32.totalorder %s756_s14, %s6837_s22 }
  0xd7   : > { %p6834_p10 = pnand %p6832_p1, %p7456_p12  ;;  %p6840_p3 = scmp.lt.s32.totalorder %s6838_s10, %s6831_s18 }
  0xd9   : > { %p6835_p11 = pneg %p6834_p10  ;;  %p6841_p7 = por %p6840_p3, %p6839_p2 }
  0xdb   : > { %p6842_p5 = pnand %p6841_p7, %p6835_p11 }
  0xdd   : > { %6845 = shalt.err (!%p6842_p5)
}
  0xde   : > { %p9623_p8 = scmp.ne.s32.totalorder %s9615_s26, 0  ;;  %s9624_s2 = scalar_lea.sflag [#allocation17], %s7440_s30 }
  0xdf   : > { %s7159_s8 = smov [#allocation24]   ;;  %s7160_s5 = smov [#allocation27]  }
  0xe0   : > { %6341 = dma.hbm_to_vmem [thread:$0]  (!%p9623_p8), %s7527_s27, 16, %s756_s14, %s9624_s2  }
  0xe1   : > { %s595_s13 = sshll.u32 %s7159_s8, 4  ;;  %s619_s28 = sshll.u32 %s7160_s5, 4  ;;  %s596_s13 = int_to_ptr.vmem [resolvable:$true] %s595_s13  ;;  %s620_s28 = int_to_ptr.vmem [resolvable:$true] %s619_s28 }
  0xe2   : > { %s6846_s22 = scalar_lea.hbm %s9531_s17, 1024  ;;  %p9625_p4 = scmp.ne.s32.totalorder %s9610_s4, 0 }
  0xe3   : > { %p6847_p7 = scmp.ne.s32.totalorder %s9531_s17, %s6846_s22  ;;  %p6853_p9 = scmp.lt.u32.totalorder %s6846_s22, %s9531_s17 }
  0xe5   : > { %p6849_p0 = pnand %p6847_p7, %p9625_p4 }
  0xe7   : > { %p6850_p6 = pneg %p6849_p0 }
  0xe9   : > { %p6855_p13 = pnand %p6853_p9, %p6850_p6 }
  0xeb   : > { %6858 = shalt.err (!%p6855_p13)
}
  0xec   : > { %s6859_s27 = scalar_lea.vmem %s596_s13, 1024  ;;  %p6867_p2 = scmp.lt.s32.totalorder %s596_s13, %s596_s13 }
  0xed   : > { %p6860_p1 = scmp.ne.s32.totalorder %s596_s13, %s6859_s27  ;;  %p6868_p3 = scmp.lt.s32.totalorder %s6859_s27, %s6859_s27 }
  0xef   : > { %p6862_p10 = pnand %p6860_p1, %p9625_p4  ;;  %p6869_p5 = por %p6868_p3, %p6867_p2 }
  0xf1   : > { %p6863_p11 = pneg %p6862_p10 }
  0xf3   : > { %p6870_p8 = pnand %p6869_p5, %p6863_p11 }
  0xf5   : > { %6873 = shalt.err (!%p6870_p8)
}
  0xf6   : > { %p9626_p7 = scmp.ne.s32.totalorder %s9608_s1, 0  ;;  %s6874_s2 = scalar_lea.hbm %s9533_s19, 1024 }
  0xf7   : > { %p6875_p0 = scmp.ne.s32.totalorder %s9533_s19, %s6874_s2  ;;  %p6881_p9 = scmp.lt.u32.totalorder %s6874_s2, %s9533_s19 }
  0xf8   : > { %6313 = dma.hbm_to_vmem [thread:$0]  (!%p9626_p7), %s9531_s17, 1024, %s596_s13, [#allocation23], %s9619_s3, %s9619_s3, %s9618_s16  }
  0xf9   : > { %p6877_p8 = pnand %p6875_p0, %p9625_p4 }
  0xfb   : > { %p6878_p6 = pneg %p6877_p8 }
  0xfd   : > { %p6883_p13 = pnand %p6881_p9, %p6878_p6 }
  0xff   : > { %6886 = shalt.err (!%p6883_p13)
}
 0x100   : > { %s6887_s18 = scalar_lea.vmem %s620_s28, 1024  ;;  %p6895_p2 = scmp.lt.s32.totalorder %s620_s28, %s620_s28 }
 0x101   : > { %p6888_p1 = scmp.ne.s32.totalorder %s620_s28, %s6887_s18  ;;  %p6896_p3 = scmp.lt.s32.totalorder %s6887_s18, %s6887_s18 }
 0x103   : > { %p6890_p10 = pnand %p6888_p1, %p9625_p4  ;;  %p6897_p5 = por %p6896_p3, %p6895_p2 }
 0x105   : > { %p6891_p11 = pneg %p6890_p10 }
 0x107   : > { %p6898_p12 = pnand %p6897_p5, %p6891_p11 }
 0x109   : > { %6901 = shalt.err (!%p6898_p12)
}
 0x10a   : > { %6319 = dma.hbm_to_vmem [thread:$0]  (!%p9626_p7), %s9533_s19, 1024, %s620_s28, [#allocation26], %s9619_s3, %s9619_s3, %s9618_s16  }
 0x10b   : > { %s7161_s27 = smov [#allocation28]   ;;  %s6902_s14 = scalar_lea.hbm %s9534_s20, 16 }
 0x10c   : > { %s633_s11 = sshll.u32 %s7161_s27, 4  ;;  %p6903_p12 = scmp.ne.s32.totalorder %s9534_s20, %s6902_s14  ;;  %s634_s11 = int_to_ptr.vmem [resolvable:$true] %s633_s11 }
 0x10d   : > { %p6909_p6 = scmp.lt.u32.totalorder %s6902_s14, %s9534_s20 }
 0x10e   : > { %p6905_p0 = pnand %p6903_p12, %p9625_p4 }
 0x110   : > { %p6906_p8 = pneg %p6905_p0 }
 0x112   : > { %p6911_p9 = pnand %p6909_p6, %p6906_p8 }
 0x114   : > { %6914 = shalt.err (!%p6911_p9)
}
 0x115   : > { %s6915_s28 = scalar_lea.vmem %s634_s11, 16  ;;  %s6922_s22 = scalar_lea.vmem %s634_s11, 32 }
 0x116   : > { %p6916_p13 = scmp.ne.s32.totalorder %s634_s11, %s6915_s28  ;;  %p6923_p11 = scmp.lt.s32.totalorder %s634_s11, %s634_s11 }
 0x117   : > { %p6924_p2 = scmp.lt.s32.totalorder %s6922_s22, %s6915_s28 }
 0x118   : > { %p6918_p1 = pnand %p6916_p13, %p9625_p4 }
 0x119   : > { %p6925_p3 = por %p6924_p2, %p6923_p11 }
 0x11a   : > { %p6919_p10 = pneg %p6918_p1 }
 0x11c   : > { %p6926_p5 = pnand %p6925_p3, %p6919_p10 }
 0x11e   : > { %6929 = shalt.err (!%p6926_p5)
}
 0x11f   : > { %6322 = dma.hbm_to_vmem [thread:$0]  (!%p9626_p7), %s9534_s20, 16, %s634_s11, [#allocation29]  }
 0x120   : > { %s7614_s27 = scalar_lea.hbm %s9521_s7, %s7433_s23  ;;  %s648_s12 = scalar_lea.vmem [#allocation8], %s7430_s21 }
 0x121   : > { %s655_s29 = sshll.u32 %s648_s12, 4  ;;  %s645_s1 = scalar_lea.sflag [#allocation9], %s7427_s25  ;;  %s7617_s29 = int_to_ptr.vmem [resolvable:$true] %s655_s29 }
 0x122   : > { %s6930_s14 = scalar_lea.hbm %s7614_s27, 1024  ;;  %p9627_p12 = scmp.ne.s32.totalorder %s9617_s15, 0 }
 0x123   : > { %p6931_p4 = scmp.ne.s32.totalorder %s7614_s27, %s6930_s14  ;;  %s6935_s8 = scalar_lea.hbm %s9521_s7, 4096 }
 0x124   : > { %p6936_p7 = scmp.lt.u32.totalorder %s7614_s27, %s9521_s7  ;;  %p6937_p6 = scmp.lt.u32.totalorder %s6935_s8, %s6930_s14 }
 0x125   : > { %p6933_p0 = pnand %p6931_p4, %p9627_p12  ;;  %p6939_p13 = scmp.lt.u32.totalorder %s6930_s14, %s7614_s27 }
 0x126   : > { %p6938_p9 = por %p6937_p6, %p6936_p7 }
 0x127   : > { %p6934_p8 = pneg %p6933_p0 }
 0x128   : > { %p6940_p1 = por %p6939_p13, %p6938_p9 }
 0x12a   : > { %p6941_p10 = pnand %p6940_p1, %p6934_p8 }
 0x12c   : > { %6944 = shalt.err (!%p6941_p10)
}
 0x12d   : > { %s6945_s21 = scalar_lea.vmem %s7617_s29, 1024  ;;  %s7162_s6 = smov [#allocation8]  }
 0x12e   : > { %p6946_p11 = scmp.ne.s32.totalorder %s7617_s29, %s6945_s21  ;;  %s6950_s28 = sshll.u32 %s7162_s6, 4  ;;  %s6951_s28 = int_to_ptr.vmem [resolvable:$false] %s6950_s28 }
 0x12f   : > { %s6952_s22 = scalar_lea.vmem %s6951_s28, 2048  ;;  %p6953_p5 = scmp.lt.s32.totalorder %s7617_s29, %s6951_s28 }
 0x130   : > { %p6948_p2 = pnand %p6946_p11, %p9627_p12  ;;  %p6954_p4 = scmp.lt.s32.totalorder %s6952_s22, %s6945_s21 }
 0x132   : > { %p6949_p3 = pneg %p6948_p2  ;;  %p6955_p0 = por %p6954_p4, %p6953_p5 }
 0x134   : > { %p6956_p7 = pnand %p6955_p0, %p6949_p3 }
 0x136   : > { %6959 = shalt.err (!%p6956_p7)
}
 0x137   : > { %p9628_p8 = scmp.ne.s32.totalorder %s9615_s26, 0  ;;  %s7650_s10 = scalar_lea.hbm %s9523_s9, %s7494_s24 }
 0x138   : > { %s689_s4 = scalar_lea.vmem [#allocation12], %s7427_s25  ;;  %s6261_s14 = smul.u32 768, %s7427_s25 }
 0x139   : > { %6326 = dma.hbm_to_vmem [thread:$0]  (!%p9628_p8), %s7614_s27, 1024, %s7617_s29, %s645_s1, %s9619_s3, %s9619_s3, %s9618_s16  }
 0x13a   : > { %s696_s12 = sshll.u32 %s689_s4, 4  ;;  %s6960_s11 = scalar_lea.hbm %s7650_s10, 16  ;;  %s697_s12 = int_to_ptr.vmem [resolvable:$true] %s696_s12 }
 0x13b   : > { %p6961_p6 = scmp.ne.s32.totalorder %s7650_s10, %s6960_s11  ;;  %s6965_s3 = scalar_lea.hbm %s9523_s9, 64 }
 0x13c   : > { %p6966_p1 = scmp.lt.u32.totalorder %s7650_s10, %s9523_s9  ;;  %p6967_p10 = scmp.lt.u32.totalorder %s6965_s3, %s6960_s11 }
 0x13d   : > { %p6963_p9 = pnand %p6961_p6, %p9627_p12  ;;  %p6969_p2 = scmp.lt.u32.totalorder %s6960_s11, %s7650_s10 }
 0x13e   : > { %p6968_p11 = por %p6967_p10, %p6966_p1 }
 0x13f   : > { %p6964_p13 = pneg %p6963_p9 }
 0x140   : > { %p6970_p3 = por %p6969_p2, %p6968_p11 }
 0x142   : > { %p6971_p5 = pnand %p6970_p3, %p6964_p13 }
 0x144   : > { %6974 = shalt.err (!%p6971_p5)
}
 0x145   : > { %s6975_s1 = scalar_lea.vmem %s697_s12, 16  ;;  %s7163_s8 = smov [#allocation12]  }
 0x146   : > { %p6976_p4 = scmp.ne.s32.totalorder %s697_s12, %s6975_s1  ;;  %s6980_s23 = sshll.u32 %s7163_s8, 4  ;;  %s6981_s23 = int_to_ptr.vmem [resolvable:$false] %s6980_s23 }
 0x147   : > { %s6982_s5 = scalar_lea.vmem %s6981_s23, 32  ;;  %p6983_p6 = scmp.lt.s32.totalorder %s697_s12, %s6981_s23 }
 0x148   : > { %p6978_p0 = pnand %p6976_p4, %p9627_p12  ;;  %p6984_p9 = scmp.lt.s32.totalorder %s6982_s5, %s6975_s1 }
 0x14a   : > { %p6979_p7 = pneg %p6978_p0  ;;  %p6985_p8 = por %p6984_p9, %p6983_p6 }
 0x14c   : > { %p6986_p1 = pnand %p6985_p8, %p6979_p7 }
 0x14e   : > { %6989 = shalt.err (!%p6986_p1)
}
 0x14f   : > { %p9629_p10 = scmp.ne.s32.totalorder %s9615_s26, 0  ;;  %s9630_s21 = scalar_lea.sflag [#allocation11], %s7440_s30 }
 0x150   : > { %s6262_s6 = smul.u32 12288, %s7148_s0  ;;  %s728_s28 = scalar_lea.vmem [#allocation15], %s6261_s14 }
 0x151   : > { %6332 = dma.hbm_to_vmem [thread:$0]  (!%p9629_p10), %s7650_s10, 16, %s697_s12, %s9630_s21  }
 0x152   : > { %s735_s22 = sshll.u32 %s728_s28, 4  ;;  %s9631_s4 = sld [smem:[#allocation74_spill]]  ;;  %s7679_s22 = int_to_ptr.vmem [resolvable:$true] %s735_s22 }
 0x158   : > { %s7677_s11 = scalar_lea.hbm %s9631_s4, %s6262_s6  ;;  %s6995_s12 = scalar_lea.hbm %s9631_s4, 49152 }
 0x159   : > { %s6990_s2 = scalar_lea.hbm %s7677_s11, 12288  ;;  %p6996_p2 = scmp.lt.u32.totalorder %s7677_s11, %s9631_s4 }
 0x15a   : > { %p6991_p8 = scmp.ne.s32.totalorder %s7677_s11, %s6990_s2  ;;  %p6997_p3 = scmp.lt.u32.totalorder %s6995_s12, %s6990_s2 }
 0x15b   : > { %p6999_p4 = scmp.lt.u32.totalorder %s6990_s2, %s7677_s11 }
 0x15c   : > { %p6993_p13 = pnand %p6991_p8, %p9627_p12  ;;  %p6998_p5 = por %p6997_p3, %p6996_p2 }
 0x15e   : > { %p6994_p11 = pneg %p6993_p13  ;;  %p7000_p0 = por %p6999_p4, %p6998_p5 }
 0x160   : > { %p7001_p7 = pnand %p7000_p0, %p6994_p11 }
 0x162   : > { %7004 = shalt.err (!%p7001_p7)
}
 0x163   : > { %s7005_s3 = scalar_lea.vmem %s7679_s22, 12288  ;;  %s7164_s27 = smov [#allocation15]  }
 0x164   : > { %p7006_p6 = scmp.ne.s32.totalorder %s7679_s22, %s7005_s3  ;;  %s7010_s29 = sshll.u32 %s7164_s27, 4  ;;  %s7011_s29 = int_to_ptr.vmem [resolvable:$false] %s7010_s29 }
 0x165   : > { %s7012_s1 = scalar_lea.vmem %s7011_s29, 24576  ;;  %p7013_p8 = scmp.lt.s32.totalorder %s7679_s22, %s7011_s29 }
 0x166   : > { %p7008_p9 = pnand %p7006_p6, %p9627_p12  ;;  %p7014_p13 = scmp.lt.s32.totalorder %s7012_s1, %s7005_s3 }
 0x168   : > { %p7009_p1 = pneg %p7008_p9  ;;  %p7015_p2 = por %p7014_p13, %p7013_p8 }
 0x16a   : > { %p7016_p3 = pnand %p7015_p2, %p7009_p1 }
 0x16c   : > { %7019 = shalt.err (!%p7016_p3)
}
 0x16d   : > { %s7165_s8 = smov 192   ;;  %s7166_s23 = smov 12  }
 0x16e   : > { %s9632_s5 = scalar_lea.sflag [#allocation14], %s7440_s30  ;;  %s9633_s28 = sld [smem:[#allocation76_spill]] }
 0x16f   : > { %6338 = dma.hbm_to_vmem [thread:$0]  (!%p9629_p10), %s7677_s11, 12288, %s7679_s22, %s9632_s5, %s7165_s8, %s7165_s8, %s7166_s23  }
 0x170   : > { %s765_s2 = scalar_lea.vmem [#allocation18], %s7427_s25 }
 0x171   : > { %s772_s10 = sshll.u32 %s765_s2, 4  ;;  %s773_s10 = int_to_ptr.vmem [resolvable:$true] %s772_s10 }
 0x174   : > { %s9634_s18 = smov %s9633_s28  ;;  %s7708_s13 = scalar_lea.hbm %s9633_s28, %s7494_s24 }
 0x175   : > { %s7020_s0 = scalar_lea.hbm %s7708_s13, 16  ;;  %s7025_s22 = scalar_lea.hbm %s9634_s18, 64 }
 0x176   : > { %p7021_p11 = scmp.ne.s32.totalorder %s7708_s13, %s7020_s0  ;;  %p7026_p0 = scmp.lt.u32.totalorder %s7708_s13, %s9634_s18 }
 0x177   : > { %p7027_p7 = scmp.lt.u32.totalorder %s7025_s22, %s7020_s0  ;;  %p7029_p9 = scmp.lt.u32.totalorder %s7020_s0, %s7708_s13 }
 0x178   : > { %p7023_p5 = pnand %p7021_p11, %p9627_p12 }
 0x179   : > { %p7028_p6 = por %p7027_p7, %p7026_p0 }
 0x17a   : > { %p7024_p4 = pneg %p7023_p5 }
 0x17b   : > { %p7030_p1 = por %p7029_p9, %p7028_p6 }
 0x17d   : > { %p7031_p8 = pnand %p7030_p1, %p7024_p4 }
 0x17f   : > { %7034 = shalt.err (!%p7031_p8)
}
 0x180   : > { %s7035_s3 = scalar_lea.vmem %s773_s10, 16  ;;  %s7167_s27 = smov [#allocation18]  }
 0x181   : > { %p7036_p13 = scmp.ne.s32.totalorder %s773_s10, %s7035_s3  ;;  %s7040_s29 = sshll.u32 %s7167_s27, 4  ;;  %s7041_s29 = int_to_ptr.vmem [resolvable:$false] %s7040_s29 }
 0x182   : > { %s7042_s1 = scalar_lea.vmem %s7041_s29, 32  ;;  %p7043_p11 = scmp.lt.s32.totalorder %s773_s10, %s7041_s29 }
 0x183   : > { %p7038_p2 = pnand %p7036_p13, %p9627_p12  ;;  %p7044_p5 = scmp.lt.s32.totalorder %s7042_s1, %s7035_s3 }
 0x185   : > { %p7039_p3 = pneg %p7038_p2  ;;  %p7045_p10 = por %p7044_p5, %p7043_p11 }
 0x187   : > { %p7046_p0 = pnand %p7045_p10, %p7039_p3 }
 0x189   : > { %7049 = shalt.err (!%p7046_p0)
}
 0x18a   : > { %p9635_p7 = scmp.ne.s32.totalorder %s9615_s26, 0  ;;  %s9636_s8 = scalar_lea.sflag [#allocation17], %s7440_s30 }
 0x18b   : > { %s9637_s21 = sld [smem:[#allocation77_spill]]  ;;  %s782_s28 = scalar_lea.vmem [#allocation19], %s7427_s25 }
 0x18c   : > { %6344 = dma.hbm_to_vmem [thread:$0]  (!%p9635_p7), %s7708_s13, 16, %s773_s10, %s9636_s8  }
 0x18d   : > { %s789_s2 = sshll.u32 %s782_s28, 4  ;;  %s780_s0 = scalar_lea.sflag [#allocation20], %s7440_s30  ;;  %s790_s2 = int_to_ptr.vmem [resolvable:$true] %s789_s2 }
 0x191   : > { %s7734_s6 = scalar_lea.hbm %s9637_s21, %s7494_s24  ;;  %s7055_s10 = scalar_lea.hbm %s9637_s21, 64 }
 0x192   : > { %s7050_s12 = scalar_lea.hbm %s7734_s6, 16  ;;  %p7056_p9 = scmp.lt.u32.totalorder %s7734_s6, %s9637_s21 }
 0x193   : > { %p7051_p10 = scmp.ne.s32.totalorder %s7734_s6, %s7050_s12  ;;  %p7057_p1 = scmp.lt.u32.totalorder %s7055_s10, %s7050_s12 }
 0x194   : > { %p7059_p13 = scmp.lt.u32.totalorder %s7050_s12, %s7734_s6 }
 0x195   : > { %p7053_p4 = pnand %p7051_p10, %p9627_p12  ;;  %p7058_p8 = por %p7057_p1, %p7056_p9 }
 0x197   : > { %p7054_p6 = pneg %p7053_p4  ;;  %p7060_p2 = por %p7059_p13, %p7058_p8 }
 0x199   : > { %p7061_p3 = pnand %p7060_p2, %p7054_p6 }
 0x19b   : > { %7064 = shalt.err (!%p7061_p3)
}
 0x19c   : > { %s7065_s25 = scalar_lea.vmem %s790_s2, 16  ;;  %s7168_s30 = smov [#allocation19]  }
 0x19d   : > { %p7066_p11 = scmp.ne.s32.totalorder %s790_s2, %s7065_s25  ;;  %s7070_s11 = sshll.u32 %s7168_s30, 4  ;;  %s7071_s11 = int_to_ptr.vmem [resolvable:$false] %s7070_s11 }
 0x19e   : > { %s7072_s16 = scalar_lea.vmem %s7071_s11, 32  ;;  %p7073_p10 = scmp.lt.s32.totalorder %s790_s2, %s7071_s11 }
 0x19f   : > { %p7068_p5 = pnand %p7066_p11, %p9627_p12  ;;  %p7074_p4 = scmp.lt.s32.totalorder %s7072_s16, %s7065_s25 }
 0x1a1   : > { %p7069_p0 = pneg %p7068_p5  ;;  %p7075_p7 = por %p7074_p4, %p7073_p10 }
 0x1a3   : > { %p7076_p1 = pnand %p7075_p7, %p7069_p0 }
 0x1a5   : > { %7079 = shalt.err (!%p7076_p1)
}
 0x1a6   : > { %p9638_p9 = scmp.ne.s32.totalorder %s9615_s26, 0  ;;  %s9639_s3 = sld [smem:[#allocation44_spill]] }
 0x1a8   : > { %6347 = dma.hbm_to_vmem [thread:$0]  (!%p9638_p9), %s7734_s6, 16, %s790_s2, %s780_s0  }
 0x1ac   : > { %p9640_p6 = scmp.ne.s32.totalorder %s9639_s3, 0 }
 0x1ae   : > { %798 = sbr.rel (%p9640_p6) target bundleno = 2681 (0xa79), region = 100 }
 0x1b5   : > { %s9641_s27 = sld [smem:[#allocation40_spill]]  ;;  %s9642_s15 = sld [smem:[#allocation43_spill]] }
 0x1bb   : > { %s7758_s29 = sand.u32 1, %s9641_s27   ;;  %p9643_p12 = scmp.ne.s32.totalorder %s9642_s15, 0 }
 0x1bc   : > { %s5172_s1 = sshll.u32 %s7758_s29, 6  ;;  %s801_s8 = scalar_lea.sflag [#allocation9], %s7758_s29 }
 0x1bd   : > { %s7762_s23 = scalar_lea.vmem [#allocation8], %s5172_s1 }
 0x1be   : > { %7099 = dma.done.wait (%p9643_p12), %s801_s8, 1024  }
 0x1bf   : > { %7101 = vsyncadd (%p9643_p12), %s801_s8, 4294966272  ;;  %s9644_s26 = sld [smem:[#allocation42_spill]]  ;;  %s7769_s28 = scalar_lea.vmem [#allocation10], %s5172_s1 }
 0x1c5   : > { %s809_s5 = sand.u32 1, %s9644_s26  }
 0x1c6   : > { %s810_s6 = scalar_lea.sflag [#allocation11], %s809_s5 }
 0x1c7   : > { %7103 = dma.done.wait (%p9643_p12), %s810_s6, 1040  }
 0x1c8   : > { %7105 = vsyncadd (%p9643_p12), %s810_s6, 4294966256  ;;  %s821_s2 = scalar_lea.vmem [#allocation12], %s7758_s29  ;;  %s827_s0 = scalar_lea.sflag [#allocation14], %s809_s5 }
 0x1c9   : > { %s7776_s12 = scalar_lea.vmem [#allocation13], %s5172_s1 }
 0x1ca   : > { %7107 = dma.done.wait (%p9643_p12), %s827_s0, 13312  }
 0x1cb   : > { %7109 = vsyncadd (%p9643_p12), %s827_s0, 4294953984  ;;  %s6263_s14 = smul.u32 768, %s7758_s29  ;;  %s845_s10 = scalar_lea.sflag [#allocation17], %s809_s5 }
 0x1cc   : > { %s847_s22 = scalar_lea.vmem [#allocation16], %s7758_s29 }
 0x1cd   : > { %s7783_s13 = scalar_lea.vmem [#allocation15], %s6263_s14 }
 0x1ce   : > { %7111 = dma.done.wait (%p9643_p12), %s845_s10, 32  }
 0x1cf   : > { %7113 = vsyncadd (%p9643_p12), %s845_s10, 4294967264  ;;  %s855_s24 = scalar_lea.vmem [#allocation18], %s7758_s29  ;;  %s861_s25 = scalar_lea.sflag [#allocation20], %s809_s5 }
 0x1d0   : > { %s863_s30 = scalar_lea.vmem [#allocation19], %s7758_s29 }
 0x1d1   : > { %7115 = dma.done.wait (%p9643_p12), %s861_s25, 16  }
 0x1d2   : > { %7117 = vsyncadd (%p9643_p12), %s861_s25, 4294967280  ;;  %p9645_p7 = scmp.eq.s32.totalorder %s9644_s26, 0 }
 0x1d4   : > { %7119 = dma.done.wait (%p9645_p7), [#allocation20], 1024   ;;  %p9646_p8 = pmov %p9645_p7 }
 0x1d5   : > { %p9647_p13 = pmov %p9645_p7 }
 0x1d6   : > { %7121 = vsyncadd (%p9646_p8), [#allocation20], 4294966272 }
 0x1d7   : > { %7123 = dma.done.wait (%p9647_p13), [#allocation23], 1040   ;;  %p9648_p2 = pmov %p9645_p7 }
 0x1d9   : > { %7125 = vsyncadd (%p9648_p2), [#allocation23], 4294966256  ;;  %p9649_p3 = pmov %p9648_p2 }
 0x1da   : > { %p9650_p11 = pmov %p9648_p2 }
 0x1db   : > { %7127 = dma.done.wait (%p9649_p3), [#allocation26], 1040  }
 0x1dc   : > { %7129 = vsyncadd (%p9650_p11), [#allocation26], 4294966256  ;;  %p9651_p5 = pmov %p9648_p2 }
 0x1dd   : > { %p9652_p0 = pmov %p9648_p2 }
 0x1de   : > { %7131 = dma.done.wait (%p9651_p5), [#allocation29], 16  }
 0x1df   : > { %7133 = vsyncadd (%p9652_p0), [#allocation29], 4294967280  ;;  %p9653_p10 = scmp.ne.s32.totalorder %s9644_s26, 0 }
 0x1e0   : > { %s9654_s3 = sld [smem:[#allocation66_spill]] (!%p9653_p10) }
 0x1e1   : > { %974 = sbr.rel (%p9653_p10) target bundleno = 495 (0x1ef), region = 160 }
 0x1e6   : > { %v975_v0 = vld [vmem:[%s9654_s3] sm:$0xff] (!%p9653_p10)  ;;  %v976_v1 = vld [vmem:[%s9654_s3 + $0x8] sm:$0xff] (!%p9653_p10)  ;;  %v977_v2 = vld [vmem:[%s9654_s3 + $0x10] sm:$0xff] (!%p9653_p10) }
 0x1e7   : > { %991 = vst [vmem:[#allocation2] sm:$0xff] (!%p9653_p10), %v975_v0  ;;  %992 = vst [vmem:[#allocation2 + $0x8] sm:$0xff] (!%p9653_p10), %v976_v1  ;;  %v978_v3 = vld [vmem:[%s9654_s3 + $0x18] sm:$0xff] (!%p9653_p10)  ;;  %v979_v4 = vld [vmem:[%s9654_s3 + $0x20] sm:$0xff] (!%p9653_p10) }
 0x1e8   : > { %993 = vst [vmem:[#allocation2 + $0x10] sm:$0xff] %v977_v2  ;;  %v980_v5 = vld [vmem:[%s9654_s3 + $0x28] sm:$0xff]  ;;  %994 = vst [vmem:[#allocation2 + $0x18] sm:$0xff] %v978_v3  ;;  %v981_v6 = vld [vmem:[%s9654_s3 + $0x30] sm:$0xff] }
 0x1e9   : > { %995 = vst [vmem:[#allocation2 + $0x20] sm:$0xff] %v979_v4  ;;  %996 = vst [vmem:[#allocation2 + $0x28] sm:$0xff] %v980_v5  ;;  %v982_v7 = vld [vmem:[%s9654_s3 + $0x38] sm:$0xff]  ;;  %v983_v8 = vld [vmem:[%s9654_s3 + $0x40] sm:$0xff] }
 0x1ea   : > { %997 = vst [vmem:[#allocation2 + $0x30] sm:$0xff] %v981_v6  ;;  %998 = vst [vmem:[#allocation2 + $0x38] sm:$0xff] %v982_v7  ;;  %v984_v9 = vld [vmem:[%s9654_s3 + $0x48] sm:$0xff]  ;;  %v985_v10 = vld [vmem:[%s9654_s3 + $0x50] sm:$0xff] }
 0x1eb   : > { %999 = vst [vmem:[#allocation2 + $0x40] sm:$0xff] %v983_v8  ;;  %v986_v11 = vld [vmem:[%s9654_s3 + $0x58] sm:$0xff]  ;;  %1000 = vst [vmem:[#allocation2 + $0x48] sm:$0xff] %v984_v9  ;;  %v987_v12 = vld [vmem:[%s9654_s3 + $0x60] sm:$0xff] }
 0x1ec   : > { %1001 = vst [vmem:[#allocation2 + $0x50] sm:$0xff] %v985_v10  ;;  %1002 = vst [vmem:[#allocation2 + $0x58] sm:$0xff] %v986_v11  ;;  %v988_v13 = vld [vmem:[%s9654_s3 + $0x68] sm:$0xff]  ;;  %v989_v14 = vld [vmem:[%s9654_s3 + $0x70] sm:$0xff] }
 0x1ed   : > { %1003 = vst [vmem:[#allocation2 + $0x60] sm:$0xff] %v987_v12  ;;  %1004 = vst [vmem:[#allocation2 + $0x68] sm:$0xff] %v988_v13  ;;  %v990_v15 = vld [vmem:[%s9654_s3 + $0x78] sm:$0xff] }
 0x1ee   : > { %1005 = vst [vmem:[#allocation2 + $0x70] sm:$0xff] %v989_v14  ;;  %1006 = vst [vmem:[#allocation2 + $0x78] sm:$0xff] %v990_v15 }
 0x1ef PF: > { %s9658_s26 = sld [smem:[#allocation67_spill]]  ;;  %s9660_s10 = sld [smem:[#allocation68_spill]]  ;;  %v6420_v42 = vld [vmem:[%s7769_s28] sm:$0xff]   ;;  %v6421_v47 = vld [vmem:[%s7769_s28 + $0x8] sm:$0xff]   ;;  %v6422_v48 = vld [vmem:[%s7769_s28 + $0x10] sm:$0xff]   ;;  %vm1530_vm0 = vcmask 523264  }
 0x1f0   : > { %v1011_v22 = vld [vmem:[#allocation2 + $0x20] sm:$0xff]  ;;  %v1012_v23 = vld [vmem:[#allocation2 + $0x28] sm:$0xff]  ;;  %v6423_v51 = vld [vmem:[%s7769_s28 + $0x18] sm:$0xff]   ;;  %s9665_s11 = sld [smem:[#allocation69_spill]]  ;;  %s7959_s16 = sld [smem:[#allocation7]] }
 0x1f1   : > { %v1013_v24 = vld [vmem:[#allocation2 + $0x30] sm:$0xff]  ;;  %v7871_v25 = vpack.c.bf16 %v1012_v23, %v1011_v22  ;;  %v1014_v26 = vld [vmem:[#allocation2 + $0x38] sm:$0xff]  ;;  %v6424_v52 = vld [vmem:[%s7769_s28 + $0x20] sm:$0xff]   ;;  %s5287_s15 = sld [smem:[#allocation7 + $0x1]]  ;;  %s7965_s1 = sld [smem:[#allocation7 + $0x2]] }
 0x1f2   : > { %v1015_v28 = vld [vmem:[#allocation2 + $0x40] sm:$0xff]  ;;  %v7879_v29 = vpack.c.bf16 %v1014_v26, %v1013_v24  ;;  %v1016_v30 = vld [vmem:[#allocation2 + $0x48] sm:$0xff]  ;;  %v6426_v54 = vld [vmem:[%s7769_s28 + $0x30] sm:$0xff]   ;;  %s7969_s6 = sld [smem:[#allocation7 + $0x3]]  ;;  %s8251_s25 = sld [smem:[#allocation7 + $0xa]] }
 0x1f3   : > { %9657 = vst [vmem:[#allocation49_spill] sm:$0xff] %v7871_v25  ;;  %v7888_v32 = vpack.c.bf16 %v1016_v30, %v1015_v28  ;;  %v1017_v33 = vld [vmem:[#allocation2 + $0x50] sm:$0xff]  ;;  %v1018_v34 = vld [vmem:[#allocation2 + $0x58] sm:$0xff]  ;;  %v6425_v53 = vld [vmem:[%s7769_s28 + $0x28] sm:$0xff]   ;;  %v7170_v28 = vmov -1e+30  }
 0x1f4   : > { %9659 = vst [vmem:[#allocation50_spill] sm:$0xff] %v7879_v29  ;;  %v7894_v35 = vpack.c.bf16 %v1018_v34, %v1017_v33  ;;  %v1019_v36 = vld [vmem:[#allocation2 + $0x60] sm:$0xff]  ;;  %v1020_v37 = vld [vmem:[#allocation2 + $0x68] sm:$0xff]  ;;  %v6427_v55 = vld [vmem:[%s7769_s28 + $0x38] sm:$0xff]   ;;  %s9741_s29 = sld [smem:[#allocation42_spill]] }
 0x1f5   : > { %v1007_v16 = vld [vmem:[#allocation2] sm:$0xff]  ;;  %v1008_v17 = vld [vmem:[#allocation2 + $0x8] sm:$0xff]  ;;  %9661 = vst [vmem:[#allocation51_spill] sm:$0xff] %v7888_v32  ;;  %v1021_v38 = vld [vmem:[#allocation2 + $0x70] sm:$0xff]  ;;  %v7900_v40 = vpack.c.bf16 %v1020_v37, %v1019_v36 }
 0x1f6   : > { %v1009_v18 = vld [vmem:[#allocation2 + $0x10] sm:$0xff]  ;;  %v7862_v19 = vpack.c.bf16 %v1008_v17, %v1007_v16  ;;  %v1010_v20 = vld [vmem:[#allocation2 + $0x18] sm:$0xff]  ;;  %v6412_v27 = vld [vmem:[%s9658_s26] sm:$0xff]   ;;  %9662 = vst [vmem:[#allocation52_spill] sm:$0xff] %v7894_v35  ;;  %s2270_s27 = scalar_lea.vmem [#allocation5], %s7959_s16 }
 0x1f7   : > { %v7864_v21 = vpack.c.bf16 %v1010_v20, %v1009_v18  ;;  %5886 = vmatprep.mubr.bf16.mxu1 %v6412_v27  ;;  %v6416_v31 = vld [vmem:[%s9660_s10] sm:$0xff]   ;;  %v1022_v39 = vld [vmem:[#allocation2 + $0x78] sm:$0xff]  ;;  %9663 = vst [vmem:[#allocation53_spill] sm:$0xff] %v7900_v40  ;;  %v6413_v43 = vld [vmem:[%s9658_s26 + $0x8] sm:$0xff]   ;;  %v7169_v27 = vmov 1e+30  }
 0x1f8   : > { %9655 = vst [vmem:[#allocation47_spill] sm:$0xff] %v7862_v19  ;;  %5870 = vmatprep.subr.bf16.mxu1 %v7862_v19  ;;  %5846 = vmatprep.subr.bf16.mxu0 %v7862_v19  ;;  %v7906_v41 = vpack.c.bf16 %v1022_v39, %v1021_v38  ;;  %v6414_v44 = vld [vmem:[%s9658_s26 + $0x10] sm:$0xff]   ;;  %v6417_v45 = vld [vmem:[%s9660_s10 + $0x8] sm:$0xff]   ;;  %v6415_v49 = vld [vmem:[%s9658_s26 + $0x18] sm:$0xff]   ;;  %s2276_s8 = scalar_lea.vmem [#allocation4], %s5287_s15  ;;  %s2280_s5 = scalar_lea.vmem [#allocation5], %s5287_s15 }
 0x1f9   : > { %9656 = vst [vmem:[#allocation48_spill] sm:$0xff] %v7864_v21  ;;  %5871 = vmatpush3.bf16.msra.mxu1 %v7862_v19  ;;  %5847 = vmatpush3.bf16.msra.mxu0 %v7862_v19  ;;  %v6418_v46 = vld [vmem:[%s9660_s10 + $0x10] sm:$0xff]   ;;  %v6419_v50 = vld [vmem:[%s9660_s10 + $0x18] sm:$0xff]   ;;  %v6428_v56 = vld [vmem:[%s7762_s23] sm:$0xff]   ;;  %s2286_s0 = scalar_lea.vmem [#allocation4], %s7965_s1  ;;  %s2290_s14 = scalar_lea.vmem [#allocation5], %s7965_s1 }
 0x1fa   : > { %5872 = vmatprep.subr.bf16.mxu1 %v7864_v21  ;;  %5848 = vmatprep.subr.bf16.mxu0 %v7864_v21  ;;  %9664 = vst [vmem:[#allocation54_spill] sm:$0xff] %v7906_v41  ;;  %v6429_v4 = vld [vmem:[%s7762_s23 + $0x8] sm:$0xff]   ;;  %v6430_v7 = vld [vmem:[%s7762_s23 + $0x10] sm:$0xff]   ;;  %v6431_v18 = vld [vmem:[%s7762_s23 + $0x18] sm:$0xff]   ;;  %s2296_s28 = scalar_lea.vmem [#allocation4], %s7969_s6  ;;  %p5529_p4 = scmp.ne.s32.totalorder %s9741_s29, 3 }
 0x1fb   : > { %5862 = vmatprep.mubr.bf16.mxu0 %v6416_v31  ;;  %v6432_v22 = vld [vmem:[%s7762_s23 + $0x20] sm:$0xff]   ;;  %v6433_v23 = vld [vmem:[%s7762_s23 + $0x28] sm:$0xff]   ;;  %v6434_v24 = vld [vmem:[%s7762_s23 + $0x30] sm:$0xff]   ;;  %2232 = vst [vmem:[#allocation4] sm:$0xff] %v7169_v27 }
 0x1fc   : > { %v6435_v26 = vld [vmem:[%s7762_s23 + $0x38] sm:$0xff]   ;;  %2233 = vst [vmem:[#allocation4 + $0x8] sm:$0xff] %v7169_v27  ;;  %2234 = vst [vmem:[#allocation4 + $0x10] sm:$0xff] %v7169_v27  ;;  %v7953_v30 = vld [vmem:[%s9665_s11] sm:$0xff]  ;;  %s8005_s23 = sld [smem:[#allocation7 + $0x4]] }
 0x1fd   : > { %5873 = vmatpush3.bf16.msra.mxu1 %v7864_v21  ;;  %5849 = vmatpush3.bf16.msra.mxu0 %v7864_v21  ;;  %2235 = vst [vmem:[#allocation4 + $0x18] sm:$0xff] %v7169_v27  ;;  %2236 = vst [vmem:[#allocation4 + $0x20] sm:$0xff] %v7169_v27  ;;  %v5206_v31 = vld [vmem:[%s821_s2] ss:$0 sm:$0xff]  ;;  %s2266_s2 = scalar_lea.vmem [#allocation4], %s7959_s16  ;;  %s2300_s16 = scalar_lea.vmem [#allocation5], %s7969_s6 }
 0x1fe   : > { %5874 = vmatprep.subr.bf16.mxu1 %v7871_v25  ;;  %5850 = vmatprep.subr.bf16.mxu0 %v7871_v25  ;;  %2237 = vst [vmem:[#allocation4 + $0x28] sm:$0xff] %v7169_v27  ;;  %2238 = vst [vmem:[#allocation4 + $0x30] sm:$0xff] %v7169_v27 }
 0x1ff   : > { %2239 = vst [vmem:[#allocation4 + $0x38] sm:$0xff] %v7169_v27  ;;  %2240 = vst [vmem:[#allocation4 + $0x40] sm:$0xff] %v7169_v27 }
 0x200   : > { %2241 = vst [vmem:[#allocation4 + $0x48] sm:$0xff] %v7169_v27  ;;  %2242 = vst [vmem:[#allocation4 + $0x50] sm:$0xff] %v7169_v27 }
 0x201   : > { %5875 = vmatpush3.bf16.msra.mxu1 %v7871_v25  ;;  %5851 = vmatpush3.bf16.msra.mxu0 %v7871_v25  ;;  %2243 = vst [vmem:[#allocation4 + $0x58] sm:$0xff] %v7169_v27  ;;  %2244 = vst [vmem:[#allocation4 + $0x60] sm:$0xff] %v7169_v27 }
 0x202   : > { %5876 = vmatprep.subr.bf16.mxu1 %v7879_v29  ;;  %5852 = vmatprep.subr.bf16.mxu0 %v7879_v29  ;;  %2245 = vst [vmem:[#allocation4 + $0x68] sm:$0xff] %v7169_v27  ;;  %2246 = vst [vmem:[#allocation4 + $0x70] sm:$0xff] %v7169_v27  ;;  %s2306_s1 = scalar_lea.vmem [#allocation4], %s8005_s23  ;;  %s2310_s6 = scalar_lea.vmem [#allocation5], %s8005_s23 }
 0x203   : > { %2247 = vst [vmem:[#allocation4 + $0x78] sm:$0xff] %v7169_v27  ;;  %2248 = vst [vmem:[#allocation5] sm:$0xff] %v7170_v28  ;;  %v7171_v27 = vmov 0  }
 0x204   : > { %2249 = vst [vmem:[#allocation5 + $0x8] sm:$0xff] %v7170_v28  ;;  %2250 = vst [vmem:[#allocation5 + $0x10] sm:$0xff] %v7170_v28  ;;  %6410 = vset.pattern.permute.xlu0 %v7171_v27  ;;  %6411 = vset.pattern.permute.xlu1 %v7171_v27 }
 0x205   : > { %5877 = vmatpush3.bf16.msra.mxu1 %v7879_v29  ;;  %5853 = vmatpush3.bf16.msra.mxu0 %v7879_v29  ;;  %2251 = vst [vmem:[#allocation5 + $0x18] sm:$0xff] %v7170_v28  ;;  %2252 = vst [vmem:[#allocation5 + $0x20] sm:$0xff] %v7170_v28 }
 0x206   : > { %5878 = vmatprep.subr.bf16.mxu1 %v7888_v32  ;;  %5854 = vmatprep.subr.bf16.mxu0 %v7888_v32  ;;  %2253 = vst [vmem:[#allocation5 + $0x28] sm:$0xff] %v7170_v28  ;;  %2254 = vst [vmem:[#allocation5 + $0x30] sm:$0xff] %v7170_v28 }
 0x207   : > { %2255 = vst [vmem:[#allocation5 + $0x38] sm:$0xff] %v7170_v28  ;;  %2256 = vst [vmem:[#allocation5 + $0x40] sm:$0xff] %v7170_v28 }
 0x208   : > { %2257 = vst [vmem:[#allocation5 + $0x48] sm:$0xff] %v7170_v28  ;;  %2258 = vst [vmem:[#allocation5 + $0x50] sm:$0xff] %v7170_v28 }
 0x209   : > { %5879 = vmatpush3.bf16.msra.mxu1 %v7888_v32  ;;  %5855 = vmatpush3.bf16.msra.mxu0 %v7888_v32  ;;  %2259 = vst [vmem:[#allocation5 + $0x58] sm:$0xff] %v7170_v28  ;;  %2260 = vst [vmem:[#allocation5 + $0x60] sm:$0xff] %v7170_v28 }
 0x20a   : > { %5880 = vmatprep.subr.bf16.mxu1 %v7894_v35  ;;  %5856 = vmatprep.subr.bf16.mxu0 %v7894_v35  ;;  %2261 = vst [vmem:[#allocation5 + $0x68] sm:$0xff] %v7170_v28  ;;  %2262 = vst [vmem:[#allocation5 + $0x70] sm:$0xff] %v7170_v28 }
 0x20b   : > { %2263 = vst [vmem:[#allocation5 + $0x78] sm:$0xff] %v7170_v28 }
 0x20d   : > { %5881 = vmatpush3.bf16.msra.mxu1 %v7894_v35  ;;  %5857 = vmatpush3.bf16.msra.mxu0 %v7894_v35  ;;  %v6480_v35 = vld [vmem:[%s7783_s13 + $0x128] ss:$12 sps:$4 sm:$0xff]  }
 0x20e   : > { %5882 = vmatprep.subr.bf16.mxu1 %v7900_v40  ;;  %5858 = vmatprep.subr.bf16.mxu0 %v7900_v40 }
 0x211   : > { %5883 = vmatpush3.bf16.msra.mxu1 %v7900_v40  ;;  %5859 = vmatpush3.bf16.msra.mxu0 %v7900_v40 }
 0x212   : > { %5884 = vmatprep.subr.bf16.mxu1 %v7906_v41  ;;  %5860 = vmatprep.subr.bf16.mxu0 %v7906_v41 }
 0x215   : > { %5885 = vmatpush3.bf16.msra.mxu1 %v7906_v41  ;;  %5861 = vmatpush3.bf16.msra.mxu0 %v7906_v41 }
 0x216   : > { %5894 = vmatprep.subr.bf16.mxu0 %v6420_v42 }
 0x218   : > { %5887 = vmatmul.mubr.bf16.vlgmr.msra.gmra.mrb[0].mxu1 %v6413_v43  ;;  %5863 = vmatmul.mubr.bf16.vlgmr.msra.gmra.mrb[0].mxu0 %v6417_v45 }
 0x219   : > { %5890 = vmatprep.mubr.bf16.mxu1 %v6414_v44  ;;  %5866 = vmatprep.mubr.bf16.mxu0 %v6418_v46 }
 0x21a   : > { %5895 = vmatpush3.bf16.msra.mxu0 %v6420_v42 }
 0x21b   : > { %5896 = vmatprep.subr.bf16.mxu0 %v6421_v47 }
 0x21e   : > { %5897 = vmatpush3.bf16.msra.mxu0 %v6421_v47 }
 0x21f   : > { %5898 = vmatprep.subr.bf16.mxu0 %v6422_v48 }
 0x220   : > { %5891 = vmatmul.mubr.bf16.gmra.mrb[4].mxu1 %v6415_v49  ;;  %5867 = vmatmul.mubr.bf16.gmra.mrb[4].mxu0 %v6419_v50 }
 0x221   : > { %5958 = vmatprep.mubr.msk.f32.mxu1 %vm1530_vm0, %v7953_v30 }
 0x222   : > { %5899 = vmatpush3.bf16.msra.mxu0 %v6422_v48 }
 0x223   : > { %5900 = vmatprep.subr.bf16.mxu0 %v6423_v51 }
 0x226   : > { %5901 = vmatpush3.bf16.msra.mxu0 %v6423_v51 }
 0x227   : > { %5902 = vmatprep.subr.bf16.mxu0 %v6424_v52 }
 0x22a   : > { %5903 = vmatpush3.bf16.msra.mxu0 %v6424_v52 }
 0x22b   : > { %5904 = vmatprep.subr.bf16.mxu0 %v6425_v53 }
 0x22e   : > { %5905 = vmatpush3.bf16.msra.mxu0 %v6425_v53 }
 0x22f   : > { %5906 = vmatprep.subr.bf16.mxu0 %v6426_v54 }
 0x232   : > { %5907 = vmatpush3.bf16.msra.mxu0 %v6426_v54 }
 0x233   : > { %5908 = vmatprep.subr.bf16.mxu0 %v6427_v55 }
 0x236   : > { %5909 = vmatpush3.bf16.msra.mxu0 %v6427_v55  ;;  %v2267_v55 = vld [vmem:[%s2266_s2] sm:$0x1] }
 0x237   : > { %5918 = vmatprep.subr.bf16.mxu0 %v6428_v56 }
 0x2eb   : > { %v5888_v57 = vpop.f32.mrb[0].mxu1  ;;  %v5864_v59 = vpop.f32.mrb[0].mxu0 }
 0x2ec   : > { %v1194_v58 = vpop.f32.mrb[1].mxu1  ;;  %v1097_v61 = vpop.f32.mrb[1].mxu0 }
 0x2ed   : > { %v5889_v60 = vpop.f32.mrb[2].mxu1  ;;  %v5865_v0 = vpop.f32.mrb[2].mxu0 }
 0x2ee   : > { %v1246_v62 = vpack.c.bf16 %v5889_v60, %v5888_v57  ;;  %v1197_v63 = vpop.f32.mrb[3].mxu1  ;;  %v1226_v2 = vpack.c.bf16 %v5865_v0, %v5864_v59  ;;  %v1100_v3 = vpop.f32.mrb[3].mxu0 }
 0x2ef   : > { %v1245_v1 = vpack.c.bf16 %v1197_v63, %v1194_v58  ;;  %v1225_v5 = vpack.c.bf16 %v1100_v3, %v1097_v61 }
 0x2f1   : > { %5910 = vmatprep.mubr.bf16.mxu0 %v1245_v1 }
 0x2f2   : > { %5911 = vmatmul.mubr.bf16.vlgmr.msra.gmra.mrb[8].mxu0 %v1246_v62 }
 0x2f3   : > { %5919 = vmatpush3.bf16.msra.mxu0 %v6428_v56  ;;  %v5892_v6 = vpop.f32.mrb[4].mxu1  ;;  %v5868_v9 = vpop.f32.mrb[4].mxu0  ;;  %v2271_v56 = vld [vmem:[%s2270_s27] sm:$0x1] }
 0x2f4   : > { %5920 = vmatprep.subr.bf16.mxu0 %v6429_v4  ;;  %v1210_v8 = vpop.f32.mrb[5].mxu1  ;;  %v1113_v11 = vpop.f32.mrb[5].mxu0 }
 0x2f5   : > { %v5893_v10 = vpop.f32.mrb[6].mxu1  ;;  %v5869_v14 = vpop.f32.mrb[6].mxu0 }
 0x2f6   : > { %v1248_v12 = vpack.c.bf16 %v5893_v10, %v5892_v6  ;;  %v1213_v13 = vpop.f32.mrb[7].mxu1  ;;  %v1228_v16 = vpack.c.bf16 %v5869_v14, %v5868_v9  ;;  %v1116_v17 = vpop.f32.mrb[7].mxu0 }
 0x2f7   : > { %5921 = vmatpush3.bf16.msra.mxu0 %v6429_v4  ;;  %v1247_v15 = vpack.c.bf16 %v1213_v13, %v1210_v8  ;;  %v1227_v20 = vpack.c.bf16 %v1116_v17, %v1113_v11 }
 0x2f8   : > { %5922 = vmatprep.subr.bf16.mxu0 %v6430_v7 }
 0x2f9   : > { %5914 = vmatprep.mubr.bf16.mxu0 %v1247_v15 }
 0x2fa   : > { %5915 = vmatmul.mubr.bf16.gmra.mrb[12].mxu0 %v1248_v12 }
 0x2fb   : > { %5923 = vmatpush3.bf16.msra.mxu0 %v6430_v7  ;;  %5934 = vmatprep.mubr.bf16.mxu0 %v1225_v5 }
 0x2fc   : > { %5924 = vmatprep.subr.bf16.mxu0 %v6431_v18 }
 0x2ff   : > { %5925 = vmatpush3.bf16.msra.mxu0 %v6431_v18 }
 0x300   : > { %5926 = vmatprep.subr.bf16.mxu0 %v6432_v22 }
 0x303   : > { %5927 = vmatpush3.bf16.msra.mxu0 %v6432_v22  ;;  %v7981_v22 = vld [vmem:[%s9665_s11 + $0x10] sm:$0xff] }
 0x304   : > { %5928 = vmatprep.subr.bf16.mxu0 %v6433_v23 }
 0x307   : > { %5929 = vmatpush3.bf16.msra.mxu0 %v6433_v23  ;;  %v7990_v23 = vld [vmem:[%s9665_s11 + $0x18] sm:$0xff] }
 0x308   : > { %5930 = vmatprep.subr.bf16.mxu0 %v6434_v24 }
 0x30b   : > { %5931 = vmatpush3.bf16.msra.mxu0 %v6434_v24 }
 0x30c   : > { %5932 = vmatprep.subr.bf16.mxu0 %v6435_v26 }
 0x30f   : > { %5933 = vmatpush3.bf16.msra.mxu0 %v6435_v26  ;;  %v7999_v26 = vld [vmem:[%s9665_s11 + $0x20] sm:$0xff] }
 0x312   : > { %5935 = vmatmul.mubr.bf16.vlgmr.msra.gmra.mrb[8].mxu0 %v1226_v2 }
 0x313   : > { %5938 = vmatprep.mubr.bf16.mxu0 %v1227_v20  ;;  %v7976_v20 = vld [vmem:[%s9665_s11 + $0x8] sm:$0xff] }
 0x31a   : > { %5939 = vmatmul.mubr.bf16.gmra.mrb[12].mxu0 %v1228_v16 }
 0x3e5   : > { %v5936_v33 = vpop.f32.mrb[8].mxu0 }
 0x3e6   : > { %v1500_v34 = vadd.f32 %v5936_v33, %v5206_v31  ;;  %v1460_v36 = vpop.f32.mrb[9].mxu0 }
 0x3e7   : > { %v1498_v37 = vadd.f32 %v5206_v31, %v1460_v36  ;;  %v5937_v38 = vpop.f32.mrb[10].mxu0 }
 0x3e8   : > { %1508 = vst [vmem:[#allocation3 + $0x10] sm:$0xff] %v1500_v34  ;;  %v1501_v39 = vadd.f32 %v5937_v38, %v5206_v31  ;;  %v1463_v42 = vpop.f32.mrb[11].mxu0  ;;  %v1726_v44 = vmul.f32 %v1500_v34, %v1500_v34 }
 0x3e9   : > { %1506 = vst [vmem:[#allocation3] sm:$0xff] %v1498_v37  ;;  %v1499_v43 = vadd.f32 %v5206_v31, %v1463_v42  ;;  %v1724_v47 = vmul.f32 %v1498_v37, %v1498_v37 }
 0x3ea   : > { %1509 = vst [vmem:[#allocation3 + $0x18] sm:$0xff] %v1501_v39  ;;  %v1727_v45 = vmul.f32 %v1501_v39, %v1501_v39  ;;  %v6153_v46 = vpack.c.bf16 %v1501_v39, %v1500_v34  ;;  %v8019_v39 = vld [vmem:[%s9665_s11 + $0x28] sm:$0xff] }
 0x3eb   : > { %1507 = vst [vmem:[#allocation3 + $0x8] sm:$0xff] %v1499_v43  ;;  %v1725_v48 = vmul.f32 %v1499_v43, %v1499_v43  ;;  %v6149_v49 = vpack.c.bf16 %v1499_v43, %v1498_v37  ;;  %v8027_v43 = vld [vmem:[%s9665_s11 + $0x30] sm:$0xff] }
 0x3ec   : > { %v7961_v50 = vpack.c.bf16 %v1727_v45, %v1726_v44 }
 0x3ed   : > { %v5940_v51 = vpop.f32.mrb[12].mxu0  ;;  %6150 = vmatprep.subr.bf16.mxu1 %v6149_v49  ;;  %v6165_v52 = vpack.c.bf16 %v1725_v48, %v1724_v47  ;;  %v8046_v47 = vld [vmem:[%s9665_s11 + $0x40] sm:$0xff] }
 0x3ee   : > { %v1504_v53 = vadd.f32 %v5940_v51, %v5206_v31  ;;  %v1476_v54 = vpop.f32.mrb[13].mxu0  ;;  %6152 = vmatpush3.bf16.msra.mxu1 %v6149_v49 }
 0x3ef   : > { %v1502_v57 = vadd.f32 %v5206_v31, %v1476_v54  ;;  %6154 = vmatprep.subr.bf16.mxu1 %v6153_v46  ;;  %v5941_v2 = vpop.f32.mrb[14].mxu0 }
 0x3f0   : > { %v2265_v58 = vld [vmem:[#allocation3] sm:$0x1]  ;;  %v2275_v61 = vld [vmem:[#allocation3 + $0x1] sm:$0x1]  ;;  %v1505_v3 = vadd.f32 %v5941_v2, %v5206_v31  ;;  %v1479_v4 = vpop.f32.mrb[15].mxu0  ;;  %v1730_v6 = vmul.f32 %v1504_v53, %v1504_v53  ;;  %v8111_v2 = vld [vmem:[%s9665_s11 + $0x68] sm:$0xff] }
 0x3f1   : > { %1510 = vst [vmem:[#allocation3 + $0x20] sm:$0xff] %v1502_v57  ;;  %v2268_v59 = vmin.f32 %v2267_v55, %v2265_v58  ;;  %v2272_v60 = vmax.f32 %v2271_v56, %v2265_v58  ;;  %v1503_v5 = vadd.f32 %v5206_v31, %v1479_v4  ;;  %v1728_v9 = vmul.f32 %v1502_v57, %v1502_v57  ;;  %v2285_v14 = vld [vmem:[#allocation3 + $0x2] sm:$0x1]  ;;  %v2295_v33 = vld [vmem:[#allocation3 + $0x3] sm:$0x1]  ;;  %v8119_v4 = vld [vmem:[%s9665_s11 + $0x70] sm:$0xff] }
 0x3f2   : > { %6156 = vmatpush3.bf16.msra.mxu1 %v6153_v46  ;;  %v1731_v7 = vmul.f32 %v1505_v3, %v1505_v3  ;;  %v6161_v8 = vpack.c.bf16 %v1505_v3, %v1504_v53  ;;  %v8040_v46 = vld [vmem:[%s9665_s11 + $0x38] sm:$0xff]  ;;  %v8072_v53 = vld [vmem:[%s9665_s11 + $0x50] sm:$0xff] }
 0x3f3   : > { %2269 = vst [vmem:[%s2266_s2] sm:$0x1] %v2268_v59  ;;  %2273 = vst [vmem:[%s2270_s27] sm:$0x1] %v2272_v60  ;;  %v1729_v10 = vmul.f32 %v1503_v5, %v1503_v5  ;;  %v6157_v11 = vpack.c.bf16 %v1503_v5, %v1502_v57 }
 0x3f4   : > { %v7967_v12 = vpack.c.bf16 %v1731_v7, %v1730_v6  ;;  %v2315_v7 = vld [vmem:[#allocation3 + $0x5] sm:$0x1] }
 0x3f5   : > { %6158 = vmatprep.subr.bf16.mxu1 %v6157_v11  ;;  %v6173_v13 = vpack.c.bf16 %v1729_v10, %v1728_v9 }
 0x3f6   : > { %6160 = vmatpush3.bf16.msra.mxu1 %v6157_v11 }
 0x3f7   : > { %6162 = vmatprep.subr.bf16.mxu1 %v6161_v8 }
 0x3fa   : > { %v2277_v62 = vld [vmem:[%s2276_s8] sm:$0x1]  ;;  %6164 = vmatpush3.bf16.msra.mxu1 %v6161_v8 }
 0x3fb   : > { %v2281_v63 = vld [vmem:[%s2280_s5] sm:$0x1]  ;;  %v2278_v0 = vmin.f32 %v2277_v62, %v2275_v61  ;;  %6166 = vmatprep.subr.bf16.mxu1 %v6165_v52 }
 0x3fc   : > { %v2282_v1 = vmax.f32 %v2281_v63, %v2275_v61  ;;  %v8088_v61 = vld [vmem:[%s9665_s11 + $0x58] sm:$0xff]  ;;  %v8093_v62 = vld [vmem:[%s9665_s11 + $0x60] sm:$0xff] }
 0x3fd   : > { %2279 = vst [vmem:[%s2276_s8] sm:$0x1] %v2278_v0  ;;  %5959 = vmatmul.mubr.msk.f32.vlgmr.msra.gmra.mrb[8].mxu1 %vm1530_vm0, %v7976_v20  ;;  %s9666_s8 = sld [smem:[#allocation70_spill]] }
 0x3fe   : > { %2283 = vst [vmem:[%s2280_s5] sm:$0x1] %v2282_v1  ;;  %6168 = vmatpush3.bf16.msra.mxu1 %v6165_v52  ;;  %5961 = vmatprep.mubr.msk.f32.mxu1 %vm1530_vm0, %v7981_v22  ;;  %v8067_v52 = vld [vmem:[%s9665_s11 + $0x48] sm:$0xff] }
 0x3ff   : > { %6170 = vmatprep.subr.bf16.mxu1 %v7961_v50 }
 0x401   : > { %5962 = vmatmul.mubr.msk.f32.gmra.mrb[10].mxu1 %vm1530_vm0, %v7990_v23 }
 0x402   : > { %6172 = vmatpush3.bf16.msra.mxu1 %v7961_v50  ;;  %5964 = vmatprep.mubr.msk.f32.mxu1 %vm1530_vm0, %v7999_v26  ;;  %v2305_v50 = vld [vmem:[#allocation3 + $0x4] sm:$0x1] }
 0x403   : > { %v5239_v24 = vld [vmem:[%s9666_s8 + $0x80] sm:$0xff]  ;;  %v5240_v42 = vld [vmem:[%s9666_s8 + $0x88] sm:$0xff]  ;;  %6174 = vmatprep.subr.bf16.mxu1 %v6173_v13  ;;  %v1879_v48 = vld [vmem:[%s9666_s8 + $0x10] sm:$0xff] }
 0x404   : > { %v2287_v15 = vld [vmem:[%s2286_s0] sm:$0x1]  ;;  %vm2664_vm1 = vcmp.gt.f32.partialorder %v5239_v24, 0.0  ;;  %v1878_v44 = vld [vmem:[%s9666_s8 + $0x8] sm:$0xff]  ;;  %vm2665_vm2 = vcmp.gt.f32.partialorder %v5240_v42, 0.0  ;;  %v1880_v49 = vld [vmem:[%s9666_s8 + $0x18] sm:$0xff] }
 0x405   : > { %v2291_v16 = vld [vmem:[%s2290_s14] sm:$0x1]  ;;  %v2288_v17 = vmin.f32 %v2287_v15, %v2285_v14  ;;  %v2696_v31 = vsel %vm2664_vm1, 1, %v7171_v27  ;;  %v2697_v45 = vsel %vm2665_vm2, 1, %v7171_v27  ;;  %5965 = vmatmul.mubr.msk.f32.gmra.mrb[12].mxu1 %vm1530_vm0, %v8019_v39  ;;  %v5241_v51 = vld [vmem:[%s9666_s8 + $0x90] sm:$0xff]  ;;  %v5242_v54 = vld [vmem:[%s9666_s8 + $0x98] sm:$0xff] }
 0x406   : > { %v2292_v18 = vmax.f32 %v2291_v16, %v2285_v14  ;;  %v1877_v28 = vld [vmem:[%s9666_s8] sm:$0xff]  ;;  %2713 = vperm.xlu1 %6411, %v2696_v31   ;;  %6176 = vmatpush3.bf16.msra.mxu1 %v6173_v13  ;;  %vm2666_vm3 = vcmp.gt.f32.partialorder %v5241_v51, 0.0  ;;  %vm2667_vm4 = vcmp.gt.f32.partialorder %v5242_v54, 0.0  ;;  %v1882_v0 = vld [vmem:[%s9666_s8 + $0x28] sm:$0xff]  ;;  %v1883_v13 = vld [vmem:[%s9666_s8 + $0x30] sm:$0xff] }
 0x407   : > { %2289 = vst [vmem:[%s2286_s0] sm:$0x1] %v2288_v17  ;;  %1946 = vperm.xlu0 %6410, %v1877_v28   ;;  %5967 = vmatprep.mubr.msk.f32.mxu1 %vm1530_vm0, %v8027_v43  ;;  %v2698_v57 = vsel %vm2666_vm3, 1, %v7171_v27  ;;  %v2699_v60 = vsel %vm2667_vm4, 1, %v7171_v27  ;;  %v1881_v63 = vld [vmem:[%s9666_s8 + $0x20] sm:$0xff]  ;;  %v5244_v3 = vld [vmem:[%s9666_s8 + $0xa8] sm:$0xff]  ;;  %v1884_v14 = vld [vmem:[%s9666_s8 + $0x38] sm:$0xff] }
 0x408   : > { %2293 = vst [vmem:[%s2290_s14] sm:$0x1] %v2292_v18  ;;  %6178 = vmatprep.subr.bf16.mxu1 %v7967_v12  ;;  %s8059_s14 = sld [smem:[#allocation7 + $0x5]]  ;;  %v5243_v1 = vld [vmem:[%s9666_s8 + $0xa0] sm:$0xff]  ;;  %vm2669_vm6 = vcmp.gt.f32.partialorder %v5244_v3, 0.0  ;;  %v5245_v15 = vld [vmem:[%s9666_s8 + $0xb0] sm:$0xff]  ;;  %v5246_v16 = vld [vmem:[%s9666_s8 + $0xb8] sm:$0xff] }
 0x409   : > { %5968 = vmatmul.mubr.msk.f32.gmra.mrb[14].mxu1 %vm1530_vm0, %v8040_v46  ;;  %vm2668_vm5 = vcmp.gt.f32.partialorder %v5243_v1, 0.0  ;;  %v2701_v6 = vsel %vm2669_vm6, 1, %v7171_v27  ;;  %vm2670_vm7 = vcmp.gt.f32.partialorder %v5245_v15, 0.0  ;;  %vm2671_vm8 = vcmp.gt.f32.partialorder %v5246_v16, 0.0  ;;  %v2325_v24 = vld [vmem:[#allocation3 + $0x6] sm:$0x1] }
 0x40a   : > { %2716 = vperm.xlu1 %6411, %v2697_v45   ;;  %6180 = vmatpush3.bf16.msra.mxu1 %v7967_v12  ;;  %v2700_v5 = vsel %vm2668_vm5, 1, %v7171_v27  ;;  %v8134_v12 = vld [vmem:[%s9665_s11 + $0x78] sm:$0xff]  ;;  %v2702_v17 = vsel %vm2670_vm7, 1, %v7171_v27  ;;  %v2703_v18 = vsel %vm2671_vm8, 1, %v7171_v27  ;;  %v1885_v31 = vld [vmem:[%s9666_s8 + $0x40] sm:$0xff]  ;;  %v1890_v51 = vld [vmem:[%s9666_s8 + $0x68] sm:$0xff] }
 0x40b   : > { %1951 = vperm.xlu0 %6410, %v1878_v44   ;;  %5970 = vmatprep.mubr.msk.f32.mxu1 %vm1530_vm0, %v8046_v47  ;;  %v1888_v42 = vld [vmem:[%s9666_s8 + $0x58] sm:$0xff]  ;;  %v2345_v54 = vld [vmem:[#allocation3 + $0x8] sm:$0x1]  ;;  %v2355_v3 = vld [vmem:[#allocation3 + $0x9] sm:$0x1]  ;;  %s8268_s0 = sld [smem:[#allocation7 + $0xb]] }
 0x40d   : > { %5971 = vmatmul.mubr.msk.f32.gmra.mrb[16].mxu1 %vm1530_vm0, %v8067_v52 }
 0x40e   : > { %v2297_v34 = vld [vmem:[%s2296_s28] sm:$0x1]  ;;  %1961 = vperm.xlu1 %6411, %v1880_v49   ;;  %5973 = vmatprep.mubr.msk.f32.mxu1 %vm1530_vm0, %v8072_v53  ;;  %s2320_s27 = scalar_lea.vmem [#allocation5], %s8059_s14  ;;  %v5250_v49 = vld [vmem:[%s9666_s8 + $0xd8] sm:$0xff] }
 0x40f   : > { %v2301_v36 = vld [vmem:[%s2300_s16] sm:$0x1]  ;;  %v2298_v37 = vmin.f32 %v2297_v34, %v2295_v33  ;;  %1956 = vperm.xlu0 %6410, %v1879_v48   ;;  %vm2675_vm12 = vcmp.gt.f32.partialorder %v5250_v49, 0.0 }
 0x410   : > { %v2302_v38 = vmax.f32 %v2301_v36, %v2295_v33  ;;  %v5248_v36 = vld [vmem:[%s9666_s8 + $0xc8] sm:$0xff]  ;;  %v5271_v49 = vld [vmem:[%s9666_s8 + $0x180] sm:$0xff] }
 0x411   : > { %2299 = vst [vmem:[%s2296_s28] sm:$0x1] %v2298_v37  ;;  %5974 = vmatmul.mubr.msk.f32.gmra.mrb[18].mxu1 %vm1530_vm0, %v8088_v61  ;;  %s8122_s28 = sld [smem:[#allocation7 + $0x6]]  ;;  %vm2673_vm10 = vcmp.gt.f32.partialorder %v5248_v36, 0.0  ;;  %v5265_v36 = vld [vmem:[%s9666_s8 + $0x150] sm:$0xff] }
 0x412   : > { %2303 = vst [vmem:[%s2300_s16] sm:$0x1] %v2302_v38  ;;  %2722 = vperm.xlu1 %6411, %v2699_v60   ;;  %5976 = vmatprep.mubr.msk.f32.mxu1 %vm1530_vm0, %v8093_v62  ;;  %s2316_s16 = scalar_lea.vmem [#allocation4], %s8059_s14  ;;  %v2335_v38 = vld [vmem:[#allocation3 + $0x7] sm:$0x1] }
 0x413   : > { %2719 = vperm.xlu0 %6410, %v2698_v57  }
 0x415   : > { %5977 = vmatmul.mubr.msk.f32.gmra.mrb[20].mxu1 %vm1530_vm0, %v8111_v2 }
 0x416   : > { %1971 = vperm.xlu1 %6411, %v1882_v0   ;;  %5979 = vmatprep.mubr.msk.f32.mxu1 %vm1530_vm0, %v8119_v4  ;;  %v5254_v0 = vld [vmem:[%s9666_s8 + $0xf8] sm:$0xff] }
 0x417   : > { %1966 = vperm.xlu0 %6410, %v1881_v63   ;;  %s2326_s15 = scalar_lea.vmem [#allocation4], %s8122_s28  ;;  %v5253_v63 = vld [vmem:[%s9666_s8 + $0xf0] sm:$0xff]  ;;  %vm2679_vm1 = vcmp.gt.f32.partialorder %v5254_v0, 0.0 }
 0x418   : > { %v2307_v55 = vld [vmem:[%s2306_s1] sm:$0x1]  ;;  %vm2678_vm15 = vcmp.gt.f32.partialorder %v5253_v63, 0.0 }
 0x419   : > { %v2311_v56 = vld [vmem:[%s2310_s6] sm:$0x1]  ;;  %v2308_v58 = vmin.f32 %v2307_v55, %v2305_v50  ;;  %5980 = vmatmul.mubr.msk.f32.gmra.mrb[22].mxu1 %vm1530_vm0, %v8134_v12  ;;  %v2710_v1 = vsel %vm2678_vm15, 1, %v7171_v27 }
 0x41a   : > { %v2312_v59 = vmax.f32 %v2311_v56, %v2305_v50  ;;  %2728 = vperm.xlu1 %6411, %v2701_v6   ;;  %5998 = vmatprep.mubr.msk.f32.mxu1 %vm1530_vm0, %v7953_v30  ;;  %v5279_v63 = vld [vmem:[%s9666_s8 + $0x1c0] sm:$0xff] }
 0x41b   : > { %2309 = vst [vmem:[%s2306_s1] sm:$0x1] %v2308_v58  ;;  %2725 = vperm.xlu0 %6410, %v2700_v5   ;;  %s2330_s1 = scalar_lea.vmem [#allocation5], %s8122_s28 }
 0x41c   : > { %2313 = vst [vmem:[%s2310_s6] sm:$0x1] %v2312_v59 }
 0x41d   : > { %5999 = vmatmul.mubr.msk.f32.vlgmr.msra.gmra.mrb[24].mxu1 %vm1530_vm0, %v7976_v20  ;;  %v1886_v20 = vld [vmem:[%s9666_s8 + $0x48] sm:$0xff] }
 0x41e   : > { %1981 = vperm.xlu1 %6411, %v1884_v14   ;;  %6001 = vmatprep.mubr.msk.f32.mxu1 %vm1530_vm0, %v7981_v22  ;;  %v5247_v22 = vld [vmem:[%s9666_s8 + $0xc0] sm:$0xff] }
 0x41f   : > { %1976 = vperm.xlu0 %6410, %v1883_v13   ;;  %vm2672_vm9 = vcmp.gt.f32.partialorder %v5247_v22, 0.0  ;;  %v5259_v14 = vld [vmem:[%s9666_s8 + $0x120] sm:$0xff] }
 0x420   : > { %v2704_v37 = vsel %vm2672_vm9, 1, %v7171_v27 }
 0x421   : > { %6002 = vmatmul.mubr.msk.f32.gmra.mrb[26].mxu1 %vm1530_vm0, %v7990_v23  ;;  %v2705_v23 = vsel %vm2673_vm10, 1, %v7171_v27 }
 0x422   : > { %v2317_v8 = vld [vmem:[%s2316_s16] sm:$0x1]  ;;  %2734 = vperm.xlu1 %6411, %v2703_v18   ;;  %6004 = vmatprep.mubr.msk.f32.mxu1 %vm1530_vm0, %v7999_v26  ;;  %v1887_v26 = vld [vmem:[%s9666_s8 + $0x50] sm:$0xff] }
 0x423   : > { %v2321_v9 = vld [vmem:[%s2320_s27] sm:$0x1]  ;;  %v2318_v10 = vmin.f32 %v2317_v8, %v2315_v7  ;;  %2731 = vperm.xlu0 %6410, %v2702_v17   ;;  %v5260_v17 = vld [vmem:[%s9666_s8 + $0x128] sm:$0xff]  ;;  %v5261_v18 = vld [vmem:[%s9666_s8 + $0x130] sm:$0xff] }
 0x424   : > { %v2322_v11 = vmax.f32 %v2321_v9, %v2315_v7  ;;  %v5255_v8 = vld [vmem:[%s9666_s8 + $0x100] sm:$0xff]  ;;  %v5257_v9 = vld [vmem:[%s9666_s8 + $0x110] sm:$0xff] }
 0x425   : > { %2319 = vst [vmem:[%s2316_s16] sm:$0x1] %v2318_v10  ;;  %6005 = vmatmul.mubr.msk.f32.gmra.mrb[28].mxu1 %vm1530_vm0, %v8019_v39  ;;  %v5258_v10 = vld [vmem:[%s9666_s8 + $0x118] sm:$0xff] }
 0x426   : > { %2323 = vst [vmem:[%s2320_s27] sm:$0x1] %v2322_v11  ;;  %s8156_s27 = sld [smem:[#allocation7 + $0x7]]  ;;  %1991 = vperm.xlu1 %6411, %v1886_v20   ;;  %6007 = vmatprep.mubr.msk.f32.mxu1 %vm1530_vm0, %v8027_v43  ;;  %v5249_v43 = vld [vmem:[%s9666_s8 + $0xd0] sm:$0xff]  ;;  %v2365_v11 = vld [vmem:[#allocation3 + $0xa] sm:$0x1] }
 0x427   : > { %1986 = vperm.xlu0 %6410, %v1885_v31   ;;  %vm2674_vm11 = vcmp.gt.f32.partialorder %v5249_v43, 0.0  ;;  %v2375_v31 = vld [vmem:[#allocation3 + $0xb] sm:$0x1] }
 0x428   : > { %v2706_v50 = vsel %vm2674_vm11, 1, %v7171_v27 }
 0x429   : > { %6008 = vmatmul.mubr.msk.f32.gmra.mrb[30].mxu1 %vm1530_vm0, %v8040_v46  ;;  %v2707_v46 = vsel %vm2675_vm12, 1, %v7171_v27 }
 0x42a   : > { %2740 = vperm.xlu1 %6411, %v2705_v23   ;;  %6010 = vmatprep.mubr.msk.f32.mxu1 %vm1530_vm0, %v8046_v47  ;;  %v1889_v47 = vld [vmem:[%s9666_s8 + $0x60] sm:$0xff] }
 0x42b   : > { %2737 = vperm.xlu0 %6410, %v2704_v37   ;;  %v5266_v37 = vld [vmem:[%s9666_s8 + $0x158] sm:$0xff]  ;;  %v5267_v23 = vld [vmem:[%s9666_s8 + $0x160] sm:$0xff] }
 0x42c   : > { %v2327_v30 = vld [vmem:[%s2326_s15] sm:$0x1]  ;;  %s2336_s14 = scalar_lea.vmem [#allocation4], %s8156_s27  ;;  %s2340_s23 = scalar_lea.vmem [#allocation5], %s8156_s27 }
 0x42d   : > { %v2331_v28 = vld [vmem:[%s2330_s1] sm:$0x1]  ;;  %v2328_v33 = vmin.f32 %v2327_v30, %v2325_v24  ;;  %6011 = vmatmul.mubr.msk.f32.gmra.mrb[32].mxu1 %vm1530_vm0, %v8067_v52  ;;  %s8287_s27 = sld [smem:[#allocation7 + $0xc]] }
 0x42e   : > { %v2332_v34 = vmax.f32 %v2331_v28, %v2325_v24  ;;  %2001 = vperm.xlu1 %6411, %v1888_v42   ;;  %6013 = vmatprep.mubr.msk.f32.mxu1 %vm1530_vm0, %v8072_v53  ;;  %v5251_v52 = vld [vmem:[%s9666_s8 + $0xe0] sm:$0xff]  ;;  %v5252_v53 = vld [vmem:[%s9666_s8 + $0xe8] sm:$0xff]  ;;  %v5262_v24 = vld [vmem:[%s9666_s8 + $0x138] sm:$0xff] }
 0x42f   : > { %2329 = vst [vmem:[%s2326_s15] sm:$0x1] %v2328_v33  ;;  %1996 = vperm.xlu0 %6410, %v1887_v26   ;;  %vm2676_vm13 = vcmp.gt.f32.partialorder %v5251_v52, 0.0  ;;  %vm2677_vm14 = vcmp.gt.f32.partialorder %v5252_v53, 0.0  ;;  %v5263_v30 = vld [vmem:[%s9666_s8 + $0x140] sm:$0xff]  ;;  %v5264_v28 = vld [vmem:[%s9666_s8 + $0x148] sm:$0xff]  ;;  %s2380_s15 = scalar_lea.vmem [#allocation5], %s8268_s0 }
 0x430   : > { %2333 = vst [vmem:[%s2330_s1] sm:$0x1] %v2332_v34  ;;  %s8187_s1 = sld [smem:[#allocation7 + $0x8]]  ;;  %v2708_v57 = vsel %vm2676_vm13, 1, %v7171_v27  ;;  %v2709_v60 = vsel %vm2677_vm14, 1, %v7171_v27  ;;  %v5268_v26 = vld [vmem:[%s9666_s8 + $0x168] sm:$0xff] }
 0x431   : > { %6014 = vmatmul.mubr.msk.f32.gmra.mrb[34].mxu1 %vm1530_vm0, %v8088_v61  ;;  %v1891_v61 = vld [vmem:[%s9666_s8 + $0x70] sm:$0xff] }
 0x432   : > { %2746 = vperm.xlu1 %6411, %v2707_v46   ;;  %6016 = vmatprep.mubr.msk.f32.mxu1 %vm1530_vm0, %v8093_v62  ;;  %v1892_v62 = vld [vmem:[%s9666_s8 + $0x78] sm:$0xff]  ;;  %v5273_v46 = vld [vmem:[%s9666_s8 + $0x190] sm:$0xff] }
 0x433   : > { %2743 = vperm.xlu0 %6410, %v2706_v50   ;;  %v5272_v50 = vld [vmem:[%s9666_s8 + $0x188] sm:$0xff] }
 0x435   : > { %6017 = vmatmul.mubr.msk.f32.gmra.mrb[36].mxu1 %vm1530_vm0, %v8111_v2  ;;  %v2711_v2 = vsel %vm2679_vm1, 1, %v7171_v27  ;;  %v5256_v27 = vld [vmem:[%s9666_s8 + $0x108] sm:$0xff] }
 0x436   : > { %v2337_v44 = vld [vmem:[%s2336_s14] sm:$0x1]  ;;  %2011 = vperm.xlu1 %6411, %v1890_v51   ;;  %s2346_s28 = scalar_lea.vmem [#allocation4], %s8187_s1  ;;  %s2350_s2 = scalar_lea.vmem [#allocation5], %s8187_s1  ;;  %6019 = vmatprep.mubr.msk.f32.mxu1 %vm1530_vm0, %v8119_v4  ;;  %v2395_v51 = vld [vmem:[#allocation3 + $0xd] sm:$0x1] }
 0x437   : > { %v2341_v39 = vld [vmem:[%s2340_s23] sm:$0x1]  ;;  %v2338_v45 = vmin.f32 %v2337_v44, %v2335_v38  ;;  %2006 = vperm.xlu0 %6410, %v1889_v47   ;;  %v5274_v47 = vld [vmem:[%s9666_s8 + $0x198] sm:$0xff] }
 0x438   : > { %v2342_v48 = vmax.f32 %v2341_v39, %v2335_v38  ;;  %v2385_v38 = vld [vmem:[#allocation3 + $0xc] sm:$0x1]  ;;  %v5269_v39 = vld [vmem:[%s9666_s8 + $0x170] sm:$0xff] }
 0x439   : > { %2339 = vst [vmem:[%s2336_s14] sm:$0x1] %v2338_v45  ;;  %6020 = vmatmul.mubr.msk.f32.gmra.mrb[38].mxu1 %vm1530_vm0, %v8134_v12 }
 0x43a   : > { %2343 = vst [vmem:[%s2340_s23] sm:$0x1] %v2342_v48  ;;  %s8221_s23 = sld [smem:[#allocation7 + $0x9]]  ;;  %2752 = vperm.xlu1 %6411, %v2709_v60   ;;  %v5270_v48 = vld [vmem:[%s9666_s8 + $0x178] sm:$0xff]  ;;  %v2405_v60 = vld [vmem:[#allocation3 + $0xe] sm:$0x1] }
 0x43b   : > { %2749 = vperm.xlu0 %6410, %v2708_v57   ;;  %v5276_v57 = vld [vmem:[%s9666_s8 + $0x1a8] sm:$0xff] }
 0x43e   : > { %2021 = vperm.xlu1 %6411, %v1892_v62  }
 0x43f   : > { %2016 = vperm.xlu0 %6410, %v1891_v61  }
 0x440   : > { %v2347_v55 = vld [vmem:[%s2346_s28] sm:$0x1] }
 0x441   : > { %v2351_v56 = vld [vmem:[%s2350_s2] sm:$0x1]  ;;  %v2348_v58 = vmin.f32 %v2347_v55, %v2345_v54 }
 0x442   : > { %v2352_v59 = vmax.f32 %v2351_v56, %v2345_v54  ;;  %2758 = vperm.xlu1 %6411, %v2711_v2   ;;  %v5275_v56 = vld [vmem:[%s9666_s8 + $0x1a0] sm:$0xff]  ;;  %v5280_v2 = vld [vmem:[%s9666_s8 + $0x1c8] sm:$0xff] }
 0x443   : > { %2349 = vst [vmem:[%s2346_s28] sm:$0x1] %v2348_v58  ;;  %2755 = vperm.xlu0 %6410, %v2710_v1   ;;  %s2356_s28 = scalar_lea.vmem [#allocation4], %s8221_s23  ;;  %v5277_v58 = vld [vmem:[%s9666_s8 + $0x1b0] sm:$0xff] }
 0x444   : > { %2353 = vst [vmem:[%s2350_s2] sm:$0x1] %v2352_v59  ;;  %s2360_s2 = scalar_lea.vmem [#allocation5], %s8221_s23  ;;  %s8325_s23 = sld [smem:[#allocation7 + $0xe]]  ;;  %v5278_v59 = vld [vmem:[%s9666_s8 + $0x1b8] sm:$0xff] }
 0x446   : > { %4084 = vperm.xlu1 %6411, %v5256_v27  }
 0x447   : > { %4079 = vperm.xlu0 %6410, %v5255_v8  }
 0x44a   : > { %v2357_v4 = vld [vmem:[%s2356_s28] sm:$0x1]  ;;  %4094 = vperm.xlu1 %6411, %v5258_v10  }
 0x44b   : > { %v2361_v5 = vld [vmem:[%s2360_s2] sm:$0x1]  ;;  %v2358_v6 = vmin.f32 %v2357_v4, %v2355_v3  ;;  %4089 = vperm.xlu0 %6410, %v5257_v9   ;;  %v5282_v4 = vld [vmem:[%s9666_s8 + $0x1d8] sm:$0xff] }
 0x44c   : > { %v2362_v7 = vmax.f32 %v2361_v5, %v2355_v3  ;;  %v5281_v3 = vld [vmem:[%s9666_s8 + $0x1d0] sm:$0xff]  ;;  %v5283_v5 = vld [vmem:[%s9666_s8 + $0x1e0] sm:$0xff] }
 0x44d   : > { %2359 = vst [vmem:[%s2356_s28] sm:$0x1] %v2358_v6  ;;  %s2366_s28 = scalar_lea.vmem [#allocation4], %s8251_s25  ;;  %v5284_v6 = vld [vmem:[%s9666_s8 + $0x1e8] sm:$0xff] }
 0x44e   : > { %2363 = vst [vmem:[%s2360_s2] sm:$0x1] %v2362_v7  ;;  %s2370_s2 = scalar_lea.vmem [#allocation5], %s8251_s25  ;;  %4104 = vperm.xlu1 %6411, %v5260_v17   ;;  %v2415_v7 = vld [vmem:[#allocation3 + $0xf] sm:$0x1]  ;;  %s5303_s25 = sld [smem:[#allocation7 + $0x11]] }
 0x44f   : > { %4099 = vperm.xlu0 %6410, %v5259_v14  }
 0x452   : > { %4114 = vperm.xlu1 %6411, %v5262_v24  }
 0x453   : > { %4109 = vperm.xlu0 %6410, %v5261_v18   ;;  %v2435_v18 = vld [vmem:[#allocation3 + $0x11] sm:$0x1] }
 0x454   : > { %v2367_v12 = vld [vmem:[%s2366_s28] sm:$0x1]  ;;  %s2436_s1 = scalar_lea.vmem [#allocation4], %s5303_s25 }
 0x455   : > { %v2371_v13 = vld [vmem:[%s2370_s2] sm:$0x1]  ;;  %v2368_v15 = vmin.f32 %v2367_v12, %v2365_v11  ;;  %v5286_v12 = vld [vmem:[%s9666_s8 + $0x1f8] sm:$0xff] }
 0x456   : > { %v2372_v16 = vmax.f32 %v2371_v13, %v2365_v11  ;;  %4124 = vperm.xlu1 %6411, %v5264_v28   ;;  %v5285_v11 = vld [vmem:[%s9666_s8 + $0x1f0] sm:$0xff] }
 0x457   : > { %2369 = vst [vmem:[%s2366_s28] sm:$0x1] %v2368_v15  ;;  %4119 = vperm.xlu0 %6410, %v5263_v30   ;;  %s8306_s28 = sld [smem:[#allocation7 + $0xd]]  ;;  %v2425_v13 = vld [vmem:[#allocation3 + $0x10] sm:$0x1] }
 0x458   : > { %2373 = vst [vmem:[%s2370_s2] sm:$0x1] %v2372_v16  ;;  %s2376_s2 = scalar_lea.vmem [#allocation4], %s8268_s0  ;;  %s5302_s0 = sld [smem:[#allocation7 + $0x10]] }
 0x45a   : > { %4134 = vperm.xlu1 %6411, %v5266_v37   ;;  %v2455_v37 = vld [vmem:[#allocation3 + $0x13] sm:$0x1] }
 0x45b   : > { %4129 = vperm.xlu0 %6410, %v5265_v36  }
 0x45d   : > { %s2400_s5 = scalar_lea.vmem [#allocation5], %s8306_s28 }
 0x45e   : > { %v2377_v33 = vld [vmem:[%s2376_s2] sm:$0x1]  ;;  %4144 = vperm.xlu1 %6411, %v5268_v26   ;;  %s2426_s14 = scalar_lea.vmem [#allocation4], %s5302_s0 }
 0x45f   : > { %v2381_v34 = vld [vmem:[%s2380_s15] sm:$0x1]  ;;  %v2378_v20 = vmin.f32 %v2377_v33, %v2375_v31  ;;  %4139 = vperm.xlu0 %6410, %v5267_v23   ;;  %v2445_v33 = vld [vmem:[#allocation3 + $0x12] sm:$0x1] }
 0x460   : > { %v2382_v22 = vmax.f32 %v2381_v34, %v2375_v31 }
 0x461   : > { %2379 = vst [vmem:[%s2376_s2] sm:$0x1] %v2378_v20  ;;  %s2386_s2 = scalar_lea.vmem [#allocation4], %s8287_s27 }
 0x462   : > { %2383 = vst [vmem:[%s2380_s15] sm:$0x1] %v2382_v22  ;;  %s2390_s15 = scalar_lea.vmem [#allocation5], %s8287_s27  ;;  %4154 = vperm.xlu1 %6411, %v5270_v48   ;;  %s5304_s27 = sld [smem:[#allocation7 + $0x12]]  ;;  %v2465_v48 = vld [vmem:[#allocation3 + $0x14] sm:$0x1] }
 0x463   : > { %4149 = vperm.xlu0 %6410, %v5269_v39  }
 0x466   : > { %4196 = vperm.xlu1 %6411, %v5272_v50  }
 0x467   : > { %4191 = vperm.xlu0 %6410, %v5271_v49  }
 0x468   : > { %v2387_v42 = vld [vmem:[%s2386_s2] sm:$0x1]  ;;  %s2446_s16 = scalar_lea.vmem [#allocation4], %s5304_s27 }
 0x469   : > { %v2391_v44 = vld [vmem:[%s2390_s15] sm:$0x1]  ;;  %v2388_v43 = vmin.f32 %v2387_v42, %v2385_v38 }
 0x46a   : > { %v2392_v45 = vmax.f32 %v2391_v44, %v2385_v38  ;;  %4206 = vperm.xlu1 %6411, %v5274_v47  }
 0x46b   : > { %2389 = vst [vmem:[%s2386_s2] sm:$0x1] %v2388_v43  ;;  %4201 = vperm.xlu0 %6410, %v5273_v46   ;;  %s8344_s2 = sld [smem:[#allocation7 + $0xf]] }
 0x46c   : > { %2393 = vst [vmem:[%s2390_s15] sm:$0x1] %v2392_v45  ;;  %s2396_s15 = scalar_lea.vmem [#allocation4], %s8306_s28  ;;  %s5306_s28 = sld [smem:[#allocation7 + $0x14]] }
 0x46e   : > { %4216 = vperm.xlu1 %6411, %v5276_v57  }
 0x46f   : > { %4211 = vperm.xlu0 %6410, %v5275_v56  }
 0x472   : > { %v2397_v52 = vld [vmem:[%s2396_s15] sm:$0x1]  ;;  %4226 = vperm.xlu1 %6411, %v5278_v59  }
 0x473   : > { %v2401_v54 = vld [vmem:[%s2400_s5] sm:$0x1]  ;;  %v2398_v53 = vmin.f32 %v2397_v52, %v2395_v51  ;;  %4221 = vperm.xlu0 %6410, %v5277_v58  }
 0x474   : > { %v2402_v55 = vmax.f32 %v2401_v54, %v2395_v51  ;;  %v2475_v54 = vld [vmem:[#allocation3 + $0x15] sm:$0x1] }
 0x475   : > { %2399 = vst [vmem:[%s2396_s15] sm:$0x1] %v2398_v53  ;;  %s2406_s15 = scalar_lea.vmem [#allocation4], %s8325_s23 }
 0x476   : > { %2403 = vst [vmem:[%s2400_s5] sm:$0x1] %v2402_v55  ;;  %s2410_s5 = scalar_lea.vmem [#allocation5], %s8325_s23  ;;  %4236 = vperm.xlu1 %6411, %v5280_v2  }
 0x477   : > { %4231 = vperm.xlu0 %6410, %v5279_v63  }
 0x47a   : > { %4246 = vperm.xlu1 %6411, %v5282_v4  }
 0x47b   : > { %4241 = vperm.xlu0 %6410, %v5281_v3  }
 0x47c   : > { %v2407_v61 = vld [vmem:[%s2406_s15] sm:$0x1] }
 0x47d   : > { %v2411_v62 = vld [vmem:[%s2410_s5] sm:$0x1]  ;;  %v2408_v0 = vmin.f32 %v2407_v61, %v2405_v60 }
 0x47e   : > { %v2412_v1 = vmax.f32 %v2411_v62, %v2405_v60  ;;  %4256 = vperm.xlu1 %6411, %v5284_v6   ;;  %v2485_v62 = vld [vmem:[#allocation3 + $0x16] sm:$0x1]  ;;  %v6436_v6 = vld [vmem:[%s7783_s13] ss:$12 sps:$4 sm:$0xff]  }
 0x47f   : > { %2409 = vst [vmem:[%s2406_s15] sm:$0x1] %v2408_v0  ;;  %4251 = vperm.xlu0 %6410, %v5283_v5   ;;  %s2416_s15 = scalar_lea.vmem [#allocation4], %s8344_s2  ;;  %v6438_v5 = vld [vmem:[%s7783_s13 + $0x4] ss:$12 sps:$4 sm:$0xff]  }
 0x480   : > { %2413 = vst [vmem:[%s2410_s5] sm:$0x1] %v2412_v1  ;;  %s2420_s5 = scalar_lea.vmem [#allocation5], %s8344_s2  ;;  %s2430_s2 = scalar_lea.vmem [#allocation5], %s5302_s0  ;;  %3496 = vmatprep.subr.bf16.mxu1 %v6438_v5 }
 0x481   : > { %s2450_s0 = scalar_lea.vmem [#allocation5], %s5304_s27  ;;  %s5308_s27 = sld [smem:[#allocation7 + $0x16]]  ;;  %3497 = vmatpush1.bf16.msra.mxu1 %v6436_v6  ;;  %v6459_v6 = vld [vmem:[%s7783_s13 + $0xac] ss:$12 sps:$4 sm:$0xff]  }
 0x482   : > { %4266 = vperm.xlu1 %6411, %v5286_v12  }
 0x483   : > { %4261 = vperm.xlu0 %6410, %v5285_v11  }
 0x485   : > { %v8374_v44 = vpop.permute.xlu1 %2713 }
 0x486   : > { %v2417_v8 = vld [vmem:[%s2416_s15] sm:$0x1]  ;;  %v8376_v39 = vpop.permute.xlu0 %1946 }
 0x487   : > { %v2421_v27 = vld [vmem:[%s2420_s5] sm:$0x1]  ;;  %v2418_v9 = vmin.f32 %v2417_v8, %v2415_v7 }
 0x488   : > { %v2422_v10 = vmax.f32 %v2421_v27, %v2415_v7  ;;  %v6441_v7 = vld [vmem:[%s7783_s13 + $0x1c] ss:$12 sps:$4 sm:$0xff]   ;;  %v6439_v27 = vld [vmem:[%s7783_s13 + $0x18] ss:$12 sps:$4 sm:$0xff]  }
 0x489   : > { %2419 = vst [vmem:[%s2416_s15] sm:$0x1] %v2418_v9  ;;  %s2440_s15 = scalar_lea.vmem [#allocation5], %s5303_s25  ;;  %v8378_v43 = vpop.permute.xlu1 %2716  ;;  %s5307_s25 = sld [smem:[#allocation7 + $0x15]]  ;;  %3498 = vmatprep.subr.bf16.mxu1 %v6441_v7 }
 0x48a   : > { %2423 = vst [vmem:[%s2420_s5] sm:$0x1] %v2422_v10  ;;  %s5305_s5 = sld [smem:[#allocation7 + $0x13]]  ;;  %v8380_v45 = vpop.permute.xlu0 %1951  ;;  %v2495_v10 = vld [vmem:[#allocation3 + $0x17] sm:$0x1]  ;;  %3499 = vmatpush1.bf16.msra.mxu1 %v6439_v27 }
 0x48b   : > { %v6457_v27 = vld [vmem:[%s7783_s13 + $0xa8] ss:$12 sps:$4 sm:$0xff]  }
 0x48d   : > { %v8382_v51 = vpop.permute.xlu1 %1961 }
 0x48e   : > { %v8384_v52 = vpop.permute.xlu0 %1956 }
 0x490   : > { %v2427_v14 = vld [vmem:[%s2426_s14] sm:$0x1]  ;;  %s2456_s23 = scalar_lea.vmem [#allocation4], %s5305_s5  ;;  %s2460_s6 = scalar_lea.vmem [#allocation5], %s5305_s5 }
 0x491   : > { %v2431_v15 = vld [vmem:[%s2430_s2] sm:$0x1]  ;;  %v2428_v16 = vmin.f32 %v2427_v14, %v2425_v13  ;;  %v8386_v56 = vpop.permute.xlu1 %2722  ;;  %s8394_s5 = sld [smem:[#allocation7 + $0x17]] }
 0x492   : > { %v2432_v17 = vmax.f32 %v2431_v15, %v2425_v13  ;;  %v8388_v59 = vpop.permute.xlu0 %2719  ;;  %v6444_v15 = vld [vmem:[%s7783_s13 + $0x34] ss:$12 sps:$4 sm:$0xff]  }
 0x493   : > { %2429 = vst [vmem:[%s2426_s14] sm:$0x1] %v2428_v16  ;;  %s2466_s14 = scalar_lea.vmem [#allocation4], %s5306_s28  ;;  %v6442_v16 = vld [vmem:[%s7783_s13 + $0x30] ss:$12 sps:$4 sm:$0xff]   ;;  %3500 = vmatprep.subr.bf16.mxu1 %v6444_v15 }
 0x494   : > { %2433 = vst [vmem:[%s2430_s2] sm:$0x1] %v2432_v17  ;;  %s2470_s2 = scalar_lea.vmem [#allocation5], %s5306_s28  ;;  %s8406_s28 = sld [smem:[#allocation7 + $0x18]]  ;;  %3501 = vmatpush1.bf16.msra.mxu1 %v6442_v16  ;;  %v6463_v15 = vld [vmem:[%s7783_s13 + $0xc4] ss:$12 sps:$4 sm:$0xff]  }
 0x495   : > { %v8390_v60 = vpop.permute.xlu1 %1971  ;;  %v6464_v16 = vld [vmem:[%s7783_s13 + $0x8] ss:$12 sps:$4 sm:$0xff]  }
 0x496   : > { %v8392_v61 = vpop.permute.xlu0 %1966 }
 0x499   : > { %v8396_v3 = vpop.permute.xlu1 %2728 }
 0x49a   : > { %v2437_v24 = vld [vmem:[%s2436_s1] sm:$0x1]  ;;  %v8398_v4 = vpop.permute.xlu0 %2725 }
 0x49b   : > { %v2441_v30 = vld [vmem:[%s2440_s15] sm:$0x1]  ;;  %v2438_v28 = vmin.f32 %v2437_v24, %v2435_v18  ;;  %v6447_v24 = vld [vmem:[%s7783_s13 + $0x4c] ss:$12 sps:$4 sm:$0xff]  }
 0x49c   : > { %v2442_v31 = vmax.f32 %v2441_v30, %v2435_v18  ;;  %v6445_v30 = vld [vmem:[%s7783_s13 + $0x48] ss:$12 sps:$4 sm:$0xff]   ;;  %3502 = vmatprep.subr.bf16.mxu1 %v6447_v24 }
 0x49d   : > { %2439 = vst [vmem:[%s2436_s1] sm:$0x1] %v2438_v28  ;;  %s2476_s1 = scalar_lea.vmem [#allocation4], %s5307_s25  ;;  %v8403_v8 = vpop.permute.xlu1 %1981  ;;  %3503 = vmatpush1.bf16.msra.mxu1 %v6445_v30 }
 0x49e   : > { %2443 = vst [vmem:[%s2440_s15] sm:$0x1] %v2442_v31  ;;  %s2480_s15 = scalar_lea.vmem [#allocation5], %s5307_s25  ;;  %v8408_v9 = vpop.permute.xlu0 %1976  ;;  %s8424_s25 = sld [smem:[#allocation7 + $0x19]] }
 0x4a1   : > { %v8414_v17 = vpop.permute.xlu1 %2734 }
 0x4a2   : > { %v8416_v18 = vpop.permute.xlu0 %2731 }
 0x4a4   : > { %v2447_v34 = vld [vmem:[%s2446_s16] sm:$0x1] }
 0x4a5   : > { %v2451_v20 = vld [vmem:[%s2450_s0] sm:$0x1]  ;;  %v2448_v22 = vmin.f32 %v2447_v34, %v2445_v33  ;;  %v6450_v34 = vld [vmem:[%s7783_s13 + $0x64] ss:$12 sps:$4 sm:$0xff]  }
 0x4a6   : > { %v2452_v36 = vmax.f32 %v2451_v20, %v2445_v33  ;;  %v2505_v33 = vld [vmem:[#allocation3 + $0x18] sm:$0x1]  ;;  %3504 = vmatprep.subr.bf16.mxu1 %v6450_v34  ;;  %v2525_v34 = vld [vmem:[#allocation3 + $0x1a] sm:$0x1] }
 0x4a7   : > { %2449 = vst [vmem:[%s2446_s16] sm:$0x1] %v2448_v22  ;;  %s2486_s16 = scalar_lea.vmem [#allocation4], %s5308_s27 }
 0x4a8   : > { %2453 = vst [vmem:[%s2450_s0] sm:$0x1] %v2452_v36  ;;  %s2490_s0 = scalar_lea.vmem [#allocation5], %s5308_s27  ;;  %v8429_v36 = vpop.permute.xlu1 %1991  ;;  %s8450_s27 = sld [smem:[#allocation7 + $0x1a]] }
 0x4ae   : > { %v2457_v23 = vld [vmem:[%s2456_s23] sm:$0x1] }
 0x4af   : > { %v2461_v26 = vld [vmem:[%s2460_s6] sm:$0x1]  ;;  %v2458_v38 = vmin.f32 %v2457_v23, %v2455_v37 }
 0x4b0   : > { %v2462_v42 = vmax.f32 %v2461_v26, %v2455_v37  ;;  %v6448_v37 = vld [vmem:[%s7783_s13 + $0x60] ss:$12 sps:$4 sm:$0xff]  }
 0x4b1   : > { %2459 = vst [vmem:[%s2456_s23] sm:$0x1] %v2458_v38  ;;  %s2496_s23 = scalar_lea.vmem [#allocation4], %s8394_s5  ;;  %v8432_v38 = vpop.permute.xlu0 %1986  ;;  %3505 = vmatpush1.bf16.msra.mxu1 %v6448_v37  ;;  %v6468_v37 = vld [vmem:[%s7783_s13 + $0xdc] ss:$12 sps:$4 sm:$0xff]  }
 0x4b2   : > { %2463 = vst [vmem:[%s2460_s6] sm:$0x1] %v2462_v42  ;;  %s2500_s6 = scalar_lea.vmem [#allocation5], %s8394_s5  ;;  %s8474_s5 = sld [smem:[#allocation7 + $0x1b]] }
 0x4b8   : > { %v2467_v49 = vld [vmem:[%s2466_s14] sm:$0x1] }
 0x4b9   : > { %v2471_v50 = vld [vmem:[%s2470_s2] sm:$0x1]  ;;  %v2468_v46 = vmin.f32 %v2467_v49, %v2465_v48 }
 0x4ba   : > { %v2472_v47 = vmax.f32 %v2471_v50, %v2465_v48  ;;  %v6453_v49 = vld [vmem:[%s7783_s13 + $0x7c] ss:$12 sps:$4 sm:$0xff]   ;;  %v6451_v50 = vld [vmem:[%s7783_s13 + $0x78] ss:$12 sps:$4 sm:$0xff]  }
 0x4bb   : > { %2469 = vst [vmem:[%s2466_s14] sm:$0x1] %v2468_v46  ;;  %s2506_s14 = scalar_lea.vmem [#allocation4], %s8406_s28  ;;  %3506 = vmatprep.subr.bf16.mxu1 %v6453_v49  ;;  %v6466_v49 = vld [vmem:[%s7783_s13 + $0xd8] ss:$12 sps:$4 sm:$0xff]  }
 0x4bc   : > { %2473 = vst [vmem:[%s2470_s2] sm:$0x1] %v2472_v47  ;;  %s2510_s2 = scalar_lea.vmem [#allocation5], %s8406_s28  ;;  %v8442_v47 = vpop.permute.xlu1 %2740  ;;  %3507 = vmatpush1.bf16.msra.mxu1 %v6451_v50  ;;  %s8505_s28 = sld [smem:[#allocation7 + $0x1c]] }
 0x4bd   : > { %9667 = vst [vmem:[#allocation55_spill] sm:$0xff] %v8442_v47 }
 0x4c0   : > { %v8459_v7 = vpop.permute.xlu1 %2001 }
 0x4c2   : > { %v2477_v53 = vld [vmem:[%s2476_s1] sm:$0x1] }
 0x4c3   : > { %v2481_v55 = vld [vmem:[%s2480_s15] sm:$0x1]  ;;  %v2478_v57 = vmin.f32 %v2477_v53, %v2475_v54  ;;  %v8446_v53 = vpop.permute.xlu0 %2737 }
 0x4c4   : > { %v2482_v58 = vmax.f32 %v2481_v55, %v2475_v54  ;;  %v6456_v55 = vld [vmem:[%s7783_s13 + $0x94] ss:$12 sps:$4 sm:$0xff]   ;;  %v8476_v30 = vpop.permute.xlu1 %2746 }
 0x4c5   : > { %2479 = vst [vmem:[%s2476_s1] sm:$0x1] %v2478_v57  ;;  %v6454_v57 = vld [vmem:[%s7783_s13 + $0x90] ss:$12 sps:$4 sm:$0xff]   ;;  %3508 = vmatprep.subr.bf16.mxu1 %v6456_v55  ;;  %s2516_s1 = scalar_lea.vmem [#allocation4], %s8424_s25  ;;  %9668 = vst [vmem:[#allocation56_spill] sm:$0xff] %v8476_v30 }
 0x4c6   : > { %2483 = vst [vmem:[%s2480_s15] sm:$0x1] %v2482_v58  ;;  %v2515_v58 = vld [vmem:[#allocation3 + $0x19] sm:$0x1]  ;;  %s2520_s15 = scalar_lea.vmem [#allocation5], %s8424_s25  ;;  %3509 = vmatpush1.bf16.msra.mxu1 %v6454_v57  ;;  %s8572_s25 = sld [smem:[#allocation7 + $0x1d]] }
 0x4c7   : > { %3510 = vmatprep.subr.bf16.mxu1 %v6459_v6  ;;  %v6471_v6 = vld [vmem:[%s7783_s13 + $0xf0] ss:$12 sps:$4 sm:$0xff]   ;;  %v2545_v30 = vld [vmem:[#allocation3 + $0x1c] sm:$0x1] }
 0x4ca   : > { %3511 = vmatpush1.bf16.msra.mxu1 %v6457_v27  ;;  %v6474_v27 = vld [vmem:[%s7783_s13 + $0x38] ss:$12 sps:$4 sm:$0xff]  }
 0x4cb   : > { %3512 = vmatprep.subr.bf16.mxu1 %v6463_v15 }
 0x4cc   : > { %v2487_v63 = vld [vmem:[%s2486_s16] sm:$0x1] }
 0x4cd   : > { %v2491_v0 = vld [vmem:[%s2490_s0] sm:$0x1]  ;;  %v2488_v1 = vmin.f32 %v2487_v63, %v2485_v62 }
 0x4ce   : > { %v2492_v2 = vmax.f32 %v2491_v0, %v2485_v62 }
 0x4cf   : > { %2489 = vst [vmem:[%s2486_s16] sm:$0x1] %v2488_v1  ;;  %s2526_s16 = scalar_lea.vmem [#allocation4], %s8450_s27 }
 0x4d0   : > { %2493 = vst [vmem:[%s2490_s0] sm:$0x1] %v2492_v2  ;;  %v8420_v28 = vpop.f32.mrb[8].mxu1  ;;  %s2530_s0 = scalar_lea.vmem [#allocation5], %s8450_s27  ;;  %s8659_s27 = sld [smem:[#allocation7 + $0x1e]] }
 0x4d1   : > { %v8422_v31 = vpop.f32.mrb[9].mxu1 }
 0x4d4   : > { %v8434_v42 = vpop.f32.mrb[10].mxu1 }
 0x4d5   : > { %v8436_v48 = vpop.f32.mrb[11].mxu1 }
 0x4d6   : > { %v2497_v11 = vld [vmem:[%s2496_s23] sm:$0x1] }
 0x4d7   : > { %v2501_v12 = vld [vmem:[%s2500_s6] sm:$0x1]  ;;  %v2498_v13 = vmin.f32 %v2497_v11, %v2495_v10 }
 0x4d8   : > { %v2502_v14 = vmax.f32 %v2501_v12, %v2495_v10  ;;  %v8440_v46 = vpop.f32.mrb[12].mxu1  ;;  %v8462_v10 = vpop.permute.xlu0 %1996 }
 0x4d9   : > { %2499 = vst [vmem:[%s2496_s23] sm:$0x1] %v2498_v13  ;;  %v8444_v54 = vpop.f32.mrb[13].mxu1  ;;  %v6460_v13 = vld [vmem:[%s7783_s13 + $0xc8] ss:$12 sps:$4 sm:$0xff]   ;;  %s2536_s23 = scalar_lea.vmem [#allocation4], %s8474_s5 }
 0x4da   : > { %2503 = vst [vmem:[%s2500_s6] sm:$0x1] %v2502_v14  ;;  %v6461_v14 = vld [vmem:[%s7783_s13 + $0xc0] ss:$12 sps:$4 sm:$0xff]   ;;  %5658 = vmatprep.subr.bf16.mxu0 %v6460_v13  ;;  %s2540_s6 = scalar_lea.vmem [#allocation5], %s8474_s5  ;;  %s8711_s5 = sld [smem:[#allocation7 + $0x1f]] }
 0x4db   : > { %5659 = vmatpush3.bf16.msra.mxu0 %v6464_v16  ;;  %3513 = vmatpush1.bf16.msra.mxu1 %v6461_v14  ;;  %v6475_v16 = vld [vmem:[%s7783_s13 + $0x110] ss:$12 sps:$4 sm:$0xff]  }
 0x4dc   : > { %v8452_v62 = vpop.f32.mrb[14].mxu1  ;;  %3514 = vmatprep.subr.bf16.mxu1 %v6468_v37  ;;  %v2025_v37 = vmul.f32 %v8420_v28, %v8380_v45 }
 0x4dd   : > { %v8456_v1 = vpop.f32.mrb[15].mxu1  ;;  %v2031_v41 = vmul.f32 %v8452_v62, %v8403_v8 }
 0x4de   : > { %v2030_v40 = vmul.f32 %v8408_v9, %v8456_v1  ;;  %v8535_v32 = vmul.f32 %v2025_v37, %v2025_v37 }
 0x4df   : > { %3515 = vmatpush1.bf16.msra.mxu1 %v6466_v49  ;;  %v2026_v49 = vmul.f32 %v8384_v52, %v8436_v48 }
 0x4e0   : > { %v2507_v20 = vld [vmem:[%s2506_s14] sm:$0x1]  ;;  %v8464_v11 = vpop.f32.mrb[16].mxu1 }
 0x4e1   : > { %v2511_v22 = vld [vmem:[%s2510_s2] sm:$0x1]  ;;  %v2508_v23 = vmin.f32 %v2507_v20, %v2505_v33  ;;  %v8466_v12 = vpop.f32.mrb[17].mxu1  ;;  %v8480_v20 = vpop.permute.xlu0 %2743  ;;  %v8547_v1 = vmul.f32 %v2026_v49, %v2026_v49 }
 0x4e2   : > { %v2512_v26 = vmax.f32 %v2511_v22, %v2505_v33  ;;  %9669 = vst [vmem:[#allocation57_spill] sm:$0xff] %v8480_v20  ;;  %v6465_v22 = vld [vmem:[%s7783_s13 + $0xe0] ss:$12 sps:$4 sm:$0xff]  }
 0x4e3   : > { %2509 = vst [vmem:[%s2506_s14] sm:$0x1] %v2508_v23  ;;  %5660 = vmatprep.subr.bf16.mxu0 %v6465_v22  ;;  %v6476_v22 = vld [vmem:[%s7783_s13 + $0x108] ss:$12 sps:$4 sm:$0xff]   ;;  %s2546_s14 = scalar_lea.vmem [#allocation4], %s8505_s28 }
 0x4e4   : > { %2513 = vst [vmem:[%s2510_s2] sm:$0x1] %v2512_v26  ;;  %v8472_v24 = vpop.f32.mrb[18].mxu1  ;;  %s2550_s2 = scalar_lea.vmem [#allocation5], %s8505_s28  ;;  %s8761_s28 = sld [smem:[#allocation7 + $0x20]] }
 0x4e5   : > { %v8478_v33 = vpop.f32.mrb[19].mxu1  ;;  %v8498_v13 = vpop.permute.xlu0 %2006 }
 0x4e8   : > { %v8487_v57 = vpop.f32.mrb[20].mxu1 }
 0x4ea   : > { %v2517_v63 = vld [vmem:[%s2516_s1] sm:$0x1] }
 0x4eb   : > { %v2521_v0 = vld [vmem:[%s2520_s15] sm:$0x1]  ;;  %v2518_v2 = vmin.f32 %v2517_v63, %v2515_v58  ;;  %v8490_v63 = vpop.f32.mrb[21].mxu1 }
 0x4ec   : > { %v2522_v5 = vmax.f32 %v2521_v0, %v2515_v58  ;;  %v6469_v58 = vld [vmem:[%s7783_s13 + $0x20] ss:$12 sps:$4 sm:$0xff]   ;;  %v6470_v0 = vld [vmem:[%s7783_s13 + $0xf8] ss:$12 sps:$4 sm:$0xff]   ;;  %v8500_v14 = vpop.f32.mrb[22].mxu1 }
 0x4ed   : > { %2519 = vst [vmem:[%s2516_s1] sm:$0x1] %v2518_v2  ;;  %5661 = vmatpush3.bf16.msra.mxu0 %v6469_v58  ;;  %v6473_v2 = vld [vmem:[%s7783_s13 + $0xf4] ss:$12 sps:$4 sm:$0xff]   ;;  %v8502_v15 = vpop.f32.mrb[23].mxu1  ;;  %v6479_v58 = vld [vmem:[%s7783_s13 + $0x50] ss:$12 sps:$4 sm:$0xff]  }
 0x4ee   : > { %2523 = vst [vmem:[%s2520_s15] sm:$0x1] %v2522_v5  ;;  %v8494_v5 = vpop.permute.xlu1 %2011  ;;  %5662 = vmatprep.subr.bf16.mxu0 %v6470_v0  ;;  %3516 = vmatprep.subr.bf16.mxu1 %v6473_v2  ;;  %s2556_s1 = scalar_lea.vmem [#allocation4], %s8572_s25  ;;  %s2560_s15 = scalar_lea.vmem [#allocation5], %s8572_s25 }
 0x4ef   : > { %3517 = vmatpush1.bf16.msra.mxu1 %v6471_v6  ;;  %v2037_v21 = vmul.f32 %v8487_v57, %v8494_v5  ;;  %s8803_s25 = sld [smem:[#allocation7 + $0x21]] }
 0x4f1   : > { %5663 = vmatpush3.bf16.msra.mxu0 %v6474_v27 }
 0x4f2   : > { %5664 = vmatprep.subr.bf16.mxu0 %v6475_v16  ;;  %v8522_v28 = vpop.permute.xlu1 %2752  ;;  %v8528_v16 = vpop.permute.xlu0 %2749 }
 0x4f3   : > { %9670 = vst [vmem:[#allocation58_spill] sm:$0xff] %v8522_v28  ;;  %9671 = vst [vmem:[#allocation59_spill] sm:$0xff] %v8528_v16 }
 0x4f4   : > { %v2527_v23 = vld [vmem:[%s2526_s16] sm:$0x1] }
 0x4f5   : > { %v2531_v26 = vld [vmem:[%s2530_s0] sm:$0x1]  ;;  %v2528_v50 = vmin.f32 %v2527_v23, %v2525_v34  ;;  %v2024_v23 = vmul.f32 %v8376_v39, %v8422_v31  ;;  %v2029_v31 = vmul.f32 %v8440_v46, %v8390_v60  ;;  %5665 = vmatpush3.bf16.msra.mxu0 %v6479_v58  ;;  %v8556_v58 = vpack.c.bf16 %v2031_v41, %v2030_v40 }
 0x4f6   : > { %v2532_v55 = vmax.f32 %v2531_v26, %v2525_v34  ;;  %v2535_v34 = vld [vmem:[#allocation3 + $0x1b] sm:$0x1]  ;;  %v2027_v26 = vmul.f32 %v8434_v42, %v8382_v51  ;;  %v2028_v42 = vmul.f32 %v8392_v61, %v8444_v54  ;;  %5666 = vmatprep.subr.bf16.mxu0 %v6480_v35  ;;  %v8576_v35 = vmul.f32 %v2030_v40, %v2030_v40  ;;  %v8585_v57 = vpop.permute.xlu0 %2016 }
 0x4f7   : > { %2529 = vst [vmem:[%s2526_s16] sm:$0x1] %v2528_v50  ;;  %v8516_v50 = vpop.f32.mrb[24].mxu1  ;;  %v8537_v46 = vmul.f32 %v2024_v23, %v2024_v23  ;;  %v8539_v29 = vpack.c.bf16 %v2025_v37, %v2024_v23  ;;  %v6481_v37 = vld [vmem:[%s7783_s13 + $0x120] ss:$12 sps:$4 sm:$0xff]   ;;  %9672 = vst [vmem:[#allocation60_spill] sm:$0xff] %v8556_v58  ;;  %s2566_s16 = scalar_lea.vmem [#allocation4], %s8659_s27 }
 0x4f8   : > { %2533 = vst [vmem:[%s2530_s0] sm:$0x1] %v2532_v55  ;;  %v6478_v55 = vld [vmem:[%s7783_s13 + $0x10c] ss:$12 sps:$4 sm:$0xff]   ;;  %v1798_v48 = vpop.f32.mrb[25].mxu1  ;;  %v8541_v54 = vpack.c.bf16 %v2027_v26, %v2026_v49  ;;  %v8545_v62 = vmul.f32 %v2027_v26, %v2027_v26  ;;  %v8554_v23 = vmul.f32 %v2028_v42, %v2028_v42  ;;  %v2032_v26 = vmul.f32 %v8432_v38, %v8466_v12  ;;  %v8574_v12 = vpop.permute.xlu1 %2021  ;;  %s2570_s0 = scalar_lea.vmem [#allocation5], %s8659_s27  ;;  %s5320_s27 = sld [smem:[#allocation7 + $0x22]] }
 0x4f9   : > { %3518 = vmatprep.subr.bf16.mxu1 %v6478_v55  ;;  %v8549_v55 = vmul.f32 %v2029_v31, %v2029_v31  ;;  %v6003_v25 = vpop.f32.mrb[26].mxu1  ;;  %v8595_v40 = vmul.f32 %v8500_v14, %v8574_v12  ;;  %v6490_v14 = vld [vmem:[%s7783_s13 + $0x158] ss:$12 sps:$4 sm:$0xff]  }
 0x4fa   : > { %3519 = vmatpush1.bf16.msra.mxu1 %v6476_v22  ;;  %v1808_v49 = vpop.f32.mrb[27].mxu1  ;;  %v2035_v22 = vmul.f32 %v8472_v24, %v8459_v7  ;;  %v2036_v24 = vmul.f32 %v8498_v13, %v8490_v63  ;;  %v6486_v63 = vld [vmem:[%s7783_s13 + $0x138] ss:$12 sps:$4 sm:$0xff]   ;;  %v2043_v20 = vmul.f32 %v6003_v25, %v8382_v51 }
 0x4fb   : > { %v2042_v58 = vmul.f32 %v8384_v52, %v1808_v49 }
 0x4fc   : > { %v8589_v28 = vmul.f32 %v2035_v22, %v2035_v22 }
 0x4fe   : > { %v2537_v0 = vld [vmem:[%s2536_s23] sm:$0x1] }
 0x4ff   : > { %v2541_v2 = vld [vmem:[%s2540_s6] sm:$0x1]  ;;  %v2538_v6 = vmin.f32 %v2537_v0, %v2535_v34  ;;  %v6484_v0 = vld [vmem:[%s7783_s13 + $0x68] ss:$12 sps:$4 sm:$0xff]  }
 0x500   : > { %v2542_v27 = vmax.f32 %v2541_v2, %v2535_v34  ;;  %v6483_v34 = vld [vmem:[%s7783_s13 + $0x124] ss:$12 sps:$4 sm:$0xff]   ;;  %v8551_v2 = vpack.c.bf16 %v2029_v31, %v2028_v42  ;;  %v8563_v31 = vmul.f32 %v2031_v41, %v2031_v41  ;;  %v2034_v42 = vmul.f32 %v8462_v10, %v8478_v33  ;;  %5667 = vmatpush3.bf16.msra.mxu0 %v6484_v0  ;;  %v6489_v33 = vld [vmem:[%s7783_s13 + $0x80] ss:$12 sps:$4 sm:$0xff]  }
 0x501   : > { %2539 = vst [vmem:[%s2536_s23] sm:$0x1] %v2538_v6  ;;  %v2033_v6 = vmul.f32 %v8464_v11, %v8429_v36  ;;  %3520 = vmatprep.subr.bf16.mxu1 %v6483_v34  ;;  %v6488_v11 = vld [vmem:[%s7783_s13 + $0x13c] ss:$12 sps:$4 sm:$0xff]   ;;  %v8587_v34 = vmul.f32 %v2032_v26, %v2032_v26  ;;  %s2576_s23 = scalar_lea.vmem [#allocation4], %s8711_s5 }
 0x502   : > { %2543 = vst [vmem:[%s2540_s6] sm:$0x1] %v2542_v27  ;;  %v6485_v27 = vld [vmem:[%s7783_s13 + $0x140] ss:$12 sps:$4 sm:$0xff]   ;;  %v8591_v16 = vpack.c.bf16 %v2035_v22, %v2034_v42  ;;  %3521 = vmatpush1.bf16.msra.mxu1 %v6481_v37  ;;  %v8598_v0 = vmul.f32 %v2034_v42, %v2034_v42  ;;  %v8606_v22 = vmul.f32 %v8585_v57, %v8502_v15  ;;  %s2580_s6 = scalar_lea.vmem [#allocation5], %s8711_s5  ;;  %s5321_s5 = sld [smem:[#allocation7 + $0x23]] }
 0x503   : > { %v8578_v41 = vmul.f32 %v2033_v6, %v2033_v6  ;;  %v8580_v19 = vpack.c.bf16 %v2033_v6, %v2032_v26  ;;  %v6006_v6 = vpop.f32.mrb[28].mxu1  ;;  %v8602_v26 = vpack.c.bf16 %v2037_v21, %v2036_v24  ;;  %5668 = vmatprep.subr.bf16.mxu0 %v6485_v27  ;;  %v2041_v37 = vmul.f32 %v8516_v50, %v8380_v45  ;;  %v6494_v45 = vld [vmem:[%s7783_s13 + $0x98] ss:$12 sps:$4 sm:$0xff]  }
 0x504   : > { %9674 = vst [vmem:[#allocation62_spill] sm:$0xff] %v8591_v16  ;;  %v1818_v16 = vpop.f32.mrb[29].mxu1  ;;  %v2040_v42 = vmul.f32 %v8376_v39, %v1798_v48  ;;  %3522 = vmatprep.subr.bf16.mxu1 %v6488_v11  ;;  %v8621_v47 = vpack.c.bf16 %v8595_v40, %v8606_v22  ;;  %v2045_v39 = vmul.f32 %v6006_v6, %v8390_v60  ;;  %v6491_v11 = vld [vmem:[%s7783_s13 + $0x150] ss:$12 sps:$4 sm:$0xff]  }
 0x505   : > { %9673 = vst [vmem:[#allocation61_spill] sm:$0xff] %v8580_v19  ;;  %v8600_v19 = vmul.f32 %v2037_v21, %v2037_v21  ;;  %9675 = vst [vmem:[#allocation63_spill] sm:$0xff] %v8602_v26  ;;  %v6493_v21 = vld [vmem:[%s7783_s13 + $0x154] ss:$12 sps:$4 sm:$0xff]   ;;  %v8617_v26 = vmul.f32 %v2036_v24, %v2036_v24  ;;  %v2044_v25 = vmul.f32 %v8392_v61, %v1818_v16  ;;  %5669 = vmatpush3.bf16.msra.mxu0 %v6489_v33  ;;  %v6009_v49 = vpop.f32.mrb[30].mxu1 }
 0x506   : > { %9676 = vst [vmem:[#allocation64_spill] sm:$0xff] %v8621_v47  ;;  %v2073_v50 = vsub.f32 %v2041_v37, %v8535_v32  ;;  %v2072_v48 = vsub.f32 %v2040_v42, %v8537_v46  ;;  %3523 = vmatpush1.bf16.msra.mxu1 %v6486_v63  ;;  %v6495_v24 = vld [vmem:[%s7783_s13 + $0x170] ss:$12 sps:$4 sm:$0xff]   ;;  %v2075_v47 = vsub.f32 %v2043_v20, %v8545_v62  ;;  %v1828_v33 = vpop.f32.mrb[31].mxu1  ;;  %v6498_v32 = vld [vmem:[%s7783_s13 + $0x16c] ss:$12 sps:$4 sm:$0xff]  }
 0x507   : > { %v2074_v60 = vsub.f32 %v2042_v58, %v8547_v1  ;;  %v2077_v61 = vsub.f32 %v2045_v39, %v8549_v55  ;;  %v2076_v16 = vsub.f32 %v2044_v25, %v8554_v23  ;;  %5670 = vmatprep.subr.bf16.mxu0 %v6490_v14  ;;  %v2047_v6 = vmul.f32 %v6009_v49, %v8403_v8  ;;  %v6496_v20 = vld [vmem:[%s7783_s13 + $0x168] ss:$12 sps:$4 sm:$0xff]   ;;  %v6499_v62 = vld [vmem:[%s7783_s13 + $0xb0] ss:$12 sps:$4 sm:$0xff]  }
 0x508   : > { %v2547_v15 = vld [vmem:[%s2546_s14] sm:$0x1]  ;;  %v2088_v46 = vmax.f32 %v2072_v48, 0.0  ;;  %v2046_v63 = vmul.f32 %v8408_v9, %v1828_v33  ;;  %3524 = vmatprep.subr.bf16.mxu1 %v6493_v21  ;;  %v2091_v1 = vmax.f32 %v2075_v47, 0.0  ;;  %v6500_v14 = vld [vmem:[%s7783_s13 + $0x248] ss:$12 sps:$4 sm:$0xff]   ;;  %v8648_v9 = vmul.f32 %v8595_v40, %v8595_v40 }
 0x509   : > { %v2551_v27 = vld [vmem:[%s2550_s2] sm:$0x1]  ;;  %v2548_v51 = vmin.f32 %v2547_v15, %v2545_v30  ;;  %v2090_v58 = vmax.f32 %v2074_v60, 0.0  ;;  %v2093_v55 = vmax.f32 %v2077_v61, 0.0  ;;  %v2092_v23 = vmax.f32 %v2076_v16, 0.0  ;;  %5671 = vmatpush3.bf16.msra.mxu0 %v6494_v45 }
 0x50a   : > { %v2552_v52 = vmax.f32 %v2551_v27, %v2545_v30  ;;  %v2089_v30 = vmax.f32 %v2073_v50, 0.0  ;;  %v8642_v42 = vadd.f32 1e-05, %v2088_v46  ;;  %v2079_v15 = vsub.f32 %v2047_v6, %v8563_v31  ;;  %v6012_v27 = vpop.f32.mrb[32].mxu1  ;;  %3525 = vmatpush1.bf16.msra.mxu1 %v6491_v11  ;;  %5672 = vmatprep.subr.bf16.mxu0 %v6495_v24  ;;  %v6503_v25 = vld [vmem:[%s7783_s13 + $0x184] ss:$12 sps:$4 sm:$0xff]  }
 0x50b   : > { %2549 = vst [vmem:[%s2546_s14] sm:$0x1] %v2548_v51  ;;  %v2078_v8 = vsub.f32 %v2046_v63, %v8576_v35  ;;  %v8650_v47 = vadd.f32 1e-05, %v2091_v1  ;;  %v8652_v21 = vadd.f32 1e-05, %v2090_v58  ;;  %v2049_v39 = vmul.f32 %v6012_v27, %v8429_v36  ;;  %3526 = vmatprep.subr.bf16.mxu1 %v6498_v32  ;;  %v1838_v51 = vpop.f32.mrb[33].mxu1 }
 0x50c   : > { %2553 = vst [vmem:[%s2550_s2] sm:$0x1] %v2552_v52  ;;  %v8640_v37 = vadd.f32 1e-05, %v2089_v30  ;;  %v8657_v31 = vadd.f32 1e-05, %v2093_v55  ;;  %v2095_v35 = vmax.f32 %v2079_v15, 0.0  ;;  %v2048_v50 = vmul.f32 %v8432_v38, %v1838_v51 }
 0x50d   : > { %v2094_v45 = vmax.f32 %v2078_v8, 0.0  ;;  %v2555_v52 = vld [vmem:[#allocation3 + $0x1d] sm:$0x1]  ;;  %v8662_v40 = vadd.f32 1e-05, %v2092_v23  ;;  %v2081_v36 = vsub.f32 %v2049_v39, %v8578_v41  ;;  %5673 = vmatpush3.bf16.msra.mxu0 %v6499_v62  ;;  %v8668_v48 = vmul.f32 %v8606_v22, %v8606_v22  ;;  %v6015_v24 = vpop.f32.mrb[34].mxu1 }
 0x50e   : > { %6572 = vrsqrt.f32 %v8640_v37  ;;  %v8671_v49 = vadd.f32 1e-05, %v2095_v35  ;;  %3527 = vmatpush1.bf16.msra.mxu1 %v6496_v20  ;;  %5722 = vmatprep.subr.bf16.mxu0 %v6500_v14  ;;  %v2080_v61 = vsub.f32 %v2048_v50, %v8587_v34  ;;  %v2051_v22 = vmul.f32 %v6015_v24, %v8459_v7  ;;  %v1848_v16 = vpop.f32.mrb[35].mxu1  ;;  %v2565_v51 = vld [vmem:[#allocation3 + $0x1e] sm:$0x1]  ;;  %s2586_s14 = scalar_lea.vmem [#allocation4], %s8761_s28 }
 0x50f   : > { %6574 = vrsqrt.f32 %v8642_v42  ;;  %v8673_v11 = vadd.f32 1e-05, %v2094_v45  ;;  %v2097_v38 = vmax.f32 %v2081_v36, 0.0  ;;  %3609 = vmatprep.subr.bf16.mxu1 %v6503_v25  ;;  %v2050_v30 = vmul.f32 %v8462_v10, %v1848_v16  ;;  %v6018_v34 = vpop.f32.mrb[36].mxu1  ;;  %s2590_s2 = scalar_lea.vmem [#allocation5], %s8761_s28  ;;  %s5322_s28 = sld [smem:[#allocation7 + $0x24]] }
 0x510   : > { %6576 = vrsqrt.f32 %v8650_v47  ;;  %vm2122_vm0 = vcmp.eq.f32.partialorder %v8642_v42, inf  ;;  %v2096_v6 = vmax.f32 %v2080_v61, 0.0  ;;  %v2083_v63 = vsub.f32 %v2051_v22, %v8589_v28  ;;  %v1858_v58 = vpop.f32.mrb[37].mxu1 }
 0x511   : > { %6578 = vrsqrt.f32 %v8652_v21  ;;  %v8684_v46 = vadd.f32 1e-05, %v2097_v38  ;;  %v2082_v7 = vsub.f32 %v2050_v30, %v8598_v0  ;;  %vm2124_vm2 = vcmp.eq.f32.partialorder %v8642_v42, 0.0  ;;  %v6021_v8 = vpop.f32.mrb[38].mxu1 }
 0x512   : > { %v2557_v60 = vld [vmem:[%s2556_s1] sm:$0x1]  ;;  %6580 = vrsqrt.f32 %v8657_v31  ;;  %v2125_v10 = vand.u32 2147483648, %v8642_v42  ;;  %v8692_v20 = vadd.f32 1e-05, %v2096_v6  ;;  %v2099_v62 = vmax.f32 %v2083_v63, 0.0 }
 0x513   : > { %v2561_v41 = vld [vmem:[%s2560_s15] sm:$0x1]  ;;  %v2558_v33 = vmin.f32 %v2557_v60, %v2555_v52  ;;  %6582 = vrsqrt.f32 %v8662_v40  ;;  %v2053_v1 = vmul.f32 %v6018_v34, %v8494_v5  ;;  %v2098_v28 = vmax.f32 %v2082_v7, 0.0  ;;  %v1868_v25 = vpop.f32.mrb[39].mxu1 }
 0x514   : > { %v2562_v32 = vmax.f32 %v2561_v41, %v2555_v52  ;;  %6584 = vrsqrt.f32 %v8671_v49  ;;  %v2052_v55 = vmul.f32 %v8498_v13, %v1858_v58  ;;  %vm2129_vm3 = vcmp.eq.f32.partialorder %v8640_v37, inf }
 0x515   : > { %2559 = vst [vmem:[%s2556_s1] sm:$0x1] %v2558_v33  ;;  %6586 = vrsqrt.f32 %v8673_v11  ;;  %v8699_v0 = vadd.f32 1e-05, %v2099_v62  ;;  %v2085_v23 = vsub.f32 %v2053_v1, %v8600_v19  ;;  %vm2131_vm4 = vcmp.eq.f32.partialorder %v8640_v37, 0.0  ;;  %s2596_s1 = scalar_lea.vmem [#allocation4], %s8803_s25 }
 0x516   : > { %2563 = vst [vmem:[%s2560_s15] sm:$0x1] %v2562_v32  ;;  %6588 = vrsqrt.f32 %v8684_v46  ;;  %v8703_v15 = vadd.f32 1e-05, %v2098_v28  ;;  %v2084_v5 = vsub.f32 %v2052_v55, %v8617_v26  ;;  %v2132_v27 = vand.u32 2147483648, %v8640_v37  ;;  %s2600_s15 = scalar_lea.vmem [#allocation5], %s8803_s25  ;;  %s5323_s25 = sld [smem:[#allocation7 + $0x25]] }
 0x517   : > { %6590 = vrsqrt.f32 %v8692_v20  ;;  %vm2136_vm5 = vcmp.eq.f32.partialorder %v8652_v21, inf  ;;  %v2101_v39 = vmax.f32 %v2085_v23, 0.0  ;;  %v2055_v19 = vmul.f32 %v6021_v8, %v8574_v12 }
 0x518   : > { %v6573_v14 = vpop.eup %6572  ;;  %6592 = vrsqrt.f32 %v8699_v0  ;;  %v2100_v26 = vmax.f32 %v2084_v5, 0.0  ;;  %v2054_v52 = vmul.f32 %v8585_v57, %v1868_v25  ;;  %vm2138_vm6 = vcmp.eq.f32.partialorder %v8652_v21, 0.0 }
 0x519   : > { %v6575_v13 = vpop.eup %6574  ;;  %v2128_v35 = vmul.f32 %v6573_v14, %v8640_v37  ;;  %6594 = vrsqrt.f32 %v8703_v15  ;;  %v8718_v12 = vadd.f32 1e-05, %v2101_v39  ;;  %v2087_v41 = vsub.f32 %v2055_v19, %v8648_v9 }
 0x51a   : > { %v6577_v45 = vpop.eup %6576  ;;  %v2121_v36 = vmul.f32 %v6575_v13, %v8642_v42  ;;  %v8725_v33 = vadd.f32 1e-05, %v2100_v26  ;;  %v2086_v32 = vsub.f32 %v2054_v52, %v8668_v48  ;;  %vm2143_vm7 = vcmp.eq.f32.partialorder %v8650_v47, inf }
 0x51b   : > { %v6579_v50 = vpop.eup %6578  ;;  %v2130_v38 = vsel %vm2129_vm3, %v8640_v37, %v2128_v35  ;;  %v2142_v61 = vmul.f32 %v6577_v45, %v8650_v47  ;;  %6596 = vrsqrt.f32 %v8718_v12  ;;  %v2103_v6 = vmax.f32 %v2087_v41, 0.0 }
 0x51c   : > { %v2567_v24 = vld [vmem:[%s2566_s16] sm:$0x1]  ;;  %v6581_v22 = vpop.eup %6580  ;;  %v2123_v9 = vsel %vm2122_vm0, %v8642_v42, %v2121_v36  ;;  %v2133_v63 = vsel %vm2131_vm4, %v2132_v27, %v2130_v38  ;;  %6598 = vrsqrt.f32 %v8725_v33  ;;  %v2102_v34 = vmax.f32 %v2086_v32, 0.0 }
 0x51d   : > { %v2571_v60 = vld [vmem:[%s2570_s0] sm:$0x1]  ;;  %v2568_v16 = vmin.f32 %v2567_v24, %v2565_v51  ;;  %v6583_v30 = vpop.eup %6582  ;;  %v2126_v48 = vsel %vm2124_vm2, %v2125_v10, %v2123_v9  ;;  %v2135_v62 = vmul.f32 %v6579_v50, %v8652_v21  ;;  %v8738_v58 = vadd.f32 1e-05, %v2103_v6 }
 0x51e   : > { %v2572_v57 = vmax.f32 %v2571_v60, %v2565_v51  ;;  %v6585_v7 = vpop.eup %6584  ;;  %v8740_v28 = vpack.c.bf16 %v2133_v63, %v2126_v48  ;;  %v2139_v37 = vand.u32 2147483648, %v8652_v21  ;;  %v8744_v23 = vadd.f32 1e-05, %v2102_v34  ;;  %v2575_v51 = vld [vmem:[#allocation3 + $0x1f] sm:$0x1] }
 0x51f   : > { %2569 = vst [vmem:[%s2566_s16] sm:$0x1] %v2568_v16  ;;  %v6587_v1 = vpop.eup %6586  ;;  %v2137_v14 = vsel %vm2136_vm5, %v8652_v21, %v2135_v62  ;;  %vm2145_vm8 = vcmp.eq.f32.partialorder %v8650_v47, 0.0  ;;  %6600 = vrsqrt.f32 %v8738_v58  ;;  %v2144_v5 = vsel %vm2143_vm7, %v8650_v47, %v2142_v61  ;;  %s2606_s16 = scalar_lea.vmem [#allocation4], %s5320_s27 }
 0x520   : > { %2573 = vst [vmem:[%s2570_s0] sm:$0x1] %v2572_v57  ;;  %v6589_v55 = vpop.eup %6588  ;;  %v2140_v10 = vsel %vm2138_vm6, %v2139_v37, %v2137_v14  ;;  %v2146_v8 = vand.u32 2147483648, %v8650_v47  ;;  %6602 = vrsqrt.f32 %v8744_v23  ;;  %v2149_v27 = vmul.f32 %v6583_v30, %v8662_v40  ;;  %s2610_s0 = scalar_lea.vmem [#allocation5], %s5320_s27  ;;  %s5324_s27 = sld [smem:[#allocation7 + $0x26]] }
 0x521   : > { %v6591_v42 = vpop.eup %6590  ;;  %vm2150_vm9 = vcmp.eq.f32.partialorder %v8662_v40, inf  ;;  %vm2152_vm10 = vcmp.eq.f32.partialorder %v8662_v40, 0.0  ;;  %v2153_v39 = vand.u32 2147483648, %v8662_v40  ;;  %v2156_v19 = vmul.f32 %v6581_v22, %v8657_v31 }
 0x522   : > { %v6593_v21 = vpop.eup %6592  ;;  %v2147_v13 = vsel %vm2145_vm8, %v2146_v8, %v2144_v5  ;;  %vm2157_vm11 = vcmp.eq.f32.partialorder %v8657_v31, inf  ;;  %v2151_v35 = vsel %vm2150_vm9, %v8662_v40, %v2149_v27  ;;  %vm2159_vm12 = vcmp.eq.f32.partialorder %v8657_v31, 0.0 }
 0x523   : > { %v6595_v25 = vpop.eup %6594  ;;  %v8763_v47 = vpack.c.bf16 %v2147_v13, %v2140_v10  ;;  %v2160_v45 = vand.u32 2147483648, %v8657_v31  ;;  %v2154_v36 = vsel %vm2152_vm10, %v2153_v39, %v2151_v35  ;;  %v2158_v50 = vsel %vm2157_vm11, %v8657_v31, %v2156_v19 }
 0x524   : > { %v2163_v24 = vmul.f32 %v6587_v1, %v8673_v11  ;;  %v2170_v60 = vmul.f32 %v6585_v7, %v8671_v49  ;;  %v2177_v22 = vmul.f32 %v6591_v42, %v8692_v20  ;;  %vm2164_vm13 = vcmp.eq.f32.partialorder %v8673_v11, inf }
 0x525   : > { %v2161_v61 = vsel %vm2159_vm12, %v2160_v45, %v2158_v50  ;;  %v6597_v16 = vpop.eup %6596  ;;  %vm2166_vm14 = vcmp.eq.f32.partialorder %v8673_v11, 0.0  ;;  %v2167_v40 = vand.u32 2147483648, %v8673_v11  ;;  %vm2171_vm15 = vcmp.eq.f32.partialorder %v8671_v49, inf }
 0x526   : > { %v2577_v26 = vld [vmem:[%s2576_s23] sm:$0x1]  ;;  %v8776_v57 = vpack.c.bf16 %v2161_v61, %v2154_v36  ;;  %v6599_v32 = vpop.eup %6598  ;;  %v2165_v31 = vsel %vm2164_vm13, %v8673_v11, %v2163_v24  ;;  %vm2173_vm1 = vcmp.eq.f32.partialorder %v8671_v49, 0.0  ;;  %v2174_v30 = vand.u32 2147483648, %v8671_v49 }
 0x527   : > { %v2581_v52 = vld [vmem:[%s2580_s6] sm:$0x1]  ;;  %v2578_v41 = vmin.f32 %v2577_v26, %v2575_v51  ;;  %v2168_v6 = vsel %vm2166_vm14, %v2167_v40, %v2165_v31  ;;  %v2172_v9 = vsel %vm2171_vm15, %v8671_v49, %v2170_v60  ;;  %vm2178_vm0 = vcmp.eq.f32.partialorder %v8692_v20, inf  ;;  %v2595_v31 = vld [vmem:[#allocation3 + $0x21] sm:$0x1] }
 0x528   : > { %v2582_v38 = vmax.f32 %v2581_v52, %v2575_v51  ;;  %vm2180_vm2 = vcmp.eq.f32.partialorder %v8692_v20, 0.0  ;;  %v2175_v63 = vsel %vm2173_vm1, %v2174_v30, %v2172_v9  ;;  %v2179_v7 = vsel %vm2178_vm0, %v8692_v20, %v2177_v22 }
 0x529   : > { %2579 = vst [vmem:[%s2576_s23] sm:$0x1] %v2578_v41  ;;  %v2181_v34 = vand.u32 2147483648, %v8692_v20  ;;  %v2184_v11 = vmul.f32 %v6589_v55, %v8684_v46  ;;  %v6601_v48 = vpop.eup %6600  ;;  %v8791_v62 = vpack.c.bf16 %v2175_v63, %v2168_v6  ;;  %vm2185_vm3 = vcmp.eq.f32.partialorder %v8684_v46, inf  ;;  %v2585_v20 = vld [vmem:[#allocation3 + $0x20] sm:$0x1]  ;;  %s2616_s23 = scalar_lea.vmem [#allocation4], %s5321_s5 }
 0x52a   : > { %2583 = vst [vmem:[%s2580_s6] sm:$0x1] %v2582_v38  ;;  %vm2187_vm4 = vcmp.eq.f32.partialorder %v8684_v46, 0.0  ;;  %v2191_v49 = vmul.f32 %v6595_v25, %v8703_v15  ;;  %v6603_v1 = vpop.eup %6602  ;;  %v2188_v42 = vand.u32 2147483648, %v8684_v46  ;;  %vm2192_vm5 = vcmp.eq.f32.partialorder %v8703_v15, inf  ;;  %s2620_s6 = scalar_lea.vmem [#allocation5], %s5321_s5  ;;  %s5325_s5 = sld [smem:[#allocation7 + $0x27]] }
 0x52b   : > { %v2182_v37 = vsel %vm2180_vm2, %v2181_v34, %v2179_v7  ;;  %v2186_v14 = vsel %vm2185_vm3, %v8684_v46, %v2184_v11  ;;  %v2198_v10 = vmul.f32 %v6593_v21, %v8699_v0  ;;  %v2205_v5 = vmul.f32 %v6599_v32, %v8725_v33  ;;  %v2605_v7 = vld [vmem:[#allocation3 + $0x22] sm:$0x1] }
 0x52c   : > { %v2193_v55 = vsel %vm2192_vm5, %v8703_v15, %v2191_v49  ;;  %v2212_v8 = vmul.f32 %v6597_v16, %v8718_v12  ;;  %v2189_v27 = vsel %vm2187_vm4, %v2188_v42, %v2186_v14  ;;  %vm2194_vm6 = vcmp.eq.f32.partialorder %v8703_v15, 0.0  ;;  %v2615_v49 = vld [vmem:[#allocation3 + $0x23] sm:$0x1] }
 0x52d   : > { %v2195_v13 = vand.u32 2147483648, %v8703_v15  ;;  %vm2199_vm7 = vcmp.eq.f32.partialorder %v8699_v0, inf  ;;  %v8810_v19 = vpack.c.bf16 %v2189_v27, %v2182_v37  ;;  %vm2201_vm8 = vcmp.eq.f32.partialorder %v8699_v0, 0.0  ;;  %v2635_v27 = vld [vmem:[#allocation3 + $0x25] sm:$0x1] }
 0x52e   : > { %v2200_v21 = vsel %vm2199_vm7, %v8699_v0, %v2198_v10  ;;  %v2202_v25 = vand.u32 2147483648, %v8699_v0  ;;  %vm2206_vm9 = vcmp.eq.f32.partialorder %v8725_v33, inf  ;;  %vm2208_vm10 = vcmp.eq.f32.partialorder %v8725_v33, 0.0 }
 0x52f   : > { %v2196_v51 = vsel %vm2194_vm6, %v2195_v13, %v2193_v55  ;;  %v2207_v26 = vsel %vm2206_vm9, %v8725_v33, %v2205_v5  ;;  %v2209_v52 = vand.u32 2147483648, %v8725_v33  ;;  %vm2213_vm11 = vcmp.eq.f32.partialorder %v8718_v12, inf }
 0x530   : > { %v2587_v46 = vld [vmem:[%s2586_s14] sm:$0x1]  ;;  %v2203_v15 = vsel %vm2201_vm8, %v2202_v25, %v2200_v21  ;;  %vm2215_vm12 = vcmp.eq.f32.partialorder %v8718_v12, 0.0  ;;  %v2216_v0 = vand.u32 2147483648, %v8718_v12  ;;  %v2214_v24 = vsel %vm2213_vm11, %v8718_v12, %v2212_v8  ;;  %v2645_v25 = vld [vmem:[#allocation3 + $0x26] sm:$0x1] }
 0x531   : > { %v2591_v39 = vld [vmem:[%s2590_s2] sm:$0x1]  ;;  %v2588_v35 = vmin.f32 %v2587_v46, %v2585_v20  ;;  %v8819_v36 = vpack.c.bf16 %v2203_v15, %v2196_v51  ;;  %v2210_v50 = vsel %vm2208_vm10, %v2209_v52, %v2207_v26  ;;  %v2219_v60 = vmul.f32 %v6603_v1, %v8744_v23  ;;  %v2655_v26 = vld [vmem:[#allocation3 + $0x27] sm:$0x1] }
 0x532   : > { %v2592_v45 = vmax.f32 %v2591_v39, %v2585_v20  ;;  %v2226_v41 = vmul.f32 %v6601_v48, %v8738_v58  ;;  %v2217_v38 = vsel %vm2215_vm12, %v2216_v0, %v2214_v24  ;;  %vm2220_vm13 = vcmp.eq.f32.partialorder %v8744_v23, inf  ;;  %v2625_v20 = vld [vmem:[#allocation3 + $0x24] sm:$0x1] }
 0x533   : > { %2589 = vst [vmem:[%s2586_s14] sm:$0x1] %v2588_v35  ;;  %vm2222_vm14 = vcmp.eq.f32.partialorder %v8744_v23, 0.0  ;;  %v2223_v33 = vand.u32 2147483648, %v8744_v23  ;;  %v8830_v61 = vpack.c.bf16 %v2217_v38, %v2210_v50  ;;  %v2221_v22 = vsel %vm2220_vm13, %v8744_v23, %v2219_v60  ;;  %s2626_s14 = scalar_lea.vmem [#allocation4], %s5322_s28 }
 0x534   : > { %2593 = vst [vmem:[%s2590_s2] sm:$0x1] %v2592_v45  ;;  %vm2227_vm15 = vcmp.eq.f32.partialorder %v8738_v58, inf  ;;  %vm2229_vm1 = vcmp.eq.f32.partialorder %v8738_v58, 0.0  ;;  %v2230_v12 = vand.u32 2147483648, %v8738_v58  ;;  %s2630_s2 = scalar_lea.vmem [#allocation5], %s5322_s28  ;;  %s2656_s28 = scalar_lea.vmem [#allocation4], %s5325_s5 }
 0x535   : > { %v2224_v16 = vsel %vm2222_vm14, %v2223_v33, %v2221_v22  ;;  %v2228_v40 = vsel %vm2227_vm15, %v8738_v58, %v2226_v41  ;;  %vm2760_vm0 = vcmp.eq.s32.totalorder %v8374_v44, 1  ;;  %vm2761_vm2 = vcmp.eq.s32.totalorder %v8378_v43, 1  ;;  %v6504_v22 = vld [vmem:[%s7783_s13 + $0x188] ss:$12 sps:$4 sm:$0xff]   ;;  %v6501_v44 = vld [vmem:[%s7783_s13 + $0x180] ss:$12 sps:$4 sm:$0xff]  }
 0x536   : > { %v2231_v32 = vsel %vm2229_vm1, %v2230_v12, %v2228_v40  ;;  %vm2762_vm3 = vcmp.eq.s32.totalorder %v8388_v59, 1  ;;  %vm2763_vm4 = vcmp.eq.s32.totalorder %v8386_v56, 1  ;;  %vm8846_vm5 = vmpackc.low %vm2761_vm2, %vm2760_vm0  ;;  %v6507_v56 = vld [vmem:[%s7783_s13 + $0x19c] ss:$12 sps:$4 sm:$0xff]   ;;  %v6508_v59 = vld [vmem:[%s7783_s13 + $0x260] ss:$12 sps:$4 sm:$0xff]  }
 0x537   : > { %v8839_v9 = vpack.c.bf16 %v2231_v32, %v2224_v16  ;;  %vm8857_vm6 = vmpackc.low %vm2763_vm4, %vm2762_vm3  ;;  %v6509_v32 = vld [vmem:[%s7783_s13 + $0x1a0] ss:$12 sps:$4 sm:$0xff]   ;;  %vm2764_vm7 = vcmp.eq.s32.totalorder %v8398_v4, 1  ;;  %vm2765_vm8 = vcmp.eq.s32.totalorder %v8396_v3, 1  ;;  %v6513_v3 = vld [vmem:[%s7783_s13 + $0x1c8] ss:$12 sps:$4 sm:$0xff]  }
 0x538   : > { %vm8877_vm9 = vmpackc.low %vm2765_vm8, %vm2764_vm7  ;;  %v6525_v4 = vld [vmem:[%s7783_s13 + $0x1d0] ss:$12 sps:$4 sm:$0xff]   ;;  %vm2766_vm10 = vcmp.eq.s32.totalorder %v8416_v18, 1  ;;  %vm2767_vm11 = vcmp.eq.s32.totalorder %v8414_v17, 1  ;;  %v6521_v17 = vld [vmem:[%s7783_s13 + $0x1f8] ss:$12 sps:$4 sm:$0xff]  }
 0x539   : > { %vm8897_vm12 = vmpackc.low %vm2767_vm11, %vm2766_vm10  ;;  %v6538_v18 = vld [vmem:[%s7783_s13 + $0x200] ss:$12 sps:$4 sm:$0xff]   ;;  %vm2768_vm13 = vcmp.eq.s32.totalorder %v8446_v53, 1  ;;  %v9688_v53 = vld [vmem:[#allocation60_spill] sm:$0xff] }
 0x53a   : > { %v2597_v30 = vld [vmem:[%s2596_s1] sm:$0x1]  ;;  %v6607_v12 = vld [vmem:[%s7783_s13 + $0x20] ss:$12 sps:$4 sm:$0xff]  }
 0x53b   : > { %v2601_v6 = vld [vmem:[%s2600_s15] sm:$0x1]  ;;  %v2598_v63 = vmin.f32 %v2597_v30, %v2595_v31  ;;  %v6516_v30 = vld [vmem:[%s7783_s13 + $0x278] ss:$12 sps:$4 sm:$0xff]  }
 0x53c   : > { %v2602_v23 = vmax.f32 %v2601_v6, %v2595_v31  ;;  %v6505_v31 = vld [vmem:[%s7783_s13 + $0x198] ss:$12 sps:$4 sm:$0xff]   ;;  %v6512_v6 = vld [vmem:[%s7783_s13 + $0x1b4] ss:$12 sps:$4 sm:$0xff]   ;;  %v6611_v40 = vld [vmem:[%s7783_s13 + $0x50] ss:$12 sps:$4 sm:$0xff]  }
 0x53d   : > { %2599 = vst [vmem:[%s2596_s1] sm:$0x1] %v2598_v63  ;;  %s2636_s1 = scalar_lea.vmem [#allocation4], %s5323_s25 }
 0x53e   : > { %2603 = vst [vmem:[%s2600_s15] sm:$0x1] %v2602_v23  ;;  %s2640_s15 = scalar_lea.vmem [#allocation5], %s5323_s25  ;;  %v6510_v23 = vld [vmem:[%s7783_s13 + $0x1b0] ss:$12 sps:$4 sm:$0xff]  }
 0x544   : > { %v2607_v34 = vld [vmem:[%s2606_s16] sm:$0x1] }
 0x545   : > { %v2611_v11 = vld [vmem:[%s2610_s0] sm:$0x1]  ;;  %v2608_v58 = vmin.f32 %v2607_v34, %v2605_v7 }
 0x546   : > { %v2612_v48 = vmax.f32 %v2611_v11, %v2605_v7  ;;  %v6517_v7 = vld [vmem:[%s7783_s13 + $0x1b8] ss:$12 sps:$4 sm:$0xff]  }
 0x547   : > { %2609 = vst [vmem:[%s2606_s16] sm:$0x1] %v2608_v58  ;;  %s2646_s16 = scalar_lea.vmem [#allocation4], %s5324_s27  ;;  %v6515_v11 = vld [vmem:[%s7783_s13 + $0x1cc] ss:$12 sps:$4 sm:$0xff]   ;;  %v6524_v58 = vld [vmem:[%s7783_s13 + $0x290] ss:$12 sps:$4 sm:$0xff]  }
 0x548   : > { %2613 = vst [vmem:[%s2610_s0] sm:$0x1] %v2612_v48  ;;  %s2650_s0 = scalar_lea.vmem [#allocation5], %s5324_s27  ;;  %v6615_v48 = vld [vmem:[%s7783_s13 + $0x80] ss:$12 sps:$4 sm:$0xff]  }
 0x54e   : > { %v2617_v1 = vld [vmem:[%s2616_s23] sm:$0x1] }
 0x54f   : > { %v2621_v37 = vld [vmem:[%s2620_s6] sm:$0x1]  ;;  %v2618_v14 = vmin.f32 %v2617_v1, %v2615_v49  ;;  %v6529_v1 = vld [vmem:[%s7783_s13 + $0x2a8] ss:$12 sps:$4 sm:$0xff]  }
 0x550   : > { %v2622_v42 = vmax.f32 %v2621_v37, %v2615_v49  ;;  %v6520_v49 = vld [vmem:[%s7783_s13 + $0x1e4] ss:$12 sps:$4 sm:$0xff]  }
 0x551   : > { %2619 = vst [vmem:[%s2616_s23] sm:$0x1] %v2618_v14  ;;  %s2660_s23 = scalar_lea.vmem [#allocation5], %s5325_s5  ;;  %v6518_v14 = vld [vmem:[%s7783_s13 + $0x1e0] ss:$12 sps:$4 sm:$0xff]  }
 0x552   : > { %2623 = vst [vmem:[%s2620_s6] sm:$0x1] %v2622_v42  ;;  %v6533_v42 = vld [vmem:[%s7783_s13 + $0x1e8] ss:$12 sps:$4 sm:$0xff]   ;;  %s9743_s6 = sld [smem:[#allocation81_spill]] (!%p5529_p4) }
 0x558   : > { %v2627_v55 = vld [vmem:[%s2626_s14] sm:$0x1] }
 0x559   : > { %v2631_v10 = vld [vmem:[%s2630_s2] sm:$0x1]  ;;  %v2628_v5 = vmin.f32 %v2627_v55, %v2625_v20 }
 0x55a   : > { %v2632_v8 = vmax.f32 %v2631_v10, %v2625_v20  ;;  %v6523_v55 = vld [vmem:[%s7783_s13 + $0x1fc] ss:$12 sps:$4 sm:$0xff]   ;;  %v6537_v10 = vld [vmem:[%s7783_s13 + $0x2c0] ss:$12 sps:$4 sm:$0xff]  }
 0x55b   : > { %2629 = vst [vmem:[%s2626_s14] sm:$0x1] %v2628_v5 }
 0x55c   : > { %2633 = vst [vmem:[%s2630_s2] sm:$0x1] %v2632_v8  ;;  %v6528_v8 = vld [vmem:[%s7783_s13 + $0x214] ss:$12 sps:$4 sm:$0xff]  }
 0x562   : > { %v2637_v13 = vld [vmem:[%s2636_s1] sm:$0x1] }
 0x563   : > { %v2641_v46 = vld [vmem:[%s2640_s15] sm:$0x1]  ;;  %v2638_v39 = vmin.f32 %v2637_v13, %v2635_v27 }
 0x564   : > { %v2642_v21 = vmax.f32 %v2641_v46, %v2635_v27  ;;  %v6545_v27 = vld [vmem:[%s7783_s13 + $0x2d8] ss:$12 sps:$4 sm:$0xff]   ;;  %v9685_v46 = vld [vmem:[#allocation55_spill] sm:$0xff] }
 0x565   : > { %2639 = vst [vmem:[%s2636_s1] sm:$0x1] %v2638_v39  ;;  %vm2769_vm14 = vcmp.eq.s32.totalorder %v9685_v46, 1  ;;  %v6526_v39 = vld [vmem:[%s7783_s13 + $0x210] ss:$12 sps:$4 sm:$0xff]   ;;  %v6562_v46 = vld [vmem:[%s7783_s13 + $0x2e8] ss:$12 sps:$4 sm:$0xff]  }
 0x566   : > { %2643 = vst [vmem:[%s2640_s15] sm:$0x1] %v2642_v21  ;;  %v6546_v21 = vld [vmem:[%s7783_s13 + $0x218] ss:$12 sps:$4 sm:$0xff]   ;;  %vm8917_vm15 = vmpackc.low %vm2769_vm14, %vm2768_vm13 }
 0x56c   : > { %v2647_v35 = vld [vmem:[%s2646_s16] sm:$0x1] }
 0x56d   : > { %v2651_v45 = vld [vmem:[%s2650_s0] sm:$0x1]  ;;  %v2648_v51 = vmin.f32 %v2647_v35, %v2645_v25  ;;  %v6532_v35 = vld [vmem:[%s7783_s13 + $0x22c] ss:$12 sps:$4 sm:$0xff]  }
 0x56e   : > { %v2652_v15 = vmax.f32 %v2651_v45, %v2645_v25  ;;  %v6553_v45 = vld [vmem:[%s7783_s13 + $0x2f0] ss:$12 sps:$4 sm:$0xff]  }
 0x56f   : > { %2649 = vst [vmem:[%s2646_s16] sm:$0x1] %v2648_v51 }
 0x570   : > { %2653 = vst [vmem:[%s2650_s0] sm:$0x1] %v2652_v15  ;;  %v6530_v15 = vld [vmem:[%s7783_s13 + $0x228] ss:$12 sps:$4 sm:$0xff]  }
 0x576   : > { %v2657_v52 = vld [vmem:[%s2656_s28] sm:$0x1] }
 0x577   : > { %v2661_v0 = vld [vmem:[%s2660_s23] sm:$0x1]  ;;  %v2658_v50 = vmin.f32 %v2657_v52, %v2655_v26  ;;  %v6536_v52 = vld [vmem:[%s7783_s13 + $0x244] ss:$12 sps:$4 sm:$0xff]  }
 0x578   : > { %v2662_v24 = vmax.f32 %v2661_v0, %v2655_v26  ;;  %v6554_v26 = vld [vmem:[%s7783_s13 + $0x230] ss:$12 sps:$4 sm:$0xff]   ;;  %v8931_v0 = vld [vmem:[%s7776_s12] sm:$0xff]  }
 0x579   : > { %2659 = vst [vmem:[%s2656_s28] sm:$0x1] %v2658_v50 }
 0x57a   : > { %2663 = vst [vmem:[%s2660_s23] sm:$0x1] %v2662_v24 }
 0x580   : > { %v2680_v60 = vld [vmem:[#allocation4] sm:$0xff]  ;;  %v2681_v41 = vld [vmem:[#allocation4 + $0x8] sm:$0xff]  ;;  %v2682_v38 = vld [vmem:[#allocation4 + $0x10] sm:$0xff] }
 0x581   : > { %v5423_v33 = vpack.c.bf16 %v2681_v41, %v2680_v60  ;;  %v2683_v16 = vld [vmem:[#allocation4 + $0x18] sm:$0xff]  ;;  %v2684_v63 = vld [vmem:[#allocation4 + $0x20] sm:$0xff]  ;;  %v2686_v37 = vld [vmem:[#allocation4 + $0x30] sm:$0xff] }
 0x582   : > { %v5426_v43 = vpack.c.bf16 %v2683_v16, %v2682_v38  ;;  %v2688_v13 = vld [vmem:[#allocation4 + $0x40] sm:$0xff]  ;;  %v2690_v50 = vld [vmem:[#allocation4 + $0x50] sm:$0xff]  ;;  %v2691_v24 = vld [vmem:[#allocation4 + $0x58] sm:$0xff] }
 0x583   : > { %5424 = vmatprep.mubr.msk.bf16.mxu1 %vm8846_vm5, %v5423_v33  ;;  %5472 = vmatprep.mubr.msk.bf16.mxu0 %vm8846_vm5, %v5423_v33  ;;  %v9689_v60 = vld [vmem:[#allocation57_spill] sm:$0xff]  ;;  %v9690_v41 = vld [vmem:[#allocation56_spill] sm:$0xff]  ;;  %v5438_v33 = vpack.c.bf16 %v2691_v24, %v2690_v50  ;;  %v6569_v24 = vld [vmem:[%s7776_s12 + $0x28] sm:$0xff]  }
 0x584   : > { %3529 = vmatmul.mubr.bf16.vlgmr.msra.gmra.mrb[40].mxu1 %v8539_v29  ;;  %3755 = vmatmul.mubr.bf16.vlgmr.msra.gmra.mrb[16].mxu0 %v8539_v29  ;;  %v2685_v29 = vld [vmem:[#allocation4 + $0x28] sm:$0xff]  ;;  %vm2770_vm1 = vcmp.eq.s32.totalorder %v9689_v60, 1  ;;  %vm2771_vm0 = vcmp.eq.s32.totalorder %v9690_v41, 1  ;;  %v2798_v60 = vld [vmem:[#allocation5 + $0x30] sm:$0xff]  ;;  %v2799_v41 = vld [vmem:[#allocation5 + $0x38] sm:$0xff] }
 0x585   : > { %5723 = vmatpush3.bf16.msra.mxu0 %v6504_v22  ;;  %5427 = vmatprep.mubr.msk.bf16.mxu1 %vm8857_vm6, %v5426_v43  ;;  %v5429_v34 = vpack.c.bf16 %v2685_v29, %v2684_v63  ;;  %v6534_v38 = vld [vmem:[%s7783_s13 + $0x240] ss:$12 sps:$4 sm:$0xff]   ;;  %v6541_v22 = vld [vmem:[%s7783_s13 + $0x25c] ss:$12 sps:$4 sm:$0xff]   ;;  %vm8938_vm2 = vmpackc.low %vm2771_vm0, %vm2770_vm1 }
 0x586   : > { %3610 = vmatpush1.bf16.msra.mxu1 %v6501_v44  ;;  %5475 = vmatprep.mubr.msk.bf16.mxu0 %vm8857_vm6, %v5426_v43  ;;  %v9693_v44 = vld [vmem:[#allocation61_spill] sm:$0xff]  ;;  %v6539_v43 = vld [vmem:[%s7783_s13 + $0x258] ss:$12 sps:$4 sm:$0xff]  }
 0x587   : > { %3611 = vmatprep.subr.bf16.mxu1 %v6507_v56  ;;  %5724 = vmatprep.subr.bf16.mxu0 %v6508_v59  ;;  %v6544_v56 = vld [vmem:[%s7783_s13 + $0x274] ss:$12 sps:$4 sm:$0xff]   ;;  %v6549_v29 = vld [vmem:[%s7783_s13 + $0x28c] ss:$12 sps:$4 sm:$0xff]  }
 0x588   : > { %v2692_v59 = vld [vmem:[#allocation4 + $0x60] sm:$0xff]  ;;  %v2805_v5 = vld [vmem:[#allocation5 + $0x68] sm:$0xff]  ;;  %v2807_v51 = vld [vmem:[#allocation5 + $0x78] sm:$0xff] }
 0x589   : > { %5725 = vmatpush3.bf16.msra.mxu0 %v6509_v32  ;;  %v2693_v32 = vld [vmem:[#allocation4 + $0x68] sm:$0xff]  ;;  %v9705_v16 = vld [vmem:[#allocation49_spill] sm:$0xff] }
 0x58a   : > { %3612 = vmatpush1.bf16.msra.mxu1 %v6505_v31  ;;  %5726 = vmatprep.subr.bf16.mxu0 %v6516_v30  ;;  %v9694_v31 = vld [vmem:[#allocation59_spill] sm:$0xff]  ;;  %v9695_v30 = vld [vmem:[#allocation58_spill] sm:$0xff]  ;;  %v5441_v63 = vpack.c.bf16 %v2693_v32, %v2692_v59 }
 0x58b   : > { %3613 = vmatprep.subr.bf16.mxu1 %v6512_v6  ;;  %vm2772_vm3 = vcmp.eq.s32.totalorder %v9694_v31, 1  ;;  %vm2773_vm4 = vcmp.eq.s32.totalorder %v9695_v30, 1  ;;  %v6542_v6 = vld [vmem:[%s7783_s13 + $0x270] ss:$12 sps:$4 sm:$0xff]   ;;  %v2801_v59 = vld [vmem:[#allocation5 + $0x48] sm:$0xff] }
 0x58c   : > { %3539 = vmatmul.mubr.bf16.gmra.mrb[44].mxu1 %v8541_v54  ;;  %3763 = vmatmul.mubr.bf16.gmra.mrb[20].mxu0 %v8541_v54  ;;  %v2687_v54 = vld [vmem:[#allocation4 + $0x38] sm:$0xff]  ;;  %vm8954_vm7 = vmpackc.low %vm2773_vm4, %vm2772_vm3  ;;  %v6614_v31 = vld [vmem:[%s7783_s13 + $0x140] ss:$12 sps:$4 sm:$0xff]  }
 0x58d   : > { %5430 = vmatprep.mubr.msk.bf16.mxu1 %vm8877_vm9, %v5429_v34  ;;  %5478 = vmatprep.mubr.msk.bf16.mxu0 %vm8877_vm9, %v5429_v34  ;;  %v5432_v20 = vpack.c.bf16 %v2687_v54, %v2686_v37  ;;  %v6547_v34 = vld [vmem:[%s7783_s13 + $0x288] ss:$12 sps:$4 sm:$0xff]  }
 0x58e   : > { %3614 = vmatpush1.bf16.msra.mxu1 %v6510_v23  ;;  %5727 = vmatpush3.bf16.msra.mxu0 %v6517_v7  ;;  %v9698_v7 = vld [vmem:[#allocation62_spill] sm:$0xff]  ;;  %v9707_v23 = vld [vmem:[#allocation51_spill] sm:$0xff] }
 0x58f   : > { %3615 = vmatprep.subr.bf16.mxu1 %v6515_v11  ;;  %5728 = vmatprep.subr.bf16.mxu0 %v6524_v58  ;;  %v6552_v11 = vld [vmem:[%s7783_s13 + $0x2a4] ss:$12 sps:$4 sm:$0xff]   ;;  %v2756_v58 = vpop.permute.xlu0 %2755  ;;  %v6557_v54 = vld [vmem:[%s7783_s13 + $0x2bc] ss:$12 sps:$4 sm:$0xff]  }
 0x590   : > { %vm2774_vm8 = vcmp.eq.s32.totalorder %v2756_v58, 1  ;;  %v6613_v32 = vld [vmem:[%s7783_s13 + $0x68] ss:$12 sps:$4 sm:$0xff]  }
 0x592   : > { %3616 = vmatpush1.bf16.msra.mxu1 %v6513_v3  ;;  %5729 = vmatpush3.bf16.msra.mxu0 %v6525_v4  ;;  %v2759_v3 = vpop.permute.xlu1 %2758  ;;  %v2694_v4 = vld [vmem:[#allocation4 + $0x70] sm:$0xff] }
 0x593   : > { %3617 = vmatprep.subr.bf16.mxu1 %v6520_v49  ;;  %5730 = vmatprep.subr.bf16.mxu0 %v6529_v1  ;;  %v2695_v49 = vld [vmem:[#allocation4 + $0x78] sm:$0xff]  ;;  %vm2775_vm10 = vcmp.eq.s32.totalorder %v2759_v3, 1  ;;  %v6550_v1 = vld [vmem:[%s7783_s13 + $0x2a0] ss:$12 sps:$4 sm:$0xff]  }
 0x594   : > { %3549 = vmatmul.mubr.bf16.gmra.mrb[48].mxu1 %v8551_v2  ;;  %3771 = vmatmul.mubr.bf16.gmra.mrb[24].mxu0 %v8551_v2  ;;  %v2689_v2 = vld [vmem:[#allocation4 + $0x48] sm:$0xff]  ;;  %v8967_v37 = vpack.c.bf16 %v2695_v49, %v2694_v4  ;;  %vm8970_vm11 = vmpackc.low %vm2775_vm10, %vm2774_vm8  ;;  %v2806_v3 = vld [vmem:[#allocation5 + $0x70] sm:$0xff] }
 0x595   : > { %5433 = vmatprep.mubr.msk.bf16.mxu1 %vm8897_vm12, %v5432_v20  ;;  %5481 = vmatprep.mubr.msk.bf16.mxu0 %vm8897_vm12, %v5432_v20  ;;  %v5435_v25 = vpack.c.bf16 %v2689_v2, %v2688_v13  ;;  %v6555_v20 = vld [vmem:[%s7783_s13 + $0x2b8] ss:$12 sps:$4 sm:$0xff]   ;;  %v6565_v13 = vld [vmem:[%s7776_s12 + $0x8] sm:$0xff]   ;;  %v5468_v4 = vpack.c.bf16 %v2807_v51, %v2806_v3 }
 0x596   : > { %3618 = vmatpush1.bf16.msra.mxu1 %v6518_v14  ;;  %5731 = vmatpush3.bf16.msra.mxu0 %v6533_v42  ;;  %v9701_v42 = vld [vmem:[#allocation63_spill] sm:$0xff]  ;;  %v9702_v2 = vld [vmem:[#allocation64_spill] sm:$0xff] }
 0x597   : > { %3619 = vmatprep.subr.bf16.mxu1 %v6523_v55  ;;  %5732 = vmatprep.subr.bf16.mxu0 %v6537_v10  ;;  %v6561_v55 = vld [vmem:[%s7783_s13 + $0x2d4] ss:$12 sps:$4 sm:$0xff]  }
 0x598   : > { %v2792_v10 = vld [vmem:[#allocation5] sm:$0xff]  ;;  %v9704_v49 = vld [vmem:[#allocation48_spill] sm:$0xff] }
 0x59a   : > { %3620 = vmatpush1.bf16.msra.mxu1 %v6521_v17  ;;  %5733 = vmatpush3.bf16.msra.mxu0 %v6538_v18  ;;  %v2793_v17 = vld [vmem:[#allocation5 + $0x8] sm:$0xff]  ;;  %v6559_v18 = vld [vmem:[%s7783_s13 + $0x2d0] ss:$12 sps:$4 sm:$0xff]  }
 0x59b   : > { %3621 = vmatprep.subr.bf16.mxu1 %v6528_v8  ;;  %5734 = vmatprep.subr.bf16.mxu0 %v6545_v27  ;;  %v5447_v8 = vpack.c.bf16 %v2793_v17, %v2792_v10  ;;  %v6564_v27 = vld [vmem:[%s7783_s13 + $0x2ec] ss:$12 sps:$4 sm:$0xff]  }
 0x59c   : > { %3559 = vmatmul.mubr.bf16.gmra.mrb[52].mxu1 %v9688_v53  ;;  %3779 = vmatmul.mubr.bf16.gmra.mrb[28].mxu0 %v9688_v53  ;;  %v6567_v53 = vld [vmem:[%s7776_s12 + $0x18] sm:$0xff]  }
 0x59d   : > { %5436 = vmatprep.mubr.msk.bf16.mxu1 %vm8917_vm15, %v5435_v25  ;;  %5484 = vmatprep.mubr.msk.bf16.mxu0 %vm8917_vm15, %v5435_v25  ;;  %v2795_v25 = vld [vmem:[#allocation5 + $0x18] sm:$0xff] }
 0x59e   : > { %3622 = vmatpush1.bf16.msra.mxu1 %v6526_v39  ;;  %5735 = vmatpush3.bf16.msra.mxu0 %v6546_v21  ;;  %v6566_v39 = vld [vmem:[%s7776_s12 + $0x10] sm:$0xff]  }
 0x59f   : > { %3623 = vmatprep.subr.bf16.mxu1 %v6532_v35  ;;  %5736 = vmatprep.subr.bf16.mxu0 %v6553_v45  ;;  %v2794_v21 = vld [vmem:[#allocation5 + $0x10] sm:$0xff] }
 0x5a0   : > { %v5450_v35 = vpack.c.bf16 %v2795_v25, %v2794_v21  ;;  %v6604_v45 = vld [vmem:[%s7783_s13 + $0xc8] ss:$12 sps:$4 sm:$0xff]  }
 0x5a2   : > { %3624 = vmatpush1.bf16.msra.mxu1 %v6530_v15  ;;  %5737 = vmatpush3.bf16.msra.mxu0 %v6554_v26  ;;  %v2797_v15 = vld [vmem:[#allocation5 + $0x28] sm:$0xff] }
 0x5a3   : > { %3625 = vmatprep.subr.bf16.mxu1 %v6536_v52  ;;  %6022 = vmatprep.subr.bf16.mxu0 %v8931_v0  ;;  %v6605_v26 = vld [vmem:[%s7783_s13 + $0x8] ss:$12 sps:$4 sm:$0xff]   ;;  %v6568_v52 = vld [vmem:[%s7776_s12 + $0x20] sm:$0xff]  }
 0x5a4   : > { %3569 = vmatmul.mubr.bf16.gmra.mrb[56].mxu1 %v9693_v44  ;;  %3787 = vmatmul.mubr.bf16.gmra.mrb[32].mxu0 %v9693_v44  ;;  %v5456_v44 = vpack.c.bf16 %v2799_v41, %v2798_v60 }
 0x5a5   : > { %5439 = vmatprep.mubr.msk.bf16.mxu1 %vm8938_vm2, %v5438_v33  ;;  %5487 = vmatprep.mubr.msk.bf16.mxu0 %vm8938_vm2, %v5438_v33  ;;  %v6570_v33 = vld [vmem:[%s7776_s12 + $0x30] sm:$0xff]  }
 0x5a6   : > { %3626 = vmatpush1.bf16.msra.mxu1 %v6534_v38  ;;  %v6609_v38 = vld [vmem:[%s7783_s13 + $0x38] ss:$12 sps:$4 sm:$0xff]  }
 0x5a7   : > { %3627 = vmatprep.subr.bf16.mxu1 %v6541_v22  ;;  %v6610_v22 = vld [vmem:[%s7783_s13 + $0x110] ss:$12 sps:$4 sm:$0xff]  }
 0x5aa   : > { %3628 = vmatpush1.bf16.msra.mxu1 %v6539_v43  ;;  %v6571_v43 = vld [vmem:[%s7776_s12 + $0x38] sm:$0xff]  }
 0x5ab   : > { %3629 = vmatprep.subr.bf16.mxu1 %v6544_v56  ;;  %v2800_v56 = vld [vmem:[#allocation5 + $0x40] sm:$0xff] }
 0x5ac   : > { %3579 = vmatmul.mubr.bf16.gmra.mrb[60].mxu1 %v9698_v7  ;;  %3795 = vmatmul.mubr.bf16.gmra.mrb[36].mxu0 %v9698_v7  ;;  %v5459_v30 = vpack.c.bf16 %v2801_v59, %v2800_v56  ;;  %v6618_v7 = vld [vmem:[%s7783_s13 + $0x170] ss:$12 sps:$4 sm:$0xff]  }
 0x5ad   : > { %5442 = vmatprep.mubr.msk.bf16.mxu1 %vm8954_vm7, %v5441_v63  ;;  %5490 = vmatprep.mubr.msk.bf16.mxu0 %vm8954_vm7, %v5441_v63  ;;  %v2803_v63 = vld [vmem:[#allocation5 + $0x58] sm:$0xff] }
 0x5ae   : > { %3630 = vmatpush1.bf16.msra.mxu1 %v6542_v6  ;;  %v6616_v6 = vld [vmem:[%s7783_s13 + $0x158] ss:$12 sps:$4 sm:$0xff]  }
 0x5af   : > { %3631 = vmatprep.subr.bf16.mxu1 %v6549_v29  ;;  %v6617_v29 = vld [vmem:[%s7783_s13 + $0x98] ss:$12 sps:$4 sm:$0xff]  }
 0x5b2   : > { %3632 = vmatpush1.bf16.msra.mxu1 %v6547_v34 }
 0x5b3   : > { %3633 = vmatprep.subr.bf16.mxu1 %v6552_v11  ;;  %v6619_v11 = vld [vmem:[%s7783_s13 + $0xb0] ss:$12 sps:$4 sm:$0xff]  }
 0x5b4   : > { %3589 = vmatmul.mubr.bf16.gmra.mrb[64].mxu1 %v9701_v42  ;;  %3803 = vmatmul.mubr.bf16.gmra.mrb[40].mxu0 %v9701_v42 }
 0x5b5   : > { %5445 = vmatprep.mubr.msk.bf16.mxu1 %vm8970_vm11, %v8967_v37  ;;  %3851 = vmatprep.mubr.bf16.mxu0 %v8740_v28 }
 0x5b6   : > { %3634 = vmatpush1.bf16.msra.mxu1 %v6550_v1  ;;  %v9708_v1 = vld [vmem:[#allocation52_spill] sm:$0xff] }
 0x5b7   : > { %3635 = vmatprep.subr.bf16.mxu1 %v6557_v54  ;;  %v9710_v54 = vld [vmem:[#allocation54_spill] sm:$0xff] }
 0x5ba   : > { %3636 = vmatpush1.bf16.msra.mxu1 %v6555_v20 }
 0x5bb   : > { %3637 = vmatprep.subr.bf16.mxu1 %v6561_v55 }
 0x5bc   : > { %3599 = vmatmul.mubr.bf16.gmra.mrb[68].mxu1 %v9702_v2  ;;  %5496 = vmatmul.mubr.msk.bf16.vlgmr.msra.gmra.mrb[44].mxu0 %vm8846_vm5, %v5447_v8 }
 0x5bd   : > { %6023 = vmatpush3.bf16.msra.mxu0 %v8931_v0  ;;  %3641 = vmatprep.mubr.bf16.mxu1 %v8740_v28  ;;  %v2796_v28 = vld [vmem:[#allocation5 + $0x20] sm:$0xff] }
 0x5be   : > { %3638 = vmatpush1.bf16.msra.mxu1 %v6559_v18  ;;  %3859 = vmatprep.mubr.bf16.mxu0 %v8763_v47  ;;  %v6606_v0 = vld [vmem:[%s7783_s13 + $0xe0] ss:$12 sps:$4 sm:$0xff]   ;;  %v5453_v50 = vpack.c.bf16 %v2797_v15, %v2796_v28 }
 0x5bf   : > { %3639 = vmatprep.subr.bf16.mxu1 %v6564_v27  ;;  %6024 = vmatprep.subr.bf16.mxu0 %v6565_v13 }
 0x5c1   : > { %6025 = vmatpush3.bf16.msra.mxu0 %v6565_v13 }
 0x5c2   : > { %3640 = vmatpush1.bf16.msra.mxu1 %v6562_v46  ;;  %6026 = vmatprep.subr.bf16.mxu0 %v6566_v39 }
 0x5c3   : > { %6205 = vmatprep.subr.bf16.mxu1 %v6604_v45 }
 0x5c4   : > { %5499 = vmatmul.mubr.msk.bf16.gmra.mrb[48].mxu0 %vm8857_vm6, %v5450_v35 }
 0x5c5   : > { %5448 = vmatmul.mubr.msk.bf16.vlgmr.msra.gmra.mrb[40].mxu1 %vm8846_vm5, %v5447_v8  ;;  %3867 = vmatprep.mubr.bf16.mxu0 %v8776_v57  ;;  %vm7173_vm5 = vmmov (!%p5529_p4), 0  }
 0x5c6   : > { %3651 = vmatprep.mubr.bf16.mxu1 %v8763_v47  ;;  %6027 = vmatpush3.bf16.msra.mxu0 %v6566_v39  ;;  %v6608_v47 = vld [vmem:[%s7783_s13 + $0xf8] ss:$12 sps:$4 sm:$0xff]  }
 0x5c7   : > { %6213 = vmatpush3.bf16.msra.mxu1 %v6605_v26  ;;  %6028 = vmatprep.subr.bf16.mxu0 %v6567_v53 }
 0x5c8   : > { %6206 = vmatprep.subr.bf16.mxu1 %v6606_v0  ;;  %v9079_v0 = vpop.permute.xlu0 %4079 }
 0x5ca   : > { %6029 = vmatpush3.bf16.msra.mxu0 %v6567_v53 }
 0x5cb   : > { %6214 = vmatpush3.bf16.msra.mxu1 %v6607_v12  ;;  %6030 = vmatprep.subr.bf16.mxu0 %v6568_v52 }
 0x5cc   : > { %5502 = vmatmul.mubr.msk.bf16.gmra.mrb[52].mxu0 %vm8877_vm9, %v5453_v50  ;;  %6207 = vmatprep.subr.bf16.mxu1 %v6608_v47  ;;  %v9085_v60 = vpop.permute.xlu0 %4089 }
 0x5cd   : > { %5451 = vmatmul.mubr.msk.bf16.gmra.mrb[44].mxu1 %vm8857_vm6, %v5450_v35  ;;  %3875 = vmatprep.mubr.bf16.mxu0 %v8791_v62 }
 0x5ce   : > { %3661 = vmatprep.mubr.bf16.mxu1 %v8776_v57  ;;  %6031 = vmatpush3.bf16.msra.mxu0 %v6568_v52  ;;  %v6612_v57 = vld [vmem:[%s7783_s13 + $0x128] ss:$12 sps:$4 sm:$0xff]  }
 0x5cf   : > { %6215 = vmatpush3.bf16.msra.mxu1 %v6609_v38  ;;  %6032 = vmatprep.subr.bf16.mxu0 %v6569_v24 }
 0x5d0   : > { %6208 = vmatprep.subr.bf16.mxu1 %v6610_v22 }
 0x5d2   : > { %6033 = vmatpush3.bf16.msra.mxu0 %v6569_v24  ;;  %v9083_v24 = vpop.permute.xlu1 %4084 }
 0x5d3   : > { %6216 = vmatpush3.bf16.msra.mxu1 %v6611_v40  ;;  %6034 = vmatprep.subr.bf16.mxu0 %v6570_v33  ;;  %v9093_v40 = vpop.permute.xlu0 %4099 }
 0x5d4   : > { %5505 = vmatmul.mubr.msk.bf16.gmra.mrb[56].mxu0 %vm8897_vm12, %v5456_v44  ;;  %6209 = vmatprep.subr.bf16.mxu1 %v6612_v57 }
 0x5d5   : > { %5454 = vmatmul.mubr.msk.bf16.gmra.mrb[48].mxu1 %vm8877_vm9, %v5453_v50  ;;  %3883 = vmatprep.mubr.bf16.mxu0 %v8810_v19 }
 0x5d6   : > { %3671 = vmatprep.mubr.bf16.mxu1 %v8791_v62  ;;  %6035 = vmatpush3.bf16.msra.mxu0 %v6570_v33  ;;  %v2802_v62 = vld [vmem:[#allocation5 + $0x50] sm:$0xff] }
 0x5d7   : > { %6217 = vmatpush3.bf16.msra.mxu1 %v6613_v32  ;;  %6036 = vmatprep.subr.bf16.mxu0 %v6571_v43  ;;  %v5462_v34 = vpack.c.bf16 %v2803_v63, %v2802_v62 }
 0x5d8   : > { %6210 = vmatprep.subr.bf16.mxu1 %v6614_v31 }
 0x5da   : > { %6037 = vmatpush3.bf16.msra.mxu0 %v6571_v43 }
 0x5db   : > { %6218 = vmatpush3.bf16.msra.mxu1 %v6615_v48  ;;  %v9101_v48 = vpop.permute.xlu0 %4109 }
 0x5dc   : > { %5508 = vmatmul.mubr.msk.bf16.gmra.mrb[60].mxu0 %vm8917_vm15, %v5459_v30  ;;  %6211 = vmatprep.subr.bf16.mxu1 %v6616_v6 }
 0x5dd   : > { %5457 = vmatmul.mubr.msk.bf16.gmra.mrb[52].mxu1 %vm8897_vm12, %v5456_v44  ;;  %3891 = vmatprep.mubr.bf16.mxu0 %v8819_v36  ;;  %v9091_v44 = vpop.permute.xlu1 %4094 }
 0x5de   : > { %3681 = vmatprep.mubr.bf16.mxu1 %v8810_v19  ;;  %v2804_v19 = vld [vmem:[#allocation5 + $0x60] sm:$0xff] }
 0x5df   : > { %6219 = vmatpush3.bf16.msra.mxu1 %v6617_v29  ;;  %v5465_v58 = vpack.c.bf16 %v2805_v5, %v2804_v19 }
 0x5e0   : > { %6212 = vmatprep.subr.bf16.mxu1 %v6618_v7 }
 0x5e3   : > { %6220 = vmatpush3.bf16.msra.mxu1 %v6619_v11  ;;  %v9107_v11 = vpop.permute.xlu0 %4119 }
 0x5e4   : > { %5511 = vmatmul.mubr.msk.bf16.gmra.mrb[64].mxu0 %vm8938_vm2, %v5462_v34 }
 0x5e5   : > { %5460 = vmatmul.mubr.msk.bf16.gmra.mrb[56].mxu1 %vm8917_vm15, %v5459_v30  ;;  %3899 = vmatprep.mubr.bf16.mxu0 %v8830_v61  ;;  %v9099_v30 = vpop.permute.xlu1 %4104 }
 0x5e6   : > { %3691 = vmatprep.mubr.bf16.mxu1 %v8819_v36  ;;  %v9703_v36 = vld [vmem:[#allocation47_spill] sm:$0xff] }
 0x5e7   : > { %v9113_v51 = vpop.permute.xlu0 %4129 }
 0x5e9   : > { %v9105_v7 = vpop.permute.xlu1 %4114 }
 0x5ec   : > { %5514 = vmatmul.mubr.msk.bf16.gmra.mrb[68].mxu0 %vm8954_vm7, %v5465_v58 }
 0x5ed   : > { %5463 = vmatmul.mubr.msk.bf16.gmra.mrb[60].mxu1 %vm8938_vm2, %v5462_v34  ;;  %3907 = vmatprep.mubr.bf16.mxu0 %v8839_v9 }
 0x5ee   : > { %3701 = vmatprep.mubr.bf16.mxu1 %v8830_v61  ;;  %v9706_v61 = vld [vmem:[#allocation50_spill] sm:$0xff] }
 0x5f4   : > { %5517 = vmatmul.mubr.msk.bf16.gmra.mrb[72].mxu0 %vm8970_vm11, %v5468_v4 }
 0x5f5   : > { %5466 = vmatmul.mubr.msk.bf16.gmra.mrb[64].mxu1 %vm8954_vm7, %v5465_v58  ;;  %6038 = vmatprep.mubr.bf16.mxu0 %v9703_v36  ;;  %v9111_v58 = vpop.permute.xlu1 %4124 }
 0x5f6   : > { %3711 = vmatprep.mubr.bf16.mxu1 %v8839_v9  ;;  %v9709_v9 = vld [vmem:[#allocation53_spill] sm:$0xff] }
 0x5fc   : > { %6039 = vmatmul.mubr.bf16.vlgmr.msra.gmra.mrb[76].mxu0 %v9704_v49 }
 0x5fd   : > { %5469 = vmatmul.mubr.msk.bf16.gmra.mrb[68].mxu1 %vm8970_vm11, %v5468_v4  ;;  %6042 = vmatprep.mubr.bf16.mxu0 %v9705_v16 }
 0x5fe   : > { %5493 = vmatprep.mubr.msk.bf16.mxu1 %vm8970_vm11, %v8967_v37 }
 0x604   : > { %6043 = vmatmul.mubr.bf16.gmra.mrb[80].mxu0 %v9706_v61 }
 0x605   : > { %3811 = vmatmul.mubr.bf16.vlgmr.msra.gmra.mrb[72].mxu1 %v9702_v2  ;;  %6046 = vmatprep.mubr.bf16.mxu0 %v9707_v23 }
 0x60c   : > { %6047 = vmatmul.mubr.bf16.gmra.mrb[84].mxu0 %v9708_v1  ;;  %v9119_v1 = vpop.permute.xlu1 %4134 }
 0x60d   : > { %6050 = vmatprep.mubr.bf16.mxu0 %v9709_v9  ;;  %9711 = vst [vmem:[#allocation55_spill] sm:$0xff] %v9119_v1  ;;  %v9121_v9 = vpop.permute.xlu0 %4139 }
 0x60e   : > { %9712 = vst [vmem:[#allocation60_spill] sm:$0xff] %v9121_v9 }
 0x614   : > { %6051 = vmatmul.mubr.bf16.gmra.mrb[88].mxu0 %v9710_v54 }
 0x657   : > { %v5674_v42 = vpop.f32.mrb[16].mxu0 }
 0x658   : > { %v5675_v20 = vpop.f32.mrb[17].mxu0 }
 0x659   : > { %v5676_v55 = vadd.f32 %v5675_v20, %v5674_v42  ;;  %v5677_v10 = vpop.f32.mrb[18].mxu0 }
 0x65a   : > { %v5678_v17 = vpop.f32.mrb[19].mxu0 }
 0x65b   : > { %v5679_v18 = vadd.f32 %v5678_v17, %v5677_v10 }
 0x65f   : > { %v5680_v14 = vpop.f32.mrb[20].mxu0 }
 0x660   : > { %v5681_v37 = vpop.f32.mrb[21].mxu0 }
 0x661   : > { %v9069_v8 = vadd.f32 %v5681_v37, %v5680_v14  ;;  %v5683_v27 = vpop.f32.mrb[22].mxu0 }
 0x662   : > { %v5684_v13 = vpop.f32.mrb[23].mxu0 }
 0x663   : > { %v9071_v2 = vadd.f32 %v5684_v13, %v5683_v27 }
 0x667   : > { %v5686_v46 = vpop.f32.mrb[24].mxu0 }
 0x668   : > { %v5687_v39 = vpop.f32.mrb[25].mxu0 }
 0x669   : > { %v9073_v21 = vadd.f32 %v5687_v39, %v5686_v46  ;;  %v5689_v25 = vpop.f32.mrb[26].mxu0  ;;  %v9137_v39 = vpop.permute.xlu1 %4144 }
 0x66a   : > { %v5690_v35 = vpop.f32.mrb[27].mxu0  ;;  %9713 = vst [vmem:[#allocation57_spill] sm:$0xff] %v9137_v39 }
 0x66b   : > { %v9075_v45 = vadd.f32 %v5690_v35, %v5689_v25  ;;  %v9139_v25 = vpop.permute.xlu0 %4149 }
 0x66c   : > { %9714 = vst [vmem:[#allocation56_spill] sm:$0xff] %v9139_v25 }
 0x66f   : > { %v5692_v53 = vpop.f32.mrb[28].mxu0 }
 0x670   : > { %v5693_v28 = vpop.f32.mrb[29].mxu0 }
 0x671   : > { %v9077_v15 = vadd.f32 %v5693_v28, %v5692_v53  ;;  %v5695_v26 = vpop.f32.mrb[30].mxu0 }
 0x672   : > { %v5696_v52 = vpop.f32.mrb[31].mxu0 }
 0x673   : > { %v9081_v50 = vadd.f32 %v5696_v52, %v5695_v26 }
 0x677   : > { %v5698_v12 = vpop.f32.mrb[32].mxu0 }
 0x678   : > { %v5699_v47 = vpop.f32.mrb[33].mxu0 }
 0x679   : > { %v9087_v41 = vadd.f32 %v5699_v47, %v5698_v12  ;;  %v5701_v38 = vpop.f32.mrb[34].mxu0 }
 0x67a   : > { %v5702_v33 = vpop.f32.mrb[35].mxu0 }
 0x67b   : > { %v9089_v22 = vadd.f32 %v5702_v33, %v5701_v38 }
 0x67f   : > { %v5704_v43 = vpop.f32.mrb[36].mxu0 }
 0x680   : > { %v5705_v57 = vpop.f32.mrb[37].mxu0 }
 0x681   : > { %v9095_v56 = vadd.f32 %v5705_v57, %v5704_v43  ;;  %v5707_v59 = vpop.f32.mrb[38].mxu0  ;;  %v9155_v57 = vpop.permute.xlu1 %4154 }
 0x682   : > { %v5708_v32 = vpop.f32.mrb[39].mxu0  ;;  %9715 = vst [vmem:[#allocation61_spill] sm:$0xff] %v9155_v57 }
 0x683   : > { %v9097_v31 = vadd.f32 %v5708_v32, %v5707_v59  ;;  %v9157_v59 = vpop.permute.xlu0 %4191 }
 0x687   : > { %v5710_v6 = vpop.f32.mrb[40].mxu0 }
 0x688   : > { %v5711_v62 = vpop.f32.mrb[41].mxu0 }
 0x689   : > { %v9103_v63 = vadd.f32 %v5711_v62, %v5710_v6  ;;  %v5713_v29 = vpop.f32.mrb[42].mxu0 }
 0x68a   : > { %v5714_v34 = vpop.f32.mrb[43].mxu0 }
 0x68b   : > { %v9109_v19 = vadd.f32 %v5714_v34, %v5713_v29 }
 0x68f   : > { %v5738_v5 = vpop.f32.mrb[44].mxu0 }
 0x690   : > { %v5739_v3 = vpop.f32.mrb[45].mxu0 }
 0x691   : > { %v5740_v4 = vadd.f32 %v5739_v3, %v5738_v5  ;;  %v5741_v36 = vpop.f32.mrb[46].mxu0 }
 0x692   : > { %v5742_v49 = vpop.f32.mrb[47].mxu0 }
 0x693   : > { %v9115_v16 = vadd.f32 %v5740_v4, %v5676_v55  ;;  %v5743_v61 = vadd.f32 %v5742_v49, %v5741_v36 }
 0x695   : > { %v9117_v23 = vadd.f32 %v5743_v61, %v5679_v18  ;;  %v4197_v61 = vpop.permute.xlu1 %4196 }
 0x697   : > { %v5744_v54 = vpop.f32.mrb[48].mxu0 }
 0x698   : > { %v9123_v42 = vpop.f32.mrb[40].mxu1  ;;  %v5745_v20 = vpop.f32.mrb[49].mxu0 }
 0x699   : > { %v9125_v10 = vpop.f32.mrb[41].mxu1  ;;  %v5746_v17 = vadd.f32 %v5745_v20, %v5744_v54  ;;  %v5747_v14 = vpop.f32.mrb[50].mxu0 }
 0x69a   : > { %v9127_v37 = vpop.f32.mrb[42].mxu1  ;;  %v5748_v27 = vpop.f32.mrb[51].mxu0 }
 0x69b   : > { %v9130_v55 = vadd.f32 %v5746_v17, %v9069_v8  ;;  %v9132_v18 = vpop.f32.mrb[43].mxu1  ;;  %v5749_v13 = vadd.f32 %v5748_v27, %v5747_v14  ;;  %v4202_v54 = vpop.permute.xlu0 %4201 }
 0x69d   : > { %v9135_v46 = vadd.f32 %v5749_v13, %v9071_v2 }
 0x69f   : > { %v5750_v35 = vpop.f32.mrb[52].mxu0 }
 0x6a0   : > { %v9141_v53 = vpop.f32.mrb[44].mxu1  ;;  %v5751_v28 = vpop.f32.mrb[53].mxu0 }
 0x6a1   : > { %v9143_v26 = vpop.f32.mrb[45].mxu1  ;;  %v5752_v52 = vadd.f32 %v5751_v28, %v5750_v35  ;;  %v5753_v12 = vpop.f32.mrb[54].mxu0 }
 0x6a2   : > { %v9145_v8 = vpop.f32.mrb[46].mxu1  ;;  %v5754_v47 = vpop.f32.mrb[55].mxu0 }
 0x6a3   : > { %v9148_v38 = vadd.f32 %v5752_v52, %v9073_v21  ;;  %v9150_v2 = vpop.f32.mrb[47].mxu1  ;;  %v5755_v33 = vadd.f32 %v5754_v47, %v5753_v12 }
 0x6a5   : > { %v9153_v43 = vadd.f32 %v5755_v33, %v9075_v45  ;;  %v4207_v33 = vpop.permute.xlu1 %4206 }
 0x6a7   : > { %v5756_v32 = vpop.f32.mrb[56].mxu0 }
 0x6a8   : > { %v9159_v6 = vpop.f32.mrb[48].mxu1  ;;  %v5757_v62 = vpop.f32.mrb[57].mxu0 }
 0x6a9   : > { %9716 = vst [vmem:[#allocation59_spill] sm:$0xff] %v9159_v6  ;;  %v9161_v29 = vpop.f32.mrb[49].mxu1  ;;  %v5758_v34 = vadd.f32 %v5757_v62, %v5756_v32  ;;  %v5759_v5 = vpop.f32.mrb[58].mxu0 }
 0x6aa   : > { %v9163_v21 = vpop.f32.mrb[50].mxu1  ;;  %v5760_v3 = vpop.f32.mrb[59].mxu0 }
 0x6ab   : > { %9717 = vst [vmem:[#allocation58_spill] sm:$0xff] %v9163_v21  ;;  %v9166_v4 = vadd.f32 %v5758_v34, %v9077_v15  ;;  %v9168_v45 = vpop.f32.mrb[51].mxu1  ;;  %v5761_v36 = vadd.f32 %v5760_v3, %v5759_v5  ;;  %v4212_v32 = vpop.permute.xlu0 %4211 }
 0x6ad   : > { %v9171_v49 = vadd.f32 %v5761_v36, %v9081_v50 }
 0x6af   : > { %v5762_v20 = vpop.f32.mrb[60].mxu0  ;;  %v4222_v21 = vpop.permute.xlu0 %4221 }
 0x6b0   : > { %v9173_v17 = vpop.f32.mrb[52].mxu1  ;;  %v5763_v14 = vpop.f32.mrb[61].mxu0 }
 0x6b1   : > { %9718 = vst [vmem:[#allocation62_spill] sm:$0xff] %v9173_v17  ;;  %v9175_v27 = vpop.f32.mrb[53].mxu1  ;;  %v5764_v13 = vadd.f32 %v5763_v14, %v5762_v20  ;;  %v5765_v35 = vpop.f32.mrb[62].mxu0 }
 0x6b2   : > { %v9177_v28 = vpop.f32.mrb[54].mxu1  ;;  %v5766_v15 = vpop.f32.mrb[63].mxu0 }
 0x6b3   : > { %9719 = vst [vmem:[#allocation63_spill] sm:$0xff] %v9177_v28  ;;  %v9180_v52 = vadd.f32 %v5764_v13, %v9087_v41  ;;  %v9182_v12 = vpop.f32.mrb[55].mxu1  ;;  %v5767_v50 = vadd.f32 %v5766_v15, %v5765_v35  ;;  %v4232_v17 = vpop.permute.xlu0 %4231 }
 0x6b5   : > { %v9185_v47 = vadd.f32 %v5767_v50, %v9089_v22  ;;  %v4217_v50 = vpop.permute.xlu1 %4216 }
 0x6b7   : > { %v5768_v62 = vpop.f32.mrb[64].mxu0 }
 0x6b8   : > { %v9187_v34 = vpop.f32.mrb[56].mxu1  ;;  %v5769_v5 = vpop.f32.mrb[65].mxu0 }
 0x6b9   : > { %9720 = vst [vmem:[#allocation64_spill] sm:$0xff] %v9187_v34  ;;  %v9189_v3 = vpop.f32.mrb[57].mxu1  ;;  %v5770_v36 = vadd.f32 %v5769_v5, %v5768_v62  ;;  %v5771_v20 = vpop.f32.mrb[66].mxu0 }
 0x6ba   : > { %v9191_v14 = vpop.f32.mrb[58].mxu1  ;;  %v5772_v41 = vpop.f32.mrb[67].mxu0 }
 0x6bb   : > { %9721 = vst [vmem:[#allocation47_spill] sm:$0xff] %v9191_v14  ;;  %v9194_v13 = vadd.f32 %v5770_v36, %v9095_v56  ;;  %v9196_v35 = vpop.f32.mrb[59].mxu1  ;;  %v5773_v22 = vadd.f32 %v5772_v41, %v5771_v20 }
 0x6bd   : > { %v9199_v15 = vadd.f32 %v5773_v22, %v9097_v31  ;;  %v4227_v22 = vpop.permute.xlu1 %4226 }
 0x6bf   : > { %v5774_v34 = vpop.f32.mrb[68].mxu0 }
 0x6c0   : > { %v9201_v28 = vpop.f32.mrb[60].mxu1  ;;  %v5775_v6 = vpop.f32.mrb[69].mxu0 }
 0x6c1   : > { %9722 = vst [vmem:[#allocation48_spill] sm:$0xff] %v9201_v28  ;;  %v9203_v62 = vpop.f32.mrb[61].mxu1  ;;  %v5776_v5 = vadd.f32 %v5775_v6, %v5774_v34  ;;  %v5777_v14 = vpop.f32.mrb[70].mxu0 }
 0x6c2   : > { %v9205_v57 = vpop.f32.mrb[62].mxu1  ;;  %v5778_v56 = vpop.f32.mrb[71].mxu0 }
 0x6c3   : > { %9723 = vst [vmem:[#allocation49_spill] sm:$0xff] %v9205_v57  ;;  %v9208_v36 = vadd.f32 %v5776_v5, %v9103_v63  ;;  %v9210_v20 = vpop.f32.mrb[63].mxu1  ;;  %v5779_v31 = vadd.f32 %v5778_v56, %v5777_v14  ;;  %v4237_v14 = vpop.permute.xlu1 %4236  ;;  %v4270_v56 = vmul.f32 %v4197_v61, %v9117_v23 }
 0x6c5   : > { %v9213_v41 = vadd.f32 %v5779_v31, %v9109_v19  ;;  %v4269_v19 = vmul.f32 %v9157_v59, %v9115_v16  ;;  %v4157_v31 = vmul.f32 %v9079_v0, %v9125_v10  ;;  %v4160_v16 = vmul.f32 %v9091_v44, %v9150_v2 }
 0x6c6   : > { %v9240_v0 = vmul.f32 %v4217_v50, %v9153_v43  ;;  %v9244_v10 = vmul.f32 %v9093_v40, %v9161_v29  ;;  %v9254_v44 = vmul.f32 %v4222_v21, %v9166_v4  ;;  %v4163_v40 = vmul.f32 %v9101_v48, %v9175_v27  ;;  %v9281_v4 = vld [vmem:[%s847_s22] ss:$0 sm:$0xff]  ;;  %s9742_s22 = sld [smem:[#allocation71_spill]] (!%p5529_p4) }
 0x6c7   : > { %9724 = vst [vmem:[#allocation50_spill] sm:$0xff] %v9213_v41  ;;  %v5780_v28 = vpop.f32.mrb[72].mxu0  ;;  %v4271_v41 = vmul.f32 %v4202_v54, %v9130_v55  ;;  %v9263_v2 = vmul.f32 %v4232_v17, %v9180_v52  ;;  %v9273_v48 = vmul.f32 %v4237_v14, %v9185_v47  ;;  %v4247_v61 = vpop.permute.xlu1 %4246 }
 0x6c8   : > { %v9215_v25 = vpop.f32.mrb[64].mxu1  ;;  %v5781_v39 = vpop.f32.mrb[73].mxu0  ;;  %v9292_v52 = vmul.f32 %v4247_v61, %v9199_v15  ;;  %v9727_v15 = vld [vmem:[#allocation60_spill] sm:$0xff] }
 0x6c9   : > { %v3705_v6 = vpop.f32.mrb[65].mxu1  ;;  %v9217_v34 = vadd.f32 %v5781_v39, %v5780_v28  ;;  %v5783_v57 = vpop.f32.mrb[74].mxu0  ;;  %v4158_v39 = vmul.f32 %v9083_v24, %v9132_v18  ;;  %v9248_v24 = vmul.f32 %v9099_v30, %v9168_v45 }
 0x6ca   : > { %v9219_v9 = vpop.f32.mrb[66].mxu1  ;;  %v5784_v63 = vpop.f32.mrb[75].mxu0  ;;  %v9311_v50 = vmul.f32 %v9727_v15, %v3705_v6  ;;  %v9730_v6 = vld [vmem:[#allocation62_spill] sm:$0xff] }
 0x6cb   : > { %9725 = vst [vmem:[#allocation51_spill] sm:$0xff] %v9219_v9  ;;  %v3709_v5 = vpop.f32.mrb[67].mxu1  ;;  %v9221_v1 = vadd.f32 %v5784_v63, %v5783_v57  ;;  %v4242_v28 = vpop.permute.xlu0 %4241  ;;  %v4272_v9 = vmul.f32 %v4207_v33, %v9135_v46  ;;  %v4159_v57 = vmul.f32 %v9085_v60, %v9143_v26  ;;  %v9235_v63 = vmul.f32 %v4212_v32, %v9148_v38 }
 0x6cc   : > { %v9257_v46 = vmul.f32 %v4227_v22, %v9171_v49  ;;  %v9285_v54 = vmul.f32 %v4242_v28, %v9194_v13 }
 0x6cf   : > { %v6040_v23 = vpop.f32.mrb[76].mxu0 }
 0x6d0   : > { %v9250_v55 = vpop.f32.mrb[68].mxu1  ;;  %v4023_v60 = vadd.f32 %v6040_v23, %v9141_v53  ;;  %v4014_v18 = vpop.f32.mrb[77].mxu0  ;;  %v9267_v53 = vmul.f32 %v9105_v7, %v9182_v12  ;;  %v9296_v12 = vmul.f32 %v9113_v51, %v9203_v62  ;;  %v9728_v51 = vld [vmem:[#allocation57_spill] sm:$0xff] }
 0x6d1   : > { %v3715_v26 = vpop.f32.mrb[69].mxu1  ;;  %v4015_v38 = vadd.f32 %v4014_v18, %v9123_v42  ;;  %v6041_v30 = vpop.f32.mrb[78].mxu0  ;;  %v9277_v42 = vmul.f32 %v9107_v11, %v9189_v3  ;;  %v9314_v62 = vmul.f32 %v9728_v51, %v3709_v5  ;;  %v9732_v18 = vld [vmem:[#allocation59_spill] sm:$0xff] }
 0x6d2   : > { %v4175_v43 = vadd.f32 %v4159_v57, %v4023_v60  ;;  %v9269_v59 = vpop.f32.mrb[70].mxu1  ;;  %v4026_v29 = vadd.f32 %v6041_v30, %v9145_v8  ;;  %v4017_v21 = vpop.f32.mrb[79].mxu0  ;;  %v9289_v8 = vmul.f32 %v9111_v58, %v9196_v35  ;;  %v9726_v58 = vld [vmem:[#allocation55_spill] sm:$0xff] }
 0x6d3   : > { %v4173_v45 = vadd.f32 %v4157_v31, %v4015_v38  ;;  %v3719_v7 = vpop.f32.mrb[71].mxu1  ;;  %v4018_v49 = vadd.f32 %v4017_v21, %v9127_v37  ;;  %v4252_v11 = vpop.permute.xlu0 %4251  ;;  %v9300_v37 = vld [vmem:[%s855_s24] ss:$0 sm:$0xff]  ;;  %v9307_v3 = vmul.f32 %v9726_v58, %v9210_v20  ;;  %v9729_v20 = vld [vmem:[#allocation56_spill] sm:$0xff] }
 0x6d4   : > { %v4287_v17 = vadd.f32 %v4271_v41, %v4175_v43  ;;  %v4176_v27 = vadd.f32 %v4160_v16, %v4026_v29  ;;  %v9303_v32 = vmul.f32 %v4252_v11, %v9208_v36  ;;  %v9318_v41 = vld [vmem:[%s863_s30] ss:$0 sm:$0xff]  ;;  %v9323_v31 = vmul.f32 %v9729_v20, %v3715_v26 }
 0x6d5   : > { %v4285_v47 = vadd.f32 %v4269_v19, %v4173_v45  ;;  %v4174_v33 = vadd.f32 %v4158_v39, %v4018_v49  ;;  %v9731_v16 = vld [vmem:[#allocation61_spill] sm:$0xff] }
 0x6d6   : > { %v4310_v13 = vadd.f32 %v9281_v4, %v4287_v17  ;;  %v4288_v35 = vadd.f32 %v4272_v9, %v4176_v27  ;;  %v9329_v23 = vmul.f32 %v9731_v16, %v3719_v7  ;;  %v9733_v27 = vld [vmem:[#allocation63_spill] sm:$0xff] }
 0x6d7   : > { %v4308_v22 = vadd.f32 %v9281_v4, %v4285_v47  ;;  %v4286_v36 = vadd.f32 %v4270_v56, %v4174_v33  ;;  %v6044_v19 = vpop.f32.mrb[80].mxu0  ;;  %v4262_v15 = vpop.permute.xlu0 %4261 }
 0x6d8   : > { %v4333_v14 = vmul.f32 %v9300_v37, %v4310_v13  ;;  %v4311_v9 = vadd.f32 %v9281_v4, %v4288_v35  ;;  %v5716_v39 = vpop.f32.mrb[72].mxu1  ;;  %v4039_v28 = vadd.f32 %v6044_v19, %v9730_v6  ;;  %v4030_v57 = vpop.f32.mrb[81].mxu0  ;;  %v6620_v19 = vld [vmem:[#allocation2 + $0x10] sm:$0xff] }
 0x6d9   : > { %v4331_v5 = vmul.f32 %v9300_v37, %v4308_v22  ;;  %v4309_v60 = vadd.f32 %v9281_v4, %v4286_v36  ;;  %v5717_v56 = vpop.f32.mrb[73].mxu1  ;;  %v4031_v38 = vadd.f32 %v4030_v57, %v9732_v18  ;;  %v6045_v30 = vpop.f32.mrb[82].mxu0 }
 0x6da   : > { %v4356_v26 = vadd.f32 %v9318_v41, %v4333_v14  ;;  %v4334_v43 = vmul.f32 %v9300_v37, %v4311_v9  ;;  %v4179_v29 = vadd.f32 %v4163_v40, %v4039_v28  ;;  %v5718_v21 = vadd.f32 %v5717_v56, %v5716_v39  ;;  %v5719_v45 = vpop.f32.mrb[74].mxu1  ;;  %v4033_v49 = vpop.f32.mrb[83].mxu0  ;;  %v9734_v56 = vld [vmem:[#allocation58_spill] sm:$0xff] }
 0x6db   : > { %v4354_v61 = vadd.f32 %v9318_v41, %v4331_v5  ;;  %v4332_v17 = vmul.f32 %v9300_v37, %v4309_v60  ;;  %v4177_v7 = vadd.f32 %v9244_v10, %v4031_v38  ;;  %v4042_v11 = vadd.f32 %v6045_v30, %v9733_v27  ;;  %v5720_v47 = vpop.f32.mrb[75].mxu1  ;;  %v9342_v40 = vpop.permute.xlu1 %4256  ;;  %v6623_v30 = vld [vmem:[#allocation2 + $0x8] sm:$0xff] }
 0x6dc   : > { %v4372_v33 = vmax.f32 %v4356_v26, 0.0  ;;  %v4357_v58 = vadd.f32 %v9318_v41, %v4334_v43  ;;  %v4291_v13 = vadd.f32 %v9254_v44, %v4179_v29  ;;  %v3910_v35 = vadd.f32 %v9217_v34, %v5718_v21  ;;  %v6621_v44 = vld [vmem:[#allocation2] sm:$0xff]  ;;  %v9735_v29 = vld [vmem:[#allocation48_spill] sm:$0xff] }
 0x6dd   : > { %v4370_v51 = vmax.f32 %v4354_v61, 0.0  ;;  %v4355_v22 = vadd.f32 %v9318_v41, %v4332_v17  ;;  %v4289_v36 = vadd.f32 %v9235_v63, %v4177_v7  ;;  %v4180_v10 = vadd.f32 %v9267_v53, %v4042_v11  ;;  %v6622_v63 = vld [vmem:[#allocation2 + $0x18] sm:$0xff] }
 0x6de   : > { %v9347_v14 = vadd.f32 %v6620_v19, %v4372_v33  ;;  %v4373_v20 = vmax.f32 %v4357_v58, 0.0  ;;  %v4314_v9 = vadd.f32 %v9281_v4, %v4291_v13  ;;  %v9350_v39 = vmul.f32 %v4262_v15, %v3910_v35  ;;  %v9736_v7 = vld [vmem:[#allocation64_spill] sm:$0xff]  ;;  %v9737_v35 = vld [vmem:[#allocation49_spill] sm:$0xff] }
 0x6df   : > { %v9352_v34 = vadd.f32 %v6621_v44, %v4370_v51  ;;  %v4371_v6 = vmax.f32 %v4355_v22, 0.0  ;;  %v4312_v28 = vadd.f32 %v9281_v4, %v4289_v36  ;;  %v4292_v57 = vadd.f32 %v9257_v46, %v4180_v10  ;;  %v6048_v5 = vpop.f32.mrb[84].mxu0 }
 0x6e0   : > { %4404 = vst [vmem:[#allocation2 + $0x10] sm:$0xff] %v9347_v14  ;;  %v9357_v53 = vadd.f32 %v6622_v63, %v4373_v20  ;;  %v4337_v16 = vmul.f32 %v9300_v37, %v4314_v9  ;;  %v5721_v60 = vadd.f32 %v5720_v47, %v5719_v45  ;;  %v4034_v18 = vadd.f32 %v4033_v49, %v9734_v56  ;;  %v4046_v38 = vpop.f32.mrb[85].mxu0  ;;  %v4267_v47 = vpop.permute.xlu1 %4266  ;;  %v6624_v9 = vld [vmem:[#allocation2 + $0x30] sm:$0xff] }
 0x6e1   : > { %4402 = vst [vmem:[#allocation2] sm:$0xff] %v9352_v34  ;;  %v9362_v26 = vadd.f32 %v6623_v30, %v4371_v6  ;;  %v4335_v43 = vmul.f32 %v9300_v37, %v4312_v28  ;;  %v4315_v46 = vadd.f32 %v9281_v4, %v4292_v57  ;;  %v4055_v21 = vadd.f32 %v6048_v5, %v9735_v29  ;;  %v6049_v61 = vpop.f32.mrb[86].mxu0  ;;  %v9738_v28 = vld [vmem:[#allocation47_spill] sm:$0xff]  ;;  %v6625_v5 = vld [vmem:[#allocation2 + $0x20] sm:$0xff] }
 0x6e2   : > { %4405 = vst [vmem:[#allocation2 + $0x18] sm:$0xff] %v9357_v53  ;;  %v4360_v17 = vadd.f32 %v9318_v41, %v4337_v16  ;;  %v3913_v45 = vadd.f32 %v9221_v1, %v5721_v60  ;;  %v4178_v49 = vadd.f32 %v9248_v24, %v4034_v18  ;;  %v4047_v27 = vadd.f32 %v4046_v38, %v9736_v7  ;;  %v4049_v11 = vpop.f32.mrb[87].mxu0  ;;  %v6626_v38 = vld [vmem:[#allocation2 + $0x38] sm:$0xff] }
 0x6e3   : > { %4403 = vst [vmem:[#allocation2 + $0x8] sm:$0xff] %v9362_v26  ;;  %v4358_v33 = vadd.f32 %v9318_v41, %v4335_v43  ;;  %v4338_v58 = vmul.f32 %v9300_v37, %v4315_v46  ;;  %v4183_v13 = vadd.f32 %v9296_v12, %v4055_v21  ;;  %v4058_v15 = vadd.f32 %v6049_v61, %v9737_v35  ;;  %v6627_v35 = vld [vmem:[#allocation2 + $0x28] sm:$0xff] }
 0x6e4   : > { %v4376_v51 = vmax.f32 %v4360_v17, 0.0  ;;  %v4284_v22 = vmul.f32 %v4267_v47, %v3913_v45  ;;  %v4290_v1 = vadd.f32 %v9240_v0, %v4178_v49  ;;  %v4181_v24 = vadd.f32 %v9277_v42, %v4047_v27 }
 0x6e5   : > { %v4374_v36 = vmax.f32 %v4358_v33, 0.0  ;;  %v4361_v10 = vadd.f32 %v9318_v41, %v4338_v58  ;;  %v4295_v19 = vadd.f32 %v9285_v54, %v4183_v13  ;;  %v4184_v20 = vadd.f32 %v9307_v3, %v4058_v15 }
 0x6e6   : > { %v9382_v44 = vadd.f32 %v6624_v9, %v4376_v51  ;;  %v4313_v12 = vadd.f32 %v9281_v4, %v4290_v1  ;;  %v4293_v6 = vadd.f32 %v9263_v2, %v4181_v24  ;;  %v4050_v57 = vadd.f32 %v4049_v11, %v9738_v28  ;;  %v6628_v1 = vld [vmem:[#allocation2 + $0x50] sm:$0xff] }
 0x6e7   : > { %v9387_v0 = vadd.f32 %v6625_v5, %v4374_v36  ;;  %v4377_v42 = vmax.f32 %v4361_v10, 0.0  ;;  %v4318_v63 = vadd.f32 %v9281_v4, %v4295_v19  ;;  %v4296_v16 = vadd.f32 %v9292_v52, %v4184_v20  ;;  %v6052_v54 = vpop.f32.mrb[88].mxu0  ;;  %v9739_v9 = vld [vmem:[#allocation51_spill] sm:$0xff]  ;;  %v9740_v5 = vld [vmem:[#allocation50_spill] sm:$0xff] }
 0x6e8   : > { %4408 = vst [vmem:[#allocation2 + $0x30] sm:$0xff] %v9382_v44  ;;  %v4336_v3 = vmul.f32 %v9300_v37, %v4313_v12  ;;  %v4316_v60 = vadd.f32 %v9281_v4, %v4293_v6  ;;  %v4182_v56 = vadd.f32 %v9289_v8, %v4050_v57  ;;  %v4071_v2 = vadd.f32 %v6052_v54, %v9250_v55  ;;  %v4062_v18 = vpop.f32.mrb[89].mxu0  ;;  %v6630_v6 = vld [vmem:[#allocation2 + $0x58] sm:$0xff] }
 0x6e9   : > { %4406 = vst [vmem:[#allocation2 + $0x20] sm:$0xff] %v9387_v0  ;;  %v9397_v30 = vadd.f32 %v6626_v38, %v4377_v42  ;;  %v4341_v43 = vmul.f32 %v9300_v37, %v4318_v63  ;;  %v4319_v52 = vadd.f32 %v9281_v4, %v4296_v16  ;;  %v4063_v46 = vadd.f32 %v4062_v18, %v9215_v25  ;;  %v6053_v29 = vpop.f32.mrb[90].mxu0 }
 0x6ea   : > { %v4359_v21 = vadd.f32 %v9318_v41, %v4336_v3  ;;  %v4339_v61 = vmul.f32 %v9300_v37, %v4316_v60  ;;  %v4294_v8 = vadd.f32 %v9273_v48, %v4182_v56  ;;  %v4187_v55 = vadd.f32 %v9323_v31, %v4071_v2  ;;  %v4065_v17 = vpop.f32.mrb[91].mxu0  ;;  %v6631_v56 = vld [vmem:[#allocation2 + $0x48] sm:$0xff] }
 0x6eb   : > { %4409 = vst [vmem:[#allocation2 + $0x38] sm:$0xff] %v9397_v30  ;;  %v4364_v45 = vadd.f32 %v9318_v41, %v4341_v43  ;;  %v4342_v49 = vmul.f32 %v9300_v37, %v4319_v52  ;;  %v4185_v7 = vadd.f32 %v9311_v50, %v4063_v46  ;;  %v4074_v25 = vadd.f32 %v6053_v29, %v9269_v59  ;;  %v6632_v52 = vld [vmem:[#allocation2 + $0x70] sm:$0xff] }
 0x6ec   : > { %v4375_v27 = vmax.f32 %v4359_v21, 0.0  ;;  %v4362_v11 = vadd.f32 %v9318_v41, %v4339_v61  ;;  %v4317_v47 = vadd.f32 %v9281_v4, %v4294_v8  ;;  %v4299_v48 = vadd.f32 %v9350_v39, %v4187_v55  ;;  %v6634_v55 = vld [vmem:[#allocation2 + $0x78] sm:$0xff] }
 0x6ed   : > { %v4380_v33 = vmax.f32 %v4364_v45, 0.0  ;;  %v4365_v31 = vadd.f32 %v9318_v41, %v4342_v49  ;;  %v4297_v58 = vadd.f32 %v9303_v32, %v4185_v7  ;;  %v4188_v13 = vadd.f32 %v9329_v23, %v4074_v25  ;;  %v6629_v32 = vld [vmem:[#allocation2 + $0x40] sm:$0xff]  ;;  %v6635_v7 = vld [vmem:[#allocation2 + $0x68] sm:$0xff] }
 0x6ee   : > { %v9417_v15 = vadd.f32 %v6627_v35, %v4375_v27  ;;  %v4378_v50 = vmax.f32 %v4362_v11, 0.0  ;;  %v4340_v59 = vmul.f32 %v9300_v37, %v4317_v47  ;;  %v4322_v51 = vadd.f32 %v9281_v4, %v4299_v48  ;;  %v6636_v11 = vld [vmem:[#allocation21] sm:$0xff] (!%p5529_p4)   ;;  %v6639_v47 = vld [vmem:[#allocation21 + $0x18] sm:$0xff] (!%p5529_p4)  }
 0x6ef   : > { %v9421_v24 = vadd.f32 %v6628_v1, %v4380_v33  ;;  %v4381_v36 = vmax.f32 %v4365_v31, 0.0  ;;  %v4320_v39 = vadd.f32 %v9281_v4, %v4297_v58  ;;  %v4300_v10 = vadd.f32 %v4284_v22, %v4188_v13  ;;  %v6642_v31 = vld [vmem:[#allocation21 + $0x30] sm:$0xff] (!%p5529_p4)   ;;  %v4422_v13 = vld [vmem:[%s9742_s22] sm:$0xff] (!%p5529_p4)  ;;  %v6648_v1 = vld [vmem:[#allocation24 + $0x20] sm:$0xff] (!%p5529_p4)  }
 0x6f0   : > { %4407 = vst [vmem:[#allocation2 + $0x28] sm:$0xff] %v9417_v15  ;;  %v9425_v19 = vadd.f32 %v6629_v32, %v4378_v50  ;;  %v4363_v23 = vadd.f32 %v9318_v41, %v4340_v59  ;;  %v4345_v20 = vmul.f32 %v9300_v37, %v4322_v51  ;;  %v4066_v12 = vadd.f32 %v4065_v17, %v9739_v9  ;;  %v6643_v35 = vld [vmem:[#allocation21 + $0x38] sm:$0xff] (!%p5529_p4)   ;;  %v6645_v50 = vld [vmem:[#allocation24 + $0x8] sm:$0xff] (!%p5529_p4)  }
 0x6f1   : > { %4412 = vst [vmem:[#allocation2 + $0x50] sm:$0xff] %v9421_v24  ;;  %v9431_v28 = vadd.f32 %v6630_v6, %v4381_v36  ;;  %v4343_v57 = vmul.f32 %v9300_v37, %v4320_v39  ;;  %v4323_v22 = vadd.f32 %v9281_v4, %v4300_v10  ;;  %v4282_v42 = vmul.f32 %v9342_v40, %v9740_v5  ;;  %v6646_v59 = vld [vmem:[#allocation24 + $0x10] sm:$0xff] (!%p5529_p4)   ;;  %v6647_v51 = vld [vmem:[#allocation24 + $0x18] sm:$0xff] (!%p5529_p4)   ;;  %v6656_v6 = vld [vmem:[#allocation27 + $0x20] sm:$0xff] (!%p5529_p4)  }
 0x6f2   : > { %4410 = vst [vmem:[#allocation2 + $0x40] sm:$0xff] %v9425_v19  ;;  %v4379_v63 = vmax.f32 %v4363_v23, 0.0  ;;  %v4368_v16 = vadd.f32 %v9318_v41, %v4345_v20  ;;  %v4186_v54 = vadd.f32 %v9314_v62, %v4066_v12  ;;  %v6633_v62 = vld [vmem:[#allocation2 + $0x60] sm:$0xff]  ;;  %v7172_v27 = vmov (!%p5529_p4), 0.0|0.0   ;;  %v6652_v23 = vld [vmem:[#allocation27] sm:$0xff] (!%p5529_p4)   ;;  %v6653_v20 = vld [vmem:[#allocation27 + $0x8] sm:$0xff] (!%p5529_p4)  }
 0x6f3   : > { %4413 = vst [vmem:[#allocation2 + $0x58] sm:$0xff] %v9431_v28  ;;  %v4366_v3 = vadd.f32 %v9318_v41, %v4343_v57  ;;  %v4346_v60 = vmul.f32 %v9300_v37, %v4323_v22  ;;  %6181 = vmatprep.subr.bf16.mxu0 (!%p5529_p4), %v7172_v27  ;;  %v6197_v33 = vpack.c.bf16 (!%p5529_p4), %v9431_v28, %v9421_v24  ;;  %v6649_v24 = vld [vmem:[#allocation24 + $0x28] sm:$0xff] (!%p5529_p4)   ;;  %v6650_v32 = vld [vmem:[#allocation24 + $0x30] sm:$0xff] (!%p5529_p4)   ;;  %v6655_v12 = vld [vmem:[#allocation27 + $0x18] sm:$0xff] (!%p5529_p4)  }
 0x6f4   : > { %v4395_v2 = vadd.f32 %v6631_v56, %v4379_v63  ;;  %v4384_v18 = vmax.f32 %v4368_v16, 0.0  ;;  %v4298_v38 = vadd.f32 %v4282_v42, %v4186_v54  ;;  %v6654_v9 = vld [vmem:[#allocation27 + $0x10] sm:$0xff] (!%p5529_p4)   ;;  %v6657_v28 = vld [vmem:[#allocation27 + $0x28] sm:$0xff] (!%p5529_p4)   ;;  %v5530_v57 = vld [vmem:[#allocation22] ss:$0 sm:$0xff] (!%p5529_p4) }
 0x6f5   : > { %v4382_v43 = vmax.f32 %v4366_v3, 0.0  ;;  %v4369_v40 = vadd.f32 %v9318_v41, %v4346_v60  ;;  %v6658_v60 = vld [vmem:[#allocation27 + $0x30] sm:$0xff] (!%p5529_p4)   ;;  %v6659_v56 = vld [vmem:[#allocation27 + $0x38] sm:$0xff] (!%p5529_p4)  }
 0x6f6   : > { %4411 = vst [vmem:[#allocation2 + $0x48] sm:$0xff] %v4395_v2  ;;  %v9444_v46 = vadd.f32 %v6632_v52, %v4384_v18  ;;  %v4321_v29 = vadd.f32 %v9281_v4, %v4298_v38  ;;  %v6182_v4 = vpack.c.bf16 (!%p5529_p4), %v9362_v26, %v9352_v34  ;;  %v6637_v34 = vld [vmem:[#allocation21 + $0x8] sm:$0xff] (!%p5529_p4)   ;;  %v6188_v26 = vpack.c.bf16 (!%p5529_p4), %v9417_v15, %v9387_v0  ;;  %v6640_v0 = vld [vmem:[#allocation21 + $0x20] sm:$0xff] (!%p5529_p4)  }
 0x6f7   : > { %v4398_v21 = vadd.f32 %v6633_v62, %v4382_v43  ;;  %v4385_v61 = vmax.f32 %v4369_v40, 0.0  ;;  %v6194_v48 = vpack.c.bf16 (!%p5529_p4), %v4395_v2, %v9425_v19  ;;  %v6644_v15 = vld [vmem:[#allocation24] sm:$0xff] (!%p5529_p4)   ;;  %v6651_v19 = vld [vmem:[#allocation24 + $0x38] sm:$0xff] (!%p5529_p4)  }
 0x6f8   : > { %4416 = vst [vmem:[#allocation2 + $0x70] sm:$0xff] %v9444_v46  ;;  %v4344_v8 = vmul.f32 %v9300_v37, %v4321_v29  ;;  %6183 = vmatpush3.bf16.msra.mxu0 (!%p5529_p4), %v6182_v4  ;;  %v6185_v37 = vpack.c.bf16 (!%p5529_p4), %v9357_v53, %v9347_v14  ;;  %v6638_v14 = vld [vmem:[#allocation21 + $0x10] sm:$0xff] (!%p5529_p4)   ;;  %v6191_v53 = vpack.c.bf16 (!%p5529_p4), %v9397_v30, %v9382_v44  ;;  %v6641_v44 = vld [vmem:[#allocation21 + $0x28] sm:$0xff] (!%p5529_p4)   ;;  %v5539_v2 = vld [vmem:[#allocation25] ss:$0 sm:$0xff] (!%p5529_p4) }
 0x6f9   : > { %4414 = vst [vmem:[#allocation2 + $0x60] sm:$0xff] %v4398_v21  ;;  %v4401_v17 = vadd.f32 %v6634_v55, %v4385_v61  ;;  %6184 = vmatprep.subr.bf16.mxu0 (!%p5529_p4), %v7172_v27  ;;  %v5548_v62 = vld [vmem:[#allocation28] ss:$0 sm:$0xff] (!%p5529_p4) }
 0x6fa   : > { %v4367_v45 = vadd.f32 %v9318_v41, %v4344_v8  ;;  %4421 = sbr.rel (%p5529_p4) target bundleno = 2681 (0xa79), region = 164  ;;  %v7174_v41 = vmov (!%p5529_p4), 0.0  }
 0x6fb   : > { %4417 = vst [vmem:[#allocation2 + $0x78] sm:$0xff] %v4401_v17  ;;  %6086 = vmatprep.mubr.msk.f32.mxu0 (!%p5529_p4), %vm7173_vm5, %v7174_v41  ;;  %6089 = vmatprep.subr.bf16.mxu1 (!%p5529_p4), %v7174_v41  ;;  %v6203_v58 = vpack.c.bf16 (!%p5529_p4), %v4401_v17, %v9444_v46 }
 0x6fc   : > { %v4383_v49 = vmax.f32 %v4367_v45, 0.0  ;;  %6105 = vmatprep.mubr.msk.bf16.mxu1 (!%p5529_p4), %vm7173_vm5, %v7174_v41  ;;  %6090 = vmatpush3.bf16.msra.mxu1 (!%p5529_p4), %v6636_v11 }
 0x6fd   : > { %6186 = vmatpush3.bf16.msra.mxu0 (!%p5529_p4), %v6185_v37  ;;  %6091 = vmatprep.subr.bf16.mxu1 (!%p5529_p4), %v7174_v41 }
 0x6fe   : > { %v4399_v25 = vadd.f32 %v6635_v7, %v4383_v49  ;;  %6187 = vmatprep.subr.bf16.mxu0 (!%p5529_p4), %v7172_v27 }
 0x700   : > { %4415 = vst [vmem:[#allocation2 + $0x68] sm:$0xff] %v4399_v25  ;;  %6092 = vmatpush3.bf16.msra.mxu1 (!%p5529_p4), %v6637_v34  ;;  %v6200_v30 = vpack.c.bf16 (!%p5529_p4), %v4399_v25, %v4398_v21 }
 0x701   : > { %6189 = vmatpush3.bf16.msra.mxu0 %v6188_v26  ;;  %6093 = vmatprep.subr.bf16.mxu1 %v7174_v41 }
 0x702   : > { %6190 = vmatprep.subr.bf16.mxu0 %v7172_v27 }
 0x704   : > { %6094 = vmatpush3.bf16.msra.mxu1 %v6638_v14 }
 0x705   : > { %6192 = vmatpush3.bf16.msra.mxu0 %v6191_v53  ;;  %6095 = vmatprep.subr.bf16.mxu1 %v7174_v41 }
 0x706   : > { %6193 = vmatprep.subr.bf16.mxu0 %v7172_v27 }
 0x708   : > { %6096 = vmatpush3.bf16.msra.mxu1 %v6639_v47 }
 0x709   : > { %6195 = vmatpush3.bf16.msra.mxu0 %v6194_v48  ;;  %6097 = vmatprep.subr.bf16.mxu1 %v7174_v41 }
 0x70a   : > { %6196 = vmatprep.subr.bf16.mxu0 %v7172_v27 }
 0x70c   : > { %6098 = vmatpush3.bf16.msra.mxu1 %v6640_v0 }
 0x70d   : > { %6198 = vmatpush3.bf16.msra.mxu0 %v6197_v33  ;;  %6099 = vmatprep.subr.bf16.mxu1 %v7174_v41 }
 0x70e   : > { %6199 = vmatprep.subr.bf16.mxu0 %v7172_v27 }
 0x710   : > { %6100 = vmatpush3.bf16.msra.mxu1 %v6641_v44 }
 0x711   : > { %6201 = vmatpush3.bf16.msra.mxu0 %v6200_v30  ;;  %6101 = vmatprep.subr.bf16.mxu1 %v7174_v41 }
 0x712   : > { %6202 = vmatprep.subr.bf16.mxu0 %v7172_v27 }
 0x714   : > { %6102 = vmatpush3.bf16.msra.mxu1 %v6642_v31 }
 0x715   : > { %6204 = vmatpush3.bf16.msra.mxu0 %v6203_v58  ;;  %6103 = vmatprep.subr.bf16.mxu1 %v7174_v41 }
 0x716   : > { %6109 = vmatprep.subr.bf16.mxu0 %v7174_v41 }
 0x718   : > { %6087 = vmatmul.mubr.f32.vlgmr.msra.gmra.mrb[0].mxu0 %v4422_v13  ;;  %6104 = vmatpush3.bf16.msra.mxu1 %v6643_v35 }
 0x719   : > { %6125 = vmatprep.mubr.msk.bf16.mxu0 %vm7173_vm5, %v7174_v41  ;;  %6129 = vmatprep.subr.bf16.mxu1 %v7174_v41 }
 0x71a   : > { %6110 = vmatpush3.bf16.msra.mxu0 %v6644_v15 }
 0x71b   : > { %6111 = vmatprep.subr.bf16.mxu0 %v7174_v41 }
 0x71e   : > { %6112 = vmatpush3.bf16.msra.mxu0 %v6645_v50 }
 0x71f   : > { %6113 = vmatprep.subr.bf16.mxu0 %v7174_v41 }
 0x722   : > { %6114 = vmatpush3.bf16.msra.mxu0 %v6646_v59 }
 0x723   : > { %6115 = vmatprep.subr.bf16.mxu0 %v7174_v41 }
 0x726   : > { %6116 = vmatpush3.bf16.msra.mxu0 %v6647_v51 }
 0x727   : > { %6117 = vmatprep.subr.bf16.mxu0 %v7174_v41 }
 0x72a   : > { %6118 = vmatpush3.bf16.msra.mxu0 %v6648_v1 }
 0x72b   : > { %6119 = vmatprep.subr.bf16.mxu0 %v7174_v41 }
 0x72e   : > { %6120 = vmatpush3.bf16.msra.mxu0 %v6649_v24 }
 0x72f   : > { %6121 = vmatprep.subr.bf16.mxu0 %v7174_v41 }
 0x732   : > { %6122 = vmatpush3.bf16.msra.mxu0 %v6650_v32 }
 0x733   : > { %6123 = vmatprep.subr.bf16.mxu0 %v7174_v41 }
 0x736   : > { %6124 = vmatpush3.bf16.msra.mxu0 %v6651_v19 }
 0x7eb   : > { %v4489_v36 = vpop.f32.mrb[0].mxu0 }
 0x7ec   : > { %v4493_v39 = vpack.c.bf16 %v4489_v36, %v4489_v36  ;;  %v6088_v10 = vpop.f32.mrb[1].mxu0 }
 0x7ee   : > { %6106 = vmatmul.mubr.bf16.vlgmr.msra.gmra.mrb[0].mxu1 %v4493_v39 }
 0x7ef   : > { %6145 = vmatprep.mubr.msk.bf16.mxu1 %vm7173_vm5, %v7174_v41  ;;  %6130 = vmatpush3.bf16.msra.mxu1 %v6652_v23 }
 0x7f0   : > { %6131 = vmatprep.subr.bf16.mxu1 %v7174_v41 }
 0x7f3   : > { %6132 = vmatpush3.bf16.msra.mxu1 %v6653_v20 }
 0x7f4   : > { %6133 = vmatprep.subr.bf16.mxu1 %v7174_v41 }
 0x7f7   : > { %6134 = vmatpush3.bf16.msra.mxu1 %v6654_v9 }
 0x7f8   : > { %6135 = vmatprep.subr.bf16.mxu1 %v7174_v41 }
 0x7fb   : > { %6136 = vmatpush3.bf16.msra.mxu1 %v6655_v12 }
 0x7fc   : > { %6137 = vmatprep.subr.bf16.mxu1 %v7174_v41 }
 0x7ff   : > { %6138 = vmatpush3.bf16.msra.mxu1 %v6656_v6 }
 0x800   : > { %6139 = vmatprep.subr.bf16.mxu1 %v7174_v41 }
 0x803   : > { %6140 = vmatpush3.bf16.msra.mxu1 %v6657_v28 }
 0x804   : > { %6141 = vmatprep.subr.bf16.mxu1 %v7174_v41 }
 0x807   : > { %6142 = vmatpush3.bf16.msra.mxu1 %v6658_v60 }
 0x808   : > { %6143 = vmatprep.subr.bf16.mxu1 %v7174_v41 }
 0x80b   : > { %6144 = vmatpush3.bf16.msra.mxu1 %v6659_v56 }
 0x8c1   : > { %v4599_v22 = vpop.f32.mrb[0].mxu1 }
 0x8c2   : > { %v4600_v5 = vadd.f32 %v5530_v57, %v4599_v22  ;;  %v6107_v42 = vpop.f32.mrb[1].mxu1 }
 0x8c3   : > { %v4602_v63 = vpop.f32.mrb[2].mxu1 }
 0x8c4   : > { %v4605_v16 = vmax.f32 %v4600_v5, 0.0  ;;  %v6108_v54 = vpop.f32.mrb[3].mxu1 }
 0x8c6   : > { %v4606_v3 = vpack.c.bf16 %v4605_v16, %v4605_v16 }
 0x8c8   : > { %6126 = vmatmul.mubr.bf16.vlgmr.msra.gmra.mrb[4].mxu0 %v4606_v3 }
 0x99b   : > { %v4712_v18 = vpop.f32.mrb[4].mxu0 }
 0x99c   : > { %v4713_v38 = vadd.f32 %v5539_v2, %v4712_v18  ;;  %v6127_v43 = vpop.f32.mrb[5].mxu0 }
 0x99d   : > { %v4715_v40 = vpop.f32.mrb[6].mxu0 }
 0x99e   : > { %v4718_v52 = vmax.f32 %v4713_v38, 0.0  ;;  %v6128_v46 = vpop.f32.mrb[7].mxu0 }
 0x9a0   : > { %v4719_v29 = vpack.c.bf16 %v4718_v52, %v4718_v52 }
 0x9a2   : > { %6146 = vmatmul.mubr.bf16.vlgmr.msra.gmra.mrb[4].mxu1 %v4719_v29 }
 0xa75   : > { %v4825_v21 = vpop.f32.mrb[4].mxu1 }
 0xa76   : > { %v4826_v61 = vadd.f32 %v5548_v62, %v4825_v21  ;;  %v6147_v8 = vpop.f32.mrb[5].mxu1 }
 0xa77   : > { %v4828_v55 = vpop.f32.mrb[6].mxu1 }
 0xa78   : > { %4831 = vst [vmem:[%s9743_s6] sm:$0xff] %v4826_v61  ;;  %v6148_v17 = vpop.f32.mrb[7].mxu1 }
 0xa79 PF: > { %s9744_s0 = sld [smem:[#allocation45_spill]]  ;;  %s9745_s28 = sld [smem:[#allocation40_spill]] }
 0xa7a   : > { %s9746_s29 = sld [smem:[#allocation41_spill]]  ;;  %s9747_s6 = sld [smem:[#allocation46_spill]] }
 0xa7f   : > { %p52_p1 = scmp.ge.s32.totalorder %s9744_s0, 6  }
 0xa81   :  { %54 = sbr.rel (!%p52_p1) target bundleno = 38 (0x26), region = 336 }
 0xa88   :  { %4843 = vsyncpa [#allocation9], 1 }
 0xa89   :  { %4845 = vsyncpa [#allocation9 + $0x1], 1 }
 0xa8a   :  { %4846 = vsyncpa [#allocation11], 1 }
 0xa8b   :  { %4848 = vsyncpa [#allocation11 + $0x1], 1 }
 0xa8c   :  { %4849 = vsyncpa [#allocation14], 1 }
 0xa8d   :  { %4851 = vsyncpa [#allocation14 + $0x1], 1 }
 0xa8e   :  { %4852 = vsyncpa [#allocation17], 1 }
 0xa8f   :  { %4854 = vsyncpa [#allocation17 + $0x1], 1 }
 0xa90   :  { %4855 = vsyncpa [#allocation20], 1 }
 0xa91   :  { %4857 = vsyncpa [#allocation20 + $0x1], 1 }
 0xa92   :  { %4858 = vsyncpa [#allocation23], 1 }
 0xa93   :  { %4859 = vsyncpa [#allocation26], 1 }
 0xa94   :  { %4860 = vsyncpa [#allocation29], 1 }

</bundles_post_ra>
